<compile_context>
chip_gen: v5e
topology: v5e:2x2
jax: 0.10.0
libtpu: 0.0.40
codegen_flags: <defaults>
</compile_context>

<pallas_src>
import functools

import numpy as np

import jax
import jax.numpy as jnp
from jax.experimental import pallas as pl
from jax.experimental.pallas import tpu as pltpu


# ----------------------------- static model dims ------------------------------
K = 5                       # conv kernel size
H0 = W0 = 28                # input image
HP = 32                     # conv1 input height after pad=2 (width pad folded in weights)
C1 = 6                      # conv1 output channels
OH1 = OW1 = 28              # conv1 output spatial
PH1 = PW1 = 14              # after pool1
C2 = 16                     # conv2 output channels
OH2 = OW2 = 10              # conv2 output spatial
PH2 = PW2 = 5               # after pool2
FC1, FC2, FC3 = 120, 84, 10
NLANE = 128                 # lane-dense width for the final store
FCIN = PH2 * PW2 * C2       # 400 flattened features per image
ROW2 = PW2 * C2             # 80 = one pooled-conv2 row, (w, c) column order


# ----------------------------- fused Pallas kernel ----------------------------
def lenet5_kernel(x_ref, t1_ref, b1_ref, pr1_ref, pc1_ref,
                  t2_ref, b2_ref, pr2_ref, pc2_ref,
                  wf1_ref, bf1_ref, wf2_ref, bf2_ref, wf3_ref, bf3_ref,
                  out_ref, xpad_ref, fcin_ref, *, b_blk):
    f32 = jnp.float32
    dot = functools.partial(jnp.dot, preferred_element_type=f32)

    # conv1's pad=2 handled in-kernel: zero-filled, height-padded slab (width padding is
    # folded into the Toeplitz weights) -> no wrapper-side jnp.pad / extra HBM pass.
    xpad_ref[...] = jnp.zeros_like(xpad_ref)
    xpad_ref[:, 2:2 + H0, :] = x_ref[...]

    # Conv / pool stages per image (static unroll over the batch block). Intermediates
    # stay in vregs; only the batched-FC staging slab touches VMEM scratch.
    for b in range(b_blk):
        # conv1 (1->6, k5, pad2): 5 row-tap matmuls vs width-Toeplitz weights.
        # Result columns ordered (ow, co): col = ow*6 + co.
        acc1 = jnp.zeros((OH1, OW1 * C1), f32)
        for i in range(K):
            acc1 = acc1 + dot(xpad_ref[b, i:i + OH1, :], t1_ref[i])   # (28,28)@(28,168)
        h1 = jnp.maximum(acc1 + b1_ref[...], 0.0)                     # (28, 168)

        # avgpool 2x2 stride 2: row-pool @ h1 @ col-pool -> (14, 84)
        p1 = dot(pr1_ref[...], dot(h1, pc1_ref[...]))

        # conv2 (6->16, k5, valid): 5 row-tap matmuls, cols = ow*16 + co.
        acc2 = jnp.zeros((OH2, OW2 * C2), f32)
        for i in range(K):
            acc2 = acc2 + dot(p1[i:i + OH2, :], t2_ref[i])            # (10,84)@(84,160)
        h2 = jnp.maximum(acc2 + b2_ref[...], 0.0)                     # (10, 160)

        # avgpool 2x2 stride 2 -> (5, 80); stage flattened row b of the FC input slab.
        p2 = dot(pr2_ref[...], dot(h2, pc2_ref[...]))
        for h in range(PH2):
            fcin_ref[b:b + 1, h * ROW2:(h + 1) * ROW2] = p2[h:h + 1, :]

    # Batched FC tail: M = b_blk rows per matmul instead of per-image M = 1 matmuls.
    f1 = jnp.maximum(dot(fcin_ref[...], wf1_ref[...]) + bf1_ref[...], 0.0)   # (B, 120)
    f2 = jnp.maximum(dot(f1, wf2_ref[...]) + bf2_ref[...], 0.0)              # (B, 84)
    out_ref[:, 0, :] = dot(f2, wf3_ref[...]) + bf3_ref[...]                  # (B, 128)


# ----------------------------- one-time weight re-layout ----------------------
def _pool_mats(h, w, c):
    """2x2/stride-2 average pool as (h/2,h) row matrix and (w*c, w/2*c) col matrix."""
    pr = np.zeros((h // 2, h), np.float32)
    for ph in range(h // 2):
        pr[ph, 2 * ph] = 0.5
        pr[ph, 2 * ph + 1] = 0.5
    pc = np.zeros((w * c, (w // 2) * c), np.float32)
    for pw in range(w // 2):
        for d in (0, 1):
            for cc in range(c):
                pc[(2 * pw + d) * c + cc, pw * c + cc] = 0.5
    return pr, pc


def prepare_params(params):
    """Re-lay PyTorch-style parameters into the MXU-friendly constants consumed by the
    fused kernel. Runs once at init (hoisted out of the jitted hot path)."""
    w1, b1, w2, b2, wf1, bf1, wf2, bf2, wf3, bf3 = [np.asarray(p, np.float32) for p in params]

    # conv1 width-Toeplitz per row tap with the width pad=2 folded in:
    # t1[i, wr, ow*C1+co] = w1[co, 0, i, wr - ow + 2] for 0 <= wr - ow + 2 < 5.
    t1 = np.zeros((K, W0, OW1 * C1), np.float32)
    for i in range(K):
        for ow in range(OW1):
            for j in range(K):
                wr = ow + j - 2
                if 0 <= wr < W0:
                    t1[i, wr, ow * C1:(ow + 1) * C1] = w1[:, 0, i, j]
    b1r = np.tile(b1, OW1)[None, :]                                   # (1, 168)

    pr1, pc1 = _pool_mats(OH1, OW1, C1)                               # (14,28), (168,84)

    # conv2 width-Toeplitz: t2[i, w*C1+ci, ow*C2+co] = w2[co, ci, i, w-ow]
    t2 = np.zeros((K, PW1 * C1, OW2 * C2), np.float32)
    for i in range(K):
        for ow in range(OW2):
            for j in range(K):
                for ci in range(C1):
                    t2[i, (ow + j) * C1 + ci, ow * C2:(ow + 1) * C2] = w2[:, ci, i, j]
    b2r = np.tile(b2, OW2)[None, :]                                   # (1, 160)

    pr2, pc2 = _pool_mats(OH2, OW2, C2)                               # (5,10), (160,80)

    # FC1: fold torch Flatten index (c*25 + h*5 + w) into our staged (h, w, c) lane
    # order: wf1r[h*80 + w*16 + c, o] = wf1[o, c*25 + h*5 + w]   -> single (400, 120).
    wf1r = np.zeros((FCIN, FC1), np.float32)
    for h in range(PH2):
        for w in range(PW2):
            for c in range(C2):
                wf1r[h * ROW2 + w * C2 + c, :] = wf1[:, c * PH2 * PW2 + h * PW2 + w]
    bf1r = bf1[None, :]                                               # (1, 120)

    wf2m = np.ascontiguousarray(wf2.T)                                # (120, 84)
    bf2r = bf2[None, :]                                               # (1, 84)

    wf3m = np.zeros((FC2, NLANE), np.float32)                         # (84, 128)
    wf3m[:, :FC3] = wf3.T
    bf3r = np.zeros((1, NLANE), np.float32)
    bf3r[0, :FC3] = bf3

    consts = (t1, b1r, pr1, pc1, t2, b2r, pr2, pc2, wf1r, bf1r, wf2m, bf2r, wf3m, bf3r)
    return tuple(jnp.asarray(c) for c in consts)


# ----------------------------- forward wrapper ---------------------------------
def lenet5_forward(x, consts, b_blk=None):
    """x: (N, 1, 28, 28) NCHW float32 -> logits (N, 10). One fused, batch-blocked
    pallas_call; all layers run inside the kernel."""
    n = x.shape[0]
    if b_blk is None:
        # Batch-block up to 8 images per grid step (amortizes per-step overhead and
        # batches the FC tail) while keeping >= 2 grid steps whenever N >= 2 so v7x's
        # two TensorCores both get work. Raise the cap for large-batch serving.
        b_blk = max(1, min(8, pl.cdiv(n, 2)))
    nb = pl.cdiv(n, b_blk)
    n_pad = nb * b_blk

    xs = x[:, 0]                                                      # (N, 28, 28)
    if n_pad != n:
        xs = jnp.pad(xs, ((0, n_pad - n), (0, 0), (0, 0)))

    def const_spec(a):
        nd = a.ndim
        return pl.BlockSpec(a.shape, lambda i, _nd=nd: (0,) * _nd)    # VMEM-resident

    out = pl.pallas_call(
        functools.partial(lenet5_kernel, b_blk=b_blk),
        out_shape=jax.ShapeDtypeStruct((n_pad, 1, NLANE), jnp.float32),
        grid=(nb,),
        in_specs=[pl.BlockSpec((b_blk, H0, W0), lambda i: (i, 0, 0))]
                 + [const_spec(a) for a in consts],
        out_specs=pl.BlockSpec((b_blk, 1, NLANE), lambda i: (i, 0, 0)),
        scratch_shapes=[pltpu.VMEM((b_blk, HP, W0), jnp.float32),     # zero-padded input slab
                        pltpu.VMEM((b_blk, FCIN), jnp.float32)],      # batched FC staging slab
        compiler_params=pltpu.CompilerParams(dimension_semantics=("parallel",)),
    )(xs, *consts)
    return out[:n, 0, :FC3]


# ----------------------------- pure-JAX reference ------------------------------
def lenet5_ref(x, params):
    w1, b1, w2, b2, wf1, bf1, wf2, bf2, wf3, bf3 = params
    dn = ("NCHW", "OIHW", "NCHW")
    y = jax.lax.conv_general_dilated(x, w1, (1, 1), ((2, 2), (2, 2)), dimension_numbers=dn)
    y = jnp.maximum(y + b1[None, :, None, None], 0.0)
    y = jax.lax.reduce_window(y, 0.0, jax.lax.add, (1, 1, 2, 2), (1, 1, 2, 2), "VALID") / 4.0
    y = jax.lax.conv_general_dilated(y, w2, (1, 1), "VALID", dimension_numbers=dn)
    y = jnp.maximum(y + b2[None, :, None, None], 0.0)
    y = jax.lax.reduce_window(y, 0.0, jax.lax.add, (1, 1, 2, 2), (1, 1, 2, 2), "VALID") / 4.0
    y = y.reshape(y.shape[0], -1)
    y = jnp.maximum(y @ wf1.T + bf1, 0.0)
    y = jnp.maximum(y @ wf2.T + bf2, 0.0)
    return y @ wf3.T + bf3


# ----------------------------- main --------------------------------------------
def init_params(key):
    ks = jax.random.split(key, 10)
    s = 0.1
    w1 = s * jax.random.normal(ks[0], (6, 1, 5, 5), jnp.float32)
    b1 = s * jax.random.normal(ks[1], (6,), jnp.float32)
    w2 = s * jax.random.normal(ks[2], (16, 6, 5, 5), jnp.float32)
    b2 = s * jax.random.normal(ks[3], (16,), jnp.float32)
    wf1 = s * jax.random.normal(ks[4], (120, 400), jnp.float32)
    bf1 = s * jax.random.normal(ks[5], (120,), jnp.float32)
    wf2 = s * jax.random.normal(ks[6], (84, 120), jnp.float32)
    bf2 = s * jax.random.normal(ks[7], (84,), jnp.float32)
    wf3 = s * jax.random.normal(ks[8], (10, 84), jnp.float32)
    bf3 = s * jax.random.normal(ks[9], (10,), jnp.float32)
    return (w1, b1, w2, b2, wf1, bf1, wf2, bf2, wf3, bf3)


if __name__ == "__main__":
    key = jax.random.PRNGKey(0)
    pkey, xkey = jax.random.split(key)
    params = init_params(pkey)
    consts = prepare_params(params)          # one-time weight re-layout (not in hot path)

    # LeNet-5 input: 28x28 single-channel images (Linear(400) => 16*5*5 after the convs).
    # Batch 4 -> b_blk = 2, grid = 2: exercises both the batched-FC path and the grid loop.
    x = jax.random.normal(xkey, (4, 1, 28, 28), jnp.float32)

    fwd = jax.jit(lenet5_forward)
    out = jax.block_until_ready(fwd(x, consts))

    ref = jax.block_until_ready(jax.jit(lenet5_ref)(x, params))
    assert out.shape == (4, 10), out.shape
    assert jnp.allclose(out, ref, rtol=1e-3, atol=1e-3), float(jnp.max(jnp.abs(out - ref)))

    print("KERNEL_OK")
</pallas_src>

<mosaic_0001>
module attributes {stable_mosaic.version = 11 : i64} {
  func.func @lenet5_kernel(%arg0: i32, %arg1: memref<2x28x28xf32, #tpu.memory_space<vmem>>, %arg2: memref<5x28x168xf32, #tpu.memory_space<vmem>>, %arg3: memref<1x168xf32, #tpu.memory_space<vmem>>, %arg4: memref<14x28xf32, #tpu.memory_space<vmem>>, %arg5: memref<168x84xf32, #tpu.memory_space<vmem>>, %arg6: memref<5x84x160xf32, #tpu.memory_space<vmem>>, %arg7: memref<1x160xf32, #tpu.memory_space<vmem>>, %arg8: memref<5x10xf32, #tpu.memory_space<vmem>>, %arg9: memref<160x80xf32, #tpu.memory_space<vmem>>, %arg10: memref<400x120xf32, #tpu.memory_space<vmem>>, %arg11: memref<1x120xf32, #tpu.memory_space<vmem>>, %arg12: memref<120x84xf32, #tpu.memory_space<vmem>>, %arg13: memref<1x84xf32, #tpu.memory_space<vmem>>, %arg14: memref<84x128xf32, #tpu.memory_space<vmem>>, %arg15: memref<1x128xf32, #tpu.memory_space<vmem>>, %arg16: memref<2x1x128xf32, #tpu.memory_space<vmem>>, %arg17: memref<2x32x28xf32, #tpu.memory_space<vmem>>, %arg18: memref<2x400xf32, #tpu.memory_space<vmem>>) attributes {dimension_semantics = [#tpu.dimension_semantics<parallel>], iteration_bounds = array<i64: 2>, scalar_prefetch = 0 : i64, scratch_operands = 2 : i64, tpu.core_type = #tpu.core_type<tc>, window_params = [{transform_indices = @transform_0, window_bounds = array<i64: 2, 28, 28>}, {pipeline_mode = #tpu.pipeline_mode<synchronous>, transform_indices = @transform_1, window_bounds = array<i64: 5, 28, 168>}, {pipeline_mode = #tpu.pipeline_mode<synchronous>, transform_indices = @transform_2, window_bounds = array<i64: 1, 168>}, {pipeline_mode = #tpu.pipeline_mode<synchronous>, transform_indices = @transform_3, window_bounds = array<i64: 14, 28>}, {pipeline_mode = #tpu.pipeline_mode<synchronous>, transform_indices = @transform_4, window_bounds = array<i64: 168, 84>}, {pipeline_mode = #tpu.pipeline_mode<synchronous>, transform_indices = @transform_5, window_bounds = array<i64: 5, 84, 160>}, {pipeline_mode = #tpu.pipeline_mode<synchronous>, transform_indices = @transform_6, window_bounds = array<i64: 1, 160>}, {pipeline_mode = #tpu.pipeline_mode<synchronous>, transform_indices = @transform_7, window_bounds = array<i64: 5, 10>}, {pipeline_mode = #tpu.pipeline_mode<synchronous>, transform_indices = @transform_8, window_bounds = array<i64: 160, 80>}, {pipeline_mode = #tpu.pipeline_mode<synchronous>, transform_indices = @transform_9, window_bounds = array<i64: 400, 120>}, {pipeline_mode = #tpu.pipeline_mode<synchronous>, transform_indices = @transform_10, window_bounds = array<i64: 1, 120>}, {pipeline_mode = #tpu.pipeline_mode<synchronous>, transform_indices = @transform_11, window_bounds = array<i64: 120, 84>}, {pipeline_mode = #tpu.pipeline_mode<synchronous>, transform_indices = @transform_12, window_bounds = array<i64: 1, 84>}, {pipeline_mode = #tpu.pipeline_mode<synchronous>, transform_indices = @transform_13, window_bounds = array<i64: 84, 128>}, {pipeline_mode = #tpu.pipeline_mode<synchronous>, transform_indices = @transform_14, window_bounds = array<i64: 1, 128>}, {transform_indices = @transform_15, window_bounds = array<i64: 2, 1, 128>}]} {
    %cst = arith.constant 0.000000e+00 : f32
    %0 = vector.broadcast %cst : f32 to vector<2x32x28xf32>
    %c0 = arith.constant 0 : index
    %c0_0 = arith.constant 0 : index
    %c0_1 = arith.constant 0 : index
    %1 = vector.load %arg17[%c0, %c0_0, %c0_1] : memref<2x32x28xf32, #tpu.memory_space<vmem>>, vector<2x32x28xf32>
    tpu.vector_store %arg17[%c0, %c0_0, %c0_1], %0 {strides = array<i32>} : memref<2x32x28xf32, #tpu.memory_space<vmem>>, vector<2x32x28xf32>,
    %c0_2 = arith.constant 0 : index
    %c0_3 = arith.constant 0 : index
    %c0_4 = arith.constant 0 : index
    %2 = vector.load %arg1[%c0_2, %c0_3, %c0_4] : memref<2x28x28xf32, #tpu.memory_space<vmem>>, vector<2x28x28xf32>
    %c0_5 = arith.constant 0 : index
    %c2 = arith.constant 2 : index
    %c0_6 = arith.constant 0 : index
    %3 = vector.load %arg17[%c0_5, %c2, %c0_6] : memref<2x32x28xf32, #tpu.memory_space<vmem>>, vector<2x28x28xf32>
    tpu.vector_store %arg17[%c0_5, %c2, %c0_6], %2 {strides = array<i32>} : memref<2x32x28xf32, #tpu.memory_space<vmem>>, vector<2x28x28xf32>,
    %cst_7 = arith.constant 0.000000e+00 : f32
    %4 = vector.broadcast %cst_7 : f32 to vector<28x168xf32>
    %c0_8 = arith.constant 0 : index
    %c0_9 = arith.constant 0 : index
    %c0_10 = arith.constant 0 : index
    %5 = vector.load %arg17[%c0_8, %c0_9, %c0_10] : memref<2x32x28xf32, #tpu.memory_space<vmem>>, vector<1x28x28xf32>
    %6 = vector.shape_cast %5 : vector<1x28x28xf32> to vector<28x28xf32>
    %c0_11 = arith.constant 0 : index
    %c0_12 = arith.constant 0 : index
    %c0_13 = arith.constant 0 : index
    %7 = vector.load %arg2[%c0_11, %c0_12, %c0_13] : memref<5x28x168xf32, #tpu.memory_space<vmem>>, vector<1x28x168xf32>
    %8 = vector.shape_cast %7 : vector<1x28x168xf32> to vector<28x168xf32>
    %cst_14 = arith.constant dense<0.000000e+00> : vector<28x168xf32>
    %9 = tpu.matmul %6, %8, %cst_14 {dimension_numbers = #tpu.dot_dimension_numbers<[1], [0], [0], [1], [0, 0, 1, 1], [], []>} : vector<28x28xf32>, vector<28x168xf32>, vector<28x168xf32> -> vector<28x168xf32>
    %10 = arith.addf %4, %9 : vector<28x168xf32>
    %c0_15 = arith.constant 0 : index
    %c1 = arith.constant 1 : index
    %c0_16 = arith.constant 0 : index
    %11 = vector.load %arg17[%c0_15, %c1, %c0_16] : memref<2x32x28xf32, #tpu.memory_space<vmem>>, vector<1x28x28xf32>
    %12 = vector.shape_cast %11 : vector<1x28x28xf32> to vector<28x28xf32>
    %c1_17 = arith.constant 1 : index
    %c0_18 = arith.constant 0 : index
    %c0_19 = arith.constant 0 : index
    %13 = vector.load %arg2[%c1_17, %c0_18, %c0_19] : memref<5x28x168xf32, #tpu.memory_space<vmem>>, vector<1x28x168xf32>
    %14 = vector.shape_cast %13 : vector<1x28x168xf32> to vector<28x168xf32>
    %cst_20 = arith.constant dense<0.000000e+00> : vector<28x168xf32>
    %15 = tpu.matmul %12, %14, %cst_20 {dimension_numbers = #tpu.dot_dimension_numbers<[1], [0], [0], [1], [0, 0, 1, 1], [], []>} : vector<28x28xf32>, vector<28x168xf32>, vector<28x168xf32> -> vector<28x168xf32>
    %16 = arith.addf %10, %15 : vector<28x168xf32>
    %c0_21 = arith.constant 0 : index
    %c2_22 = arith.constant 2 : index
    %c0_23 = arith.constant 0 : index
    %17 = vector.load %arg17[%c0_21, %c2_22, %c0_23] : memref<2x32x28xf32, #tpu.memory_space<vmem>>, vector<1x28x28xf32>
    %18 = vector.shape_cast %17 : vector<1x28x28xf32> to vector<28x28xf32>
    %c2_24 = arith.constant 2 : index
    %c0_25 = arith.constant 0 : index
    %c0_26 = arith.constant 0 : index
    %19 = vector.load %arg2[%c2_24, %c0_25, %c0_26] : memref<5x28x168xf32, #tpu.memory_space<vmem>>, vector<1x28x168xf32>
    %20 = vector.shape_cast %19 : vector<1x28x168xf32> to vector<28x168xf32>
    %cst_27 = arith.constant dense<0.000000e+00> : vector<28x168xf32>
    %21 = tpu.matmul %18, %20, %cst_27 {dimension_numbers = #tpu.dot_dimension_numbers<[1], [0], [0], [1], [0, 0, 1, 1], [], []>} : vector<28x28xf32>, vector<28x168xf32>, vector<28x168xf32> -> vector<28x168xf32>
    %22 = arith.addf %16, %21 : vector<28x168xf32>
    %c0_28 = arith.constant 0 : index
    %c3 = arith.constant 3 : index
    %c0_29 = arith.constant 0 : index
    %23 = vector.load %arg17[%c0_28, %c3, %c0_29] : memref<2x32x28xf32, #tpu.memory_space<vmem>>, vector<1x28x28xf32>
    %24 = vector.shape_cast %23 : vector<1x28x28xf32> to vector<28x28xf32>
    %c3_30 = arith.constant 3 : index
    %c0_31 = arith.constant 0 : index
    %c0_32 = arith.constant 0 : index
    %25 = vector.load %arg2[%c3_30, %c0_31, %c0_32] : memref<5x28x168xf32, #tpu.memory_space<vmem>>, vector<1x28x168xf32>
    %26 = vector.shape_cast %25 : vector<1x28x168xf32> to vector<28x168xf32>
    %cst_33 = arith.constant dense<0.000000e+00> : vector<28x168xf32>
    %27 = tpu.matmul %24, %26, %cst_33 {dimension_numbers = #tpu.dot_dimension_numbers<[1], [0], [0], [1], [0, 0, 1, 1], [], []>} : vector<28x28xf32>, vector<28x168xf32>, vector<28x168xf32> -> vector<28x168xf32>
    %28 = arith.addf %22, %27 : vector<28x168xf32>
    %c0_34 = arith.constant 0 : index
    %c4 = arith.constant 4 : index
    %c0_35 = arith.constant 0 : index
    %29 = vector.load %arg17[%c0_34, %c4, %c0_35] : memref<2x32x28xf32, #tpu.memory_space<vmem>>, vector<1x28x28xf32>
    %30 = vector.shape_cast %29 : vector<1x28x28xf32> to vector<28x28xf32>
    %c4_36 = arith.constant 4 : index
    %c0_37 = arith.constant 0 : index
    %c0_38 = arith.constant 0 : index
    %31 = vector.load %arg2[%c4_36, %c0_37, %c0_38] : memref<5x28x168xf32, #tpu.memory_space<vmem>>, vector<1x28x168xf32>
    %32 = vector.shape_cast %31 : vector<1x28x168xf32> to vector<28x168xf32>
    %cst_39 = arith.constant dense<0.000000e+00> : vector<28x168xf32>
    %33 = tpu.matmul %30, %32, %cst_39 {dimension_numbers = #tpu.dot_dimension_numbers<[1], [0], [0], [1], [0, 0, 1, 1], [], []>} : vector<28x28xf32>, vector<28x168xf32>, vector<28x168xf32> -> vector<28x168xf32>
    %34 = arith.addf %28, %33 : vector<28x168xf32>
    %c0_40 = arith.constant 0 : index
    %c0_41 = arith.constant 0 : index
    %35 = vector.load %arg3[%c0_40, %c0_41] : memref<1x168xf32, #tpu.memory_space<vmem>>, vector<1x168xf32>
    %36 = vector.broadcast %35 : vector<1x168xf32> to vector<28x168xf32>
    %37 = arith.addf %34, %36 : vector<28x168xf32>
    %cst_42 = arith.constant 0.000000e+00 : f32
    %38 = vector.broadcast %cst_42 : f32 to vector<28x168xf32>
    %39 = arith.maximumf %37, %38 : vector<28x168xf32>
    %c0_43 = arith.constant 0 : index
    %c0_44 = arith.constant 0 : index
    %40 = vector.load %arg4[%c0_43, %c0_44] : memref<14x28xf32, #tpu.memory_space<vmem>>, vector<14x28xf32>
    %c0_45 = arith.constant 0 : index
    %c0_46 = arith.constant 0 : index
    %41 = vector.load %arg5[%c0_45, %c0_46] : memref<168x84xf32, #tpu.memory_space<vmem>>, vector<168x84xf32>
    %cst_47 = arith.constant dense<0.000000e+00> : vector<28x84xf32>
    %42 = tpu.matmul %39, %41, %cst_47 {dimension_numbers = #tpu.dot_dimension_numbers<[1], [0], [0], [1], [0, 0, 1, 1], [], []>} : vector<28x168xf32>, vector<168x84xf32>, vector<28x84xf32> -> vector<28x84xf32>
    %cst_48 = arith.constant dense<0.000000e+00> : vector<14x84xf32>
    %43 = tpu.matmul %40, %42, %cst_48 {dimension_numbers = #tpu.dot_dimension_numbers<[1], [0], [0], [1], [0, 0, 1, 1], [], []>} : vector<14x28xf32>, vector<28x84xf32>, vector<14x84xf32> -> vector<14x84xf32>
    %cst_49 = arith.constant 0.000000e+00 : f32
    %44 = vector.broadcast %cst_49 : f32 to vector<10x160xf32>
    %45 = vector.extract_strided_slice %43 {offsets = [0, 0], sizes = [10, 84], strides = [1, 1]} : vector<14x84xf32> to vector<10x84xf32>
    %c0_50 = arith.constant 0 : index
    %c0_51 = arith.constant 0 : index
    %c0_52 = arith.constant 0 : index
    %46 = vector.load %arg6[%c0_50, %c0_51, %c0_52] : memref<5x84x160xf32, #tpu.memory_space<vmem>>, vector<1x84x160xf32>
    %47 = vector.shape_cast %46 : vector<1x84x160xf32> to vector<84x160xf32>
    %cst_53 = arith.constant dense<0.000000e+00> : vector<10x160xf32>
    %48 = tpu.matmul %45, %47, %cst_53 {dimension_numbers = #tpu.dot_dimension_numbers<[1], [0], [0], [1], [0, 0, 1, 1], [], []>} : vector<10x84xf32>, vector<84x160xf32>, vector<10x160xf32> -> vector<10x160xf32>
    %49 = arith.addf %44, %48 : vector<10x160xf32>
    %50 = vector.extract_strided_slice %43 {offsets = [1, 0], sizes = [10, 84], strides = [1, 1]} : vector<14x84xf32> to vector<10x84xf32>
    %c1_54 = arith.constant 1 : index
    %c0_55 = arith.constant 0 : index
    %c0_56 = arith.constant 0 : index
    %51 = vector.load %arg6[%c1_54, %c0_55, %c0_56] : memref<5x84x160xf32, #tpu.memory_space<vmem>>, vector<1x84x160xf32>
    %52 = vector.shape_cast %51 : vector<1x84x160xf32> to vector<84x160xf32>
    %cst_57 = arith.constant dense<0.000000e+00> : vector<10x160xf32>
    %53 = tpu.matmul %50, %52, %cst_57 {dimension_numbers = #tpu.dot_dimension_numbers<[1], [0], [0], [1], [0, 0, 1, 1], [], []>} : vector<10x84xf32>, vector<84x160xf32>, vector<10x160xf32> -> vector<10x160xf32>
    %54 = arith.addf %49, %53 : vector<10x160xf32>
    %55 = vector.extract_strided_slice %43 {offsets = [2, 0], sizes = [10, 84], strides = [1, 1]} : vector<14x84xf32> to vector<10x84xf32>
    %c2_58 = arith.constant 2 : index
    %c0_59 = arith.constant 0 : index
    %c0_60 = arith.constant 0 : index
    %56 = vector.load %arg6[%c2_58, %c0_59, %c0_60] : memref<5x84x160xf32, #tpu.memory_space<vmem>>, vector<1x84x160xf32>
    %57 = vector.shape_cast %56 : vector<1x84x160xf32> to vector<84x160xf32>
    %cst_61 = arith.constant dense<0.000000e+00> : vector<10x160xf32>
    %58 = tpu.matmul %55, %57, %cst_61 {dimension_numbers = #tpu.dot_dimension_numbers<[1], [0], [0], [1], [0, 0, 1, 1], [], []>} : vector<10x84xf32>, vector<84x160xf32>, vector<10x160xf32> -> vector<10x160xf32>
    %59 = arith.addf %54, %58 : vector<10x160xf32>
    %60 = vector.extract_strided_slice %43 {offsets = [3, 0], sizes = [10, 84], strides = [1, 1]} : vector<14x84xf32> to vector<10x84xf32>
    %c3_62 = arith.constant 3 : index
    %c0_63 = arith.constant 0 : index
    %c0_64 = arith.constant 0 : index
    %61 = vector.load %arg6[%c3_62, %c0_63, %c0_64] : memref<5x84x160xf32, #tpu.memory_space<vmem>>, vector<1x84x160xf32>
    %62 = vector.shape_cast %61 : vector<1x84x160xf32> to vector<84x160xf32>
    %cst_65 = arith.constant dense<0.000000e+00> : vector<10x160xf32>
    %63 = tpu.matmul %60, %62, %cst_65 {dimension_numbers = #tpu.dot_dimension_numbers<[1], [0], [0], [1], [0, 0, 1, 1], [], []>} : vector<10x84xf32>, vector<84x160xf32>, vector<10x160xf32> -> vector<10x160xf32>
    %64 = arith.addf %59, %63 : vector<10x160xf32>
    %65 = vector.extract_strided_slice %43 {offsets = [4, 0], sizes = [10, 84], strides = [1, 1]} : vector<14x84xf32> to vector<10x84xf32>
    %c4_66 = arith.constant 4 : index
    %c0_67 = arith.constant 0 : index
    %c0_68 = arith.constant 0 : index
    %66 = vector.load %arg6[%c4_66, %c0_67, %c0_68] : memref<5x84x160xf32, #tpu.memory_space<vmem>>, vector<1x84x160xf32>
    %67 = vector.shape_cast %66 : vector<1x84x160xf32> to vector<84x160xf32>
    %cst_69 = arith.constant dense<0.000000e+00> : vector<10x160xf32>
    %68 = tpu.matmul %65, %67, %cst_69 {dimension_numbers = #tpu.dot_dimension_numbers<[1], [0], [0], [1], [0, 0, 1, 1], [], []>} : vector<10x84xf32>, vector<84x160xf32>, vector<10x160xf32> -> vector<10x160xf32>
    %69 = arith.addf %64, %68 : vector<10x160xf32>
    %c0_70 = arith.constant 0 : index
    %c0_71 = arith.constant 0 : index
    %70 = vector.load %arg7[%c0_70, %c0_71] : memref<1x160xf32, #tpu.memory_space<vmem>>, vector<1x160xf32>
    %71 = vector.broadcast %70 : vector<1x160xf32> to vector<10x160xf32>
    %72 = arith.addf %69, %71 : vector<10x160xf32>
    %cst_72 = arith.constant 0.000000e+00 : f32
    %73 = vector.broadcast %cst_72 : f32 to vector<10x160xf32>
    %74 = arith.maximumf %72, %73 : vector<10x160xf32>
    %c0_73 = arith.constant 0 : index
    %c0_74 = arith.constant 0 : index
    %75 = vector.load %arg8[%c0_73, %c0_74] : memref<5x10xf32, #tpu.memory_space<vmem>>, vector<5x10xf32>
    %c0_75 = arith.constant 0 : index
    %c0_76 = arith.constant 0 : index
    %76 = vector.load %arg9[%c0_75, %c0_76] : memref<160x80xf32, #tpu.memory_space<vmem>>, vector<160x80xf32>
    %cst_77 = arith.constant dense<0.000000e+00> : vector<10x80xf32>
    %77 = tpu.matmul %74, %76, %cst_77 {dimension_numbers = #tpu.dot_dimension_numbers<[1], [0], [0], [1], [0, 0, 1, 1], [], []>} : vector<10x160xf32>, vector<160x80xf32>, vector<10x80xf32> -> vector<10x80xf32>
    %cst_78 = arith.constant dense<0.000000e+00> : vector<5x80xf32>
    %78 = tpu.matmul %75, %77, %cst_78 {dimension_numbers = #tpu.dot_dimension_numbers<[1], [0], [0], [1], [0, 0, 1, 1], [], []>} : vector<5x10xf32>, vector<10x80xf32>, vector<5x80xf32> -> vector<5x80xf32>
    %79 = vector.extract_strided_slice %78 {offsets = [0, 0], sizes = [1, 80], strides = [1, 1]} : vector<5x80xf32> to vector<1x80xf32>
    %c0_79 = arith.constant 0 : index
    %c0_80 = arith.constant 0 : index
    %80 = vector.load %arg18[%c0_79, %c0_80] : memref<2x400xf32, #tpu.memory_space<vmem>>, vector<1x80xf32>
    tpu.vector_store %arg18[%c0_79, %c0_80], %79 {strides = array<i32>} : memref<2x400xf32, #tpu.memory_space<vmem>>, vector<1x80xf32>,
    %81 = vector.extract_strided_slice %78 {offsets = [1, 0], sizes = [1, 80], strides = [1, 1]} : vector<5x80xf32> to vector<1x80xf32>
    %c0_81 = arith.constant 0 : index
    %c80 = arith.constant 80 : index
    %82 = vector.load %arg18[%c0_81, %c80] : memref<2x400xf32, #tpu.memory_space<vmem>>, vector<1x80xf32>
    tpu.vector_store %arg18[%c0_81, %c80], %81 {strides = array<i32>} : memref<2x400xf32, #tpu.memory_space<vmem>>, vector<1x80xf32>,
    %83 = vector.extract_strided_slice %78 {offsets = [2, 0], sizes = [1, 80], strides = [1, 1]} : vector<5x80xf32> to vector<1x80xf32>
    %c0_82 = arith.constant 0 : index
    %c160 = arith.constant 160 : index
    %84 = vector.load %arg18[%c0_82, %c160] : memref<2x400xf32, #tpu.memory_space<vmem>>, vector<1x80xf32>
    tpu.vector_store %arg18[%c0_82, %c160], %83 {strides = array<i32>} : memref<2x400xf32, #tpu.memory_space<vmem>>, vector<1x80xf32>,
    %85 = vector.extract_strided_slice %78 {offsets = [3, 0], sizes = [1, 80], strides = [1, 1]} : vector<5x80xf32> to vector<1x80xf32>
    %c0_83 = arith.constant 0 : index
    %c240 = arith.constant 240 : index
    %86 = vector.load %arg18[%c0_83, %c240] : memref<2x400xf32, #tpu.memory_space<vmem>>, vector<1x80xf32>
    tpu.vector_store %arg18[%c0_83, %c240], %85 {strides = array<i32>} : memref<2x400xf32, #tpu.memory_space<vmem>>, vector<1x80xf32>,
    %87 = vector.extract_strided_slice %78 {offsets = [4, 0], sizes = [1, 80], strides = [1, 1]} : vector<5x80xf32> to vector<1x80xf32>
    %c0_84 = arith.constant 0 : index
    %c320 = arith.constant 320 : index
    %88 = vector.load %arg18[%c0_84, %c320] : memref<2x400xf32, #tpu.memory_space<vmem>>, vector<1x80xf32>
    tpu.vector_store %arg18[%c0_84, %c320], %87 {strides = array<i32>} : memref<2x400xf32, #tpu.memory_space<vmem>>, vector<1x80xf32>,
    %cst_85 = arith.constant 0.000000e+00 : f32
    %89 = vector.broadcast %cst_85 : f32 to vector<28x168xf32>
    %c1_86 = arith.constant 1 : index
    %c0_87 = arith.constant 0 : index
    %c0_88 = arith.constant 0 : index
    %90 = vector.load %arg17[%c1_86, %c0_87, %c0_88] : memref<2x32x28xf32, #tpu.memory_space<vmem>>, vector<1x28x28xf32>
    %91 = vector.shape_cast %90 : vector<1x28x28xf32> to vector<28x28xf32>
    %c0_89 = arith.constant 0 : index
    %c0_90 = arith.constant 0 : index
    %c0_91 = arith.constant 0 : index
    %92 = vector.load %arg2[%c0_89, %c0_90, %c0_91] : memref<5x28x168xf32, #tpu.memory_space<vmem>>, vector<1x28x168xf32>
    %93 = vector.shape_cast %92 : vector<1x28x168xf32> to vector<28x168xf32>
    %cst_92 = arith.constant dense<0.000000e+00> : vector<28x168xf32>
    %94 = tpu.matmul %91, %93, %cst_92 {dimension_numbers = #tpu.dot_dimension_numbers<[1], [0], [0], [1], [0, 0, 1, 1], [], []>} : vector<28x28xf32>, vector<28x168xf32>, vector<28x168xf32> -> vector<28x168xf32>
    %95 = arith.addf %89, %94 : vector<28x168xf32>
    %c1_93 = arith.constant 1 : index
    %c1_94 = arith.constant 1 : index
    %c0_95 = arith.constant 0 : index
    %96 = vector.load %arg17[%c1_93, %c1_94, %c0_95] : memref<2x32x28xf32, #tpu.memory_space<vmem>>, vector<1x28x28xf32>
    %97 = vector.shape_cast %96 : vector<1x28x28xf32> to vector<28x28xf32>
    %c1_96 = arith.constant 1 : index
    %c0_97 = arith.constant 0 : index
    %c0_98 = arith.constant 0 : index
    %98 = vector.load %arg2[%c1_96, %c0_97, %c0_98] : memref<5x28x168xf32, #tpu.memory_space<vmem>>, vector<1x28x168xf32>
    %99 = vector.shape_cast %98 : vector<1x28x168xf32> to vector<28x168xf32>
    %cst_99 = arith.constant dense<0.000000e+00> : vector<28x168xf32>
    %100 = tpu.matmul %97, %99, %cst_99 {dimension_numbers = #tpu.dot_dimension_numbers<[1], [0], [0], [1], [0, 0, 1, 1], [], []>} : vector<28x28xf32>, vector<28x168xf32>, vector<28x168xf32> -> vector<28x168xf32>
    %101 = arith.addf %95, %100 : vector<28x168xf32>
    %c1_100 = arith.constant 1 : index
    %c2_101 = arith.constant 2 : index
    %c0_102 = arith.constant 0 : index
    %102 = vector.load %arg17[%c1_100, %c2_101, %c0_102] : memref<2x32x28xf32, #tpu.memory_space<vmem>>, vector<1x28x28xf32>
    %103 = vector.shape_cast %102 : vector<1x28x28xf32> to vector<28x28xf32>
    %c2_103 = arith.constant 2 : index
    %c0_104 = arith.constant 0 : index
    %c0_105 = arith.constant 0 : index
    %104 = vector.load %arg2[%c2_103, %c0_104, %c0_105] : memref<5x28x168xf32, #tpu.memory_space<vmem>>, vector<1x28x168xf32>
    %105 = vector.shape_cast %104 : vector<1x28x168xf32> to vector<28x168xf32>
    %cst_106 = arith.constant dense<0.000000e+00> : vector<28x168xf32>
    %106 = tpu.matmul %103, %105, %cst_106 {dimension_numbers = #tpu.dot_dimension_numbers<[1], [0], [0], [1], [0, 0, 1, 1], [], []>} : vector<28x28xf32>, vector<28x168xf32>, vector<28x168xf32> -> vector<28x168xf32>
    %107 = arith.addf %101, %106 : vector<28x168xf32>
    %c1_107 = arith.constant 1 : index
    %c3_108 = arith.constant 3 : index
    %c0_109 = arith.constant 0 : index
    %108 = vector.load %arg17[%c1_107, %c3_108, %c0_109] : memref<2x32x28xf32, #tpu.memory_space<vmem>>, vector<1x28x28xf32>
    %109 = vector.shape_cast %108 : vector<1x28x28xf32> to vector<28x28xf32>
    %c3_110 = arith.constant 3 : index
    %c0_111 = arith.constant 0 : index
    %c0_112 = arith.constant 0 : index
    %110 = vector.load %arg2[%c3_110, %c0_111, %c0_112] : memref<5x28x168xf32, #tpu.memory_space<vmem>>, vector<1x28x168xf32>
    %111 = vector.shape_cast %110 : vector<1x28x168xf32> to vector<28x168xf32>
    %cst_113 = arith.constant dense<0.000000e+00> : vector<28x168xf32>
    %112 = tpu.matmul %109, %111, %cst_113 {dimension_numbers = #tpu.dot_dimension_numbers<[1], [0], [0], [1], [0, 0, 1, 1], [], []>} : vector<28x28xf32>, vector<28x168xf32>, vector<28x168xf32> -> vector<28x168xf32>
    %113 = arith.addf %107, %112 : vector<28x168xf32>
    %c1_114 = arith.constant 1 : index
    %c4_115 = arith.constant 4 : index
    %c0_116 = arith.constant 0 : index
    %114 = vector.load %arg17[%c1_114, %c4_115, %c0_116] : memref<2x32x28xf32, #tpu.memory_space<vmem>>, vector<1x28x28xf32>
    %115 = vector.shape_cast %114 : vector<1x28x28xf32> to vector<28x28xf32>
    %c4_117 = arith.constant 4 : index
    %c0_118 = arith.constant 0 : index
    %c0_119 = arith.constant 0 : index
    %116 = vector.load %arg2[%c4_117, %c0_118, %c0_119] : memref<5x28x168xf32, #tpu.memory_space<vmem>>, vector<1x28x168xf32>
    %117 = vector.shape_cast %116 : vector<1x28x168xf32> to vector<28x168xf32>
    %cst_120 = arith.constant dense<0.000000e+00> : vector<28x168xf32>
    %118 = tpu.matmul %115, %117, %cst_120 {dimension_numbers = #tpu.dot_dimension_numbers<[1], [0], [0], [1], [0, 0, 1, 1], [], []>} : vector<28x28xf32>, vector<28x168xf32>, vector<28x168xf32> -> vector<28x168xf32>
    %119 = arith.addf %113, %118 : vector<28x168xf32>
    %c0_121 = arith.constant 0 : index
    %c0_122 = arith.constant 0 : index
    %120 = vector.load %arg3[%c0_121, %c0_122] : memref<1x168xf32, #tpu.memory_space<vmem>>, vector<1x168xf32>
    %121 = vector.broadcast %120 : vector<1x168xf32> to vector<28x168xf32>
    %122 = arith.addf %119, %121 : vector<28x168xf32>
    %cst_123 = arith.constant 0.000000e+00 : f32
    %123 = vector.broadcast %cst_123 : f32 to vector<28x168xf32>
    %124 = arith.maximumf %122, %123 : vector<28x168xf32>
    %c0_124 = arith.constant 0 : index
    %c0_125 = arith.constant 0 : index
    %125 = vector.load %arg4[%c0_124, %c0_125] : memref<14x28xf32, #tpu.memory_space<vmem>>, vector<14x28xf32>
    %c0_126 = arith.constant 0 : index
    %c0_127 = arith.constant 0 : index
    %126 = vector.load %arg5[%c0_126, %c0_127] : memref<168x84xf32, #tpu.memory_space<vmem>>, vector<168x84xf32>
    %cst_128 = arith.constant dense<0.000000e+00> : vector<28x84xf32>
    %127 = tpu.matmul %124, %126, %cst_128 {dimension_numbers = #tpu.dot_dimension_numbers<[1], [0], [0], [1], [0, 0, 1, 1], [], []>} : vector<28x168xf32>, vector<168x84xf32>, vector<28x84xf32> -> vector<28x84xf32>
    %cst_129 = arith.constant dense<0.000000e+00> : vector<14x84xf32>
    %128 = tpu.matmul %125, %127, %cst_129 {dimension_numbers = #tpu.dot_dimension_numbers<[1], [0], [0], [1], [0, 0, 1, 1], [], []>} : vector<14x28xf32>, vector<28x84xf32>, vector<14x84xf32> -> vector<14x84xf32>
    %cst_130 = arith.constant 0.000000e+00 : f32
    %129 = vector.broadcast %cst_130 : f32 to vector<10x160xf32>
    %130 = vector.extract_strided_slice %128 {offsets = [0, 0], sizes = [10, 84], strides = [1, 1]} : vector<14x84xf32> to vector<10x84xf32>
    %c0_131 = arith.constant 0 : index
    %c0_132 = arith.constant 0 : index
    %c0_133 = arith.constant 0 : index
    %131 = vector.load %arg6[%c0_131, %c0_132, %c0_133] : memref<5x84x160xf32, #tpu.memory_space<vmem>>, vector<1x84x160xf32>
    %132 = vector.shape_cast %131 : vector<1x84x160xf32> to vector<84x160xf32>
    %cst_134 = arith.constant dense<0.000000e+00> : vector<10x160xf32>
    %133 = tpu.matmul %130, %132, %cst_134 {dimension_numbers = #tpu.dot_dimension_numbers<[1], [0], [0], [1], [0, 0, 1, 1], [], []>} : vector<10x84xf32>, vector<84x160xf32>, vector<10x160xf32> -> vector<10x160xf32>
    %134 = arith.addf %129, %133 : vector<10x160xf32>
    %135 = vector.extract_strided_slice %128 {offsets = [1, 0], sizes = [10, 84], strides = [1, 1]} : vector<14x84xf32> to vector<10x84xf32>
    %c1_135 = arith.constant 1 : index
    %c0_136 = arith.constant 0 : index
    %c0_137 = arith.constant 0 : index
    %136 = vector.load %arg6[%c1_135, %c0_136, %c0_137] : memref<5x84x160xf32, #tpu.memory_space<vmem>>, vector<1x84x160xf32>
    %137 = vector.shape_cast %136 : vector<1x84x160xf32> to vector<84x160xf32>
    %cst_138 = arith.constant dense<0.000000e+00> : vector<10x160xf32>
    %138 = tpu.matmul %135, %137, %cst_138 {dimension_numbers = #tpu.dot_dimension_numbers<[1], [0], [0], [1], [0, 0, 1, 1], [], []>} : vector<10x84xf32>, vector<84x160xf32>, vector<10x160xf32> -> vector<10x160xf32>
    %139 = arith.addf %134, %138 : vector<10x160xf32>
    %140 = vector.extract_strided_slice %128 {offsets = [2, 0], sizes = [10, 84], strides = [1, 1]} : vector<14x84xf32> to vector<10x84xf32>
    %c2_139 = arith.constant 2 : index
    %c0_140 = arith.constant 0 : index
    %c0_141 = arith.constant 0 : index
    %141 = vector.load %arg6[%c2_139, %c0_140, %c0_141] : memref<5x84x160xf32, #tpu.memory_space<vmem>>, vector<1x84x160xf32>
    %142 = vector.shape_cast %141 : vector<1x84x160xf32> to vector<84x160xf32>
    %cst_142 = arith.constant dense<0.000000e+00> : vector<10x160xf32>
    %143 = tpu.matmul %140, %142, %cst_142 {dimension_numbers = #tpu.dot_dimension_numbers<[1], [0], [0], [1], [0, 0, 1, 1], [], []>} : vector<10x84xf32>, vector<84x160xf32>, vector<10x160xf32> -> vector<10x160xf32>
    %144 = arith.addf %139, %143 : vector<10x160xf32>
    %145 = vector.extract_strided_slice %128 {offsets = [3, 0], sizes = [10, 84], strides = [1, 1]} : vector<14x84xf32> to vector<10x84xf32>
    %c3_143 = arith.constant 3 : index
    %c0_144 = arith.constant 0 : index
    %c0_145 = arith.constant 0 : index
    %146 = vector.load %arg6[%c3_143, %c0_144, %c0_145] : memref<5x84x160xf32, #tpu.memory_space<vmem>>, vector<1x84x160xf32>
    %147 = vector.shape_cast %146 : vector<1x84x160xf32> to vector<84x160xf32>
    %cst_146 = arith.constant dense<0.000000e+00> : vector<10x160xf32>
    %148 = tpu.matmul %145, %147, %cst_146 {dimension_numbers = #tpu.dot_dimension_numbers<[1], [0], [0], [1], [0, 0, 1, 1], [], []>} : vector<10x84xf32>, vector<84x160xf32>, vector<10x160xf32> -> vector<10x160xf32>
    %149 = arith.addf %144, %148 : vector<10x160xf32>
    %150 = vector.extract_strided_slice %128 {offsets = [4, 0], sizes = [10, 84], strides = [1, 1]} : vector<14x84xf32> to vector<10x84xf32>
    %c4_147 = arith.constant 4 : index
    %c0_148 = arith.constant 0 : index
    %c0_149 = arith.constant 0 : index
    %151 = vector.load %arg6[%c4_147, %c0_148, %c0_149] : memref<5x84x160xf32, #tpu.memory_space<vmem>>, vector<1x84x160xf32>
    %152 = vector.shape_cast %151 : vector<1x84x160xf32> to vector<84x160xf32>
    %cst_150 = arith.constant dense<0.000000e+00> : vector<10x160xf32>
    %153 = tpu.matmul %150, %152, %cst_150 {dimension_numbers = #tpu.dot_dimension_numbers<[1], [0], [0], [1], [0, 0, 1, 1], [], []>} : vector<10x84xf32>, vector<84x160xf32>, vector<10x160xf32> -> vector<10x160xf32>
    %154 = arith.addf %149, %153 : vector<10x160xf32>
    %c0_151 = arith.constant 0 : index
    %c0_152 = arith.constant 0 : index
    %155 = vector.load %arg7[%c0_151, %c0_152] : memref<1x160xf32, #tpu.memory_space<vmem>>, vector<1x160xf32>
    %156 = vector.broadcast %155 : vector<1x160xf32> to vector<10x160xf32>
    %157 = arith.addf %154, %156 : vector<10x160xf32>
    %cst_153 = arith.constant 0.000000e+00 : f32
    %158 = vector.broadcast %cst_153 : f32 to vector<10x160xf32>
    %159 = arith.maximumf %157, %158 : vector<10x160xf32>
    %c0_154 = arith.constant 0 : index
    %c0_155 = arith.constant 0 : index
    %160 = vector.load %arg8[%c0_154, %c0_155] : memref<5x10xf32, #tpu.memory_space<vmem>>, vector<5x10xf32>
    %c0_156 = arith.constant 0 : index
    %c0_157 = arith.constant 0 : index
    %161 = vector.load %arg9[%c0_156, %c0_157] : memref<160x80xf32, #tpu.memory_space<vmem>>, vector<160x80xf32>
    %cst_158 = arith.constant dense<0.000000e+00> : vector<10x80xf32>
    %162 = tpu.matmul %159, %161, %cst_158 {dimension_numbers = #tpu.dot_dimension_numbers<[1], [0], [0], [1], [0, 0, 1, 1], [], []>} : vector<10x160xf32>, vector<160x80xf32>, vector<10x80xf32> -> vector<10x80xf32>
    %cst_159 = arith.constant dense<0.000000e+00> : vector<5x80xf32>
    %163 = tpu.matmul %160, %162, %cst_159 {dimension_numbers = #tpu.dot_dimension_numbers<[1], [0], [0], [1], [0, 0, 1, 1], [], []>} : vector<5x10xf32>, vector<10x80xf32>, vector<5x80xf32> -> vector<5x80xf32>
    %164 = vector.extract_strided_slice %163 {offsets = [0, 0], sizes = [1, 80], strides = [1, 1]} : vector<5x80xf32> to vector<1x80xf32>
    %c1_160 = arith.constant 1 : index
    %c0_161 = arith.constant 0 : index
    %165 = vector.load %arg18[%c1_160, %c0_161] : memref<2x400xf32, #tpu.memory_space<vmem>>, vector<1x80xf32>
    tpu.vector_store %arg18[%c1_160, %c0_161], %164 {strides = array<i32>} : memref<2x400xf32, #tpu.memory_space<vmem>>, vector<1x80xf32>,
    %166 = vector.extract_strided_slice %163 {offsets = [1, 0], sizes = [1, 80], strides = [1, 1]} : vector<5x80xf32> to vector<1x80xf32>
    %c1_162 = arith.constant 1 : index
    %c80_163 = arith.constant 80 : index
    %167 = vector.load %arg18[%c1_162, %c80_163] : memref<2x400xf32, #tpu.memory_space<vmem>>, vector<1x80xf32>
    tpu.vector_store %arg18[%c1_162, %c80_163], %166 {strides = array<i32>} : memref<2x400xf32, #tpu.memory_space<vmem>>, vector<1x80xf32>,
    %168 = vector.extract_strided_slice %163 {offsets = [2, 0], sizes = [1, 80], strides = [1, 1]} : vector<5x80xf32> to vector<1x80xf32>
    %c1_164 = arith.constant 1 : index
    %c160_165 = arith.constant 160 : index
    %169 = vector.load %arg18[%c1_164, %c160_165] : memref<2x400xf32, #tpu.memory_space<vmem>>, vector<1x80xf32>
    tpu.vector_store %arg18[%c1_164, %c160_165], %168 {strides = array<i32>} : memref<2x400xf32, #tpu.memory_space<vmem>>, vector<1x80xf32>,
    %170 = vector.extract_strided_slice %163 {offsets = [3, 0], sizes = [1, 80], strides = [1, 1]} : vector<5x80xf32> to vector<1x80xf32>
    %c1_166 = arith.constant 1 : index
    %c240_167 = arith.constant 240 : index
    %171 = vector.load %arg18[%c1_166, %c240_167] : memref<2x400xf32, #tpu.memory_space<vmem>>, vector<1x80xf32>
    tpu.vector_store %arg18[%c1_166, %c240_167], %170 {strides = array<i32>} : memref<2x400xf32, #tpu.memory_space<vmem>>, vector<1x80xf32>,
    %172 = vector.extract_strided_slice %163 {offsets = [4, 0], sizes = [1, 80], strides = [1, 1]} : vector<5x80xf32> to vector<1x80xf32>
    %c1_168 = arith.constant 1 : index
    %c320_169 = arith.constant 320 : index
    %173 = vector.load %arg18[%c1_168, %c320_169] : memref<2x400xf32, #tpu.memory_space<vmem>>, vector<1x80xf32>
    tpu.vector_store %arg18[%c1_168, %c320_169], %172 {strides = array<i32>} : memref<2x400xf32, #tpu.memory_space<vmem>>, vector<1x80xf32>,
    %c0_170 = arith.constant 0 : index
    %c0_171 = arith.constant 0 : index
    %174 = vector.load %arg18[%c0_170, %c0_171] : memref<2x400xf32, #tpu.memory_space<vmem>>, vector<2x400xf32>
    %c0_172 = arith.constant 0 : index
    %c0_173 = arith.constant 0 : index
    %175 = vector.load %arg10[%c0_172, %c0_173] : memref<400x120xf32, #tpu.memory_space<vmem>>, vector<400x120xf32>
    %cst_174 = arith.constant dense<0.000000e+00> : vector<2x120xf32>
    %176 = tpu.matmul %174, %175, %cst_174 {dimension_numbers = #tpu.dot_dimension_numbers<[1], [0], [0], [1], [0, 0, 1, 1], [], []>} : vector<2x400xf32>, vector<400x120xf32>, vector<2x120xf32> -> vector<2x120xf32>
    %c0_175 = arith.constant 0 : index
    %c0_176 = arith.constant 0 : index
    %177 = vector.load %arg11[%c0_175, %c0_176] : memref<1x120xf32, #tpu.memory_space<vmem>>, vector<1x120xf32>
    %178 = vector.broadcast %177 : vector<1x120xf32> to vector<2x120xf32>
    %179 = arith.addf %176, %178 : vector<2x120xf32>
    %cst_177 = arith.constant 0.000000e+00 : f32
    %180 = vector.broadcast %cst_177 : f32 to vector<2x120xf32>
    %181 = arith.maximumf %179, %180 : vector<2x120xf32>
    %c0_178 = arith.constant 0 : index
    %c0_179 = arith.constant 0 : index
    %182 = vector.load %arg12[%c0_178, %c0_179] : memref<120x84xf32, #tpu.memory_space<vmem>>, vector<120x84xf32>
    %cst_180 = arith.constant dense<0.000000e+00> : vector<2x84xf32>
    %183 = tpu.matmul %181, %182, %cst_180 {dimension_numbers = #tpu.dot_dimension_numbers<[1], [0], [0], [1], [0, 0, 1, 1], [], []>} : vector<2x120xf32>, vector<120x84xf32>, vector<2x84xf32> -> vector<2x84xf32>
    %c0_181 = arith.constant 0 : index
    %c0_182 = arith.constant 0 : index
    %184 = vector.load %arg13[%c0_181, %c0_182] : memref<1x84xf32, #tpu.memory_space<vmem>>, vector<1x84xf32>
    %185 = vector.broadcast %184 : vector<1x84xf32> to vector<2x84xf32>
    %186 = arith.addf %183, %185 : vector<2x84xf32>
    %cst_183 = arith.constant 0.000000e+00 : f32
    %187 = vector.broadcast %cst_183 : f32 to vector<2x84xf32>
    %188 = arith.maximumf %186, %187 : vector<2x84xf32>
    %c0_184 = arith.constant 0 : index
    %c0_185 = arith.constant 0 : index
    %189 = vector.load %arg14[%c0_184, %c0_185] : memref<84x128xf32, #tpu.memory_space<vmem>>, vector<84x128xf32>
    %cst_186 = arith.constant dense<0.000000e+00> : vector<2x128xf32>
    %190 = tpu.matmul %188, %189, %cst_186 {dimension_numbers = #tpu.dot_dimension_numbers<[1], [0], [0], [1], [0, 0, 1, 1], [], []>} : vector<2x84xf32>, vector<84x128xf32>, vector<2x128xf32> -> vector<2x128xf32>
    %c0_187 = arith.constant 0 : index
    %c0_188 = arith.constant 0 : index
    %191 = vector.load %arg15[%c0_187, %c0_188] : memref<1x128xf32, #tpu.memory_space<vmem>>, vector<1x128xf32>
    %192 = vector.broadcast %191 : vector<1x128xf32> to vector<2x128xf32>
    %193 = arith.addf %190, %192 : vector<2x128xf32>
    %c0_189 = arith.constant 0 : index
    %c0_190 = arith.constant 0 : index
    %c0_191 = arith.constant 0 : index
    %194 = vector.load %arg16[%c0_189, %c0_190, %c0_191] : memref<2x1x128xf32, #tpu.memory_space<vmem>>, vector<2x1x128xf32>
    %195 = vector.shape_cast %194 : vector<2x1x128xf32> to vector<2x128xf32>
    %196 = vector.shape_cast %193 : vector<2x128xf32> to vector<2x1x128xf32>
    tpu.vector_store %arg16[%c0_189, %c0_190, %c0_191], %196 {strides = array<i32>} : memref<2x1x128xf32, #tpu.memory_space<vmem>>, vector<2x1x128xf32>,
    return
  }
  func.func @transform_0(%arg0: i32) -> (i32, i32, i32) {
    %c0_i32 = arith.constant 0 : i32
    %c0_i32_0 = arith.constant 0 : i32
    %c0_i32_1 = arith.constant 0 : i32
    return %arg0, %c0_i32, %c0_i32_0 : i32, i32, i32
  }
  func.func @transform_1(%arg0: i32) -> (i32, i32, i32) {
    %c0_i32 = arith.constant 0 : i32
    %c0_i32_0 = arith.constant 0 : i32
    %c0_i32_1 = arith.constant 0 : i32
    %c0_i32_2 = arith.constant 0 : i32
    return %c0_i32, %c0_i32_0, %c0_i32_1 : i32, i32, i32
  }
  func.func @transform_2(%arg0: i32) -> (i32, i32) {
    %c0_i32 = arith.constant 0 : i32
    %c0_i32_0 = arith.constant 0 : i32
    %c0_i32_1 = arith.constant 0 : i32
    return %c0_i32, %c0_i32_0 : i32, i32
  }
  func.func @transform_3(%arg0: i32) -> (i32, i32) {
    %c0_i32 = arith.constant 0 : i32
    %c0_i32_0 = arith.constant 0 : i32
    %c0_i32_1 = arith.constant 0 : i32
    return %c0_i32, %c0_i32_0 : i32, i32
  }
  func.func @transform_4(%arg0: i32) -> (i32, i32) {
    %c0_i32 = arith.constant 0 : i32
    %c0_i32_0 = arith.constant 0 : i32
    %c0_i32_1 = arith.constant 0 : i32
    return %c0_i32, %c0_i32_0 : i32, i32
  }
  func.func @transform_5(%arg0: i32) -> (i32, i32, i32) {
    %c0_i32 = arith.constant 0 : i32
    %c0_i32_0 = arith.constant 0 : i32
    %c0_i32_1 = arith.constant 0 : i32
    %c0_i32_2 = arith.constant 0 : i32
    return %c0_i32, %c0_i32_0, %c0_i32_1 : i32, i32, i32
  }
  func.func @transform_6(%arg0: i32) -> (i32, i32) {
    %c0_i32 = arith.constant 0 : i32
    %c0_i32_0 = arith.constant 0 : i32
    %c0_i32_1 = arith.constant 0 : i32
    return %c0_i32, %c0_i32_0 : i32, i32
  }
  func.func @transform_7(%arg0: i32) -> (i32, i32) {
    %c0_i32 = arith.constant 0 : i32
    %c0_i32_0 = arith.constant 0 : i32
    %c0_i32_1 = arith.constant 0 : i32
    return %c0_i32, %c0_i32_0 : i32, i32
  }
  func.func @transform_8(%arg0: i32) -> (i32, i32) {
    %c0_i32 = arith.constant 0 : i32
    %c0_i32_0 = arith.constant 0 : i32
    %c0_i32_1 = arith.constant 0 : i32
    return %c0_i32, %c0_i32_0 : i32, i32
  }
  func.func @transform_9(%arg0: i32) -> (i32, i32) {
    %c0_i32 = arith.constant 0 : i32
    %c0_i32_0 = arith.constant 0 : i32
    %c0_i32_1 = arith.constant 0 : i32
    return %c0_i32, %c0_i32_0 : i32, i32
  }
  func.func @transform_10(%arg0: i32) -> (i32, i32) {
    %c0_i32 = arith.constant 0 : i32
    %c0_i32_0 = arith.constant 0 : i32
    %c0_i32_1 = arith.constant 0 : i32
    return %c0_i32, %c0_i32_0 : i32, i32
  }
  func.func @transform_11(%arg0: i32) -> (i32, i32) {
    %c0_i32 = arith.constant 0 : i32
    %c0_i32_0 = arith.constant 0 : i32
    %c0_i32_1 = arith.constant 0 : i32
    return %c0_i32, %c0_i32_0 : i32, i32
  }
  func.func @transform_12(%arg0: i32) -> (i32, i32) {
    %c0_i32 = arith.constant 0 : i32
    %c0_i32_0 = arith.constant 0 : i32
    %c0_i32_1 = arith.constant 0 : i32
    return %c0_i32, %c0_i32_0 : i32, i32
  }
  func.func @transform_13(%arg0: i32) -> (i32, i32) {
    %c0_i32 = arith.constant 0 : i32
    %c0_i32_0 = arith.constant 0 : i32
    %c0_i32_1 = arith.constant 0 : i32
    return %c0_i32, %c0_i32_0 : i32, i32
  }
  func.func @transform_14(%arg0: i32) -> (i32, i32) {
    %c0_i32 = arith.constant 0 : i32
    %c0_i32_0 = arith.constant 0 : i32
    %c0_i32_1 = arith.constant 0 : i32
    return %c0_i32, %c0_i32_0 : i32, i32
  }
  func.func @transform_15(%arg0: i32) -> (i32, i32, i32) {
    %c0_i32 = arith.constant 0 : i32
    %c0_i32_0 = arith.constant 0 : i32
    %c0_i32_1 = arith.constant 0 : i32
    return %arg0, %c0_i32, %c0_i32_0 : i32, i32, i32
  }
}

</mosaic_0001>

<bundles_post_ra>
// kernel: lenet5_forward.1
= control target key start
LH: loop header
LB: loop body
LE: loop exit
PB: predicated region body
PF: predicated region fallthrough
CT: control target
= control target key end

     0   :  { %s5770_s0 = inlined_call_operand.vmem [shape: f32[4,28,28], index: 0, kind: input, shape index: {}]   ;;  %s5771_s1 = inlined_call_operand.vmem [shape: f32[5,28,168], index: 1, kind: input, shape index: {}]   ;;  %s5772_s2 = inlined_call_operand.vmem [shape: f32[1,168], index: 2, kind: input, shape index: {}]   ;;  %s5773_s3 = inlined_call_operand.vmem [shape: f32[14,28], index: 3, kind: input, shape index: {}]   ;;  %s5774_s4 = inlined_call_operand.vmem [shape: f32[168,84], index: 4, kind: input, shape index: {}]   ;;  %s5775_s5 = inlined_call_operand.vmem [shape: f32[5,84,160], index: 5, kind: input, shape index: {}]   ;;  %s5776_s6 = inlined_call_operand.vmem [shape: f32[1,160], index: 6, kind: input, shape index: {}]   ;;  %s5777_s7 = inlined_call_operand.vmem [shape: f32[5,10], index: 7, kind: input, shape index: {}]   ;;  %s5778_s8 = inlined_call_operand.vmem [shape: f32[160,80], index: 8, kind: input, shape index: {}]   ;;  %s5779_s9 = inlined_call_operand.vmem [shape: f32[400,120], index: 9, kind: input, shape index: {}]   ;;  %s5780_s10 = inlined_call_operand.vmem [shape: f32[1,120], index: 10, kind: input, shape index: {}]   ;;  %s5781_s11 = inlined_call_operand.vmem [shape: f32[120,84], index: 11, kind: input, shape index: {}]   ;;  %s5782_s12 = inlined_call_operand.vmem [shape: f32[1,84], index: 12, kind: input, shape index: {}]   ;;  %s5783_s13 = inlined_call_operand.vmem [shape: f32[84,128], index: 13, kind: input, shape index: {}]   ;;  %s5784_s14 = inlined_call_operand.vmem [shape: f32[1,128], index: 14, kind: input, shape index: {}]   ;;  %s5785_s15 = inlined_call_operand.hbm [shape: f32[4,1,128], index: 15, kind: output, shape index: {}]  }
   0x1   :  { %5792 = sst [smem:[#allocation11_spill]] %s5770_s0 }
   0x2   :  { %5793 = sst [smem:[#allocation12_spill]] %s5771_s1 }
   0x3   :  { %20 = vsyncpa [#allocation5], 0 }
   0x4   :  { %22 = vsyncpa [#allocation5 + $0x1], 0  ;;  %s3869_s18 = smov 0   ;;  %s3871_s19 = smov 0  }
   0x5   :  { %s3873_s20 = smov 0   ;;  %s3875_s21 = smov 0  }
   0x6 LB: > { %5794 = sst [smem:[#allocation7_spill]] %s3776_s20  ;;  %s3225_s22 = sadd.s32 4294967295, %s3780_s21   ;;  %s3780_s21 = sphi %s3875_s21, %s5811_s21   ;;  %s3776_s20 = sphi %s3873_s20, %s5813_s20   ;;  %s3772_s19 = sphi %s3871_s19, %s5815_s19   ;;  %s3768_s18 = sphi %s3869_s18, %s5814_s18  }
   0x7   : > { %s3226_s23 = sadd.s32 4294967294, %s3780_s21   ;;  %s3892_s24 = sadd.s32 1, %s3780_s21  }
   0x8   : > { %5795 = sst [smem:[#allocation8_spill]] %s3892_s24  ;;  %s355_s25 = sadd.s32 1, %s3776_s20 }
   0x9   : > { %s352_s26 = ssub.s32 %s3780_s21, %s3892_s24  ;;  %p365_p0 = scmp.ne.s32.totalorder %s3776_s20, %s3772_s19 }
   0xa   : > { %p353_p1 = scmp.eq.s32.totalorder %s352_s26, 0  ;;  %p366_p2 = scmp.eq.s32.totalorder %s3225_s22, 1 }
   0xb   : > { %p371_p3 = scmp.ne.s32.totalorder %s3772_s19, %s3768_s18  ;;  %p372_p4 = scmp.eq.s32.totalorder %s3226_s23, 1 }
   0xc   : > { %s3902_s27 = scalar_select %p353_p1, %s3776_s20, %s355_s25  }
   0xd   : > { %p3904_p5 = por %p366_p2, %p365_p0  ;;  %p3908_p6 = por %p372_p4, %p371_p3 }
   0xe   : > { %5796 = sst [smem:[#allocation9_spill]] %s3902_s27  ;;  %p3229_p7 = scmp.ge.s32.totalorder %s3780_s21, 1 }
   0xf   : > { %s5798_s29 = scalar_select %p3908_p6, 1, 0 }
  0x10   : > { %p442_p8 = scmp.lt.s32.totalorder %s3780_s21, 3 }
  0x11   : > { %5799 = sst [smem:[#allocation10_spill]] %s5798_s29 }
  0x12   : > { %p443_p9 = pnand %p3229_p7, %p442_p8 }
  0x13   : > { %s5800_s1 = sld [smem:[#allocation12_spill]] (!%p443_p9)  ;;  %s3934_s17 = sshll.u32 (!%p443_p9), %s3225_s22, 1 }
  0x14   : > { %446 = sbr.rel (%p443_p9) target bundleno = 2369 (0x941), region = 80  ;;  %p492_p10 = scmp.lt.s32.totalorder (!%p443_p9), %s3934_s17, 3 }
  0x15   : > { %s5801_s0 = sld [smem:[#allocation11_spill]] (!%p443_p9)  ;;  %s3783_s23 = smov (!%p443_p9), 80  }
  0x16   : > { %s3786_s20 = smov (!%p443_p9), 32   ;;  %s5804_s27 = smov (!%p443_p9), 112  }
  0x17   : > { %s488_s29 = sand.u32 (!%p443_p9), 1, %s3772_s19  }
  0x18   : > { %s3150_s22 = scalar_lea.sflag (!%p443_p9), [#allocation5], %s488_s29 }
  0x19   : > { %v3240_v0 = vld [vmem:[%s5800_s1 + $0x70] sm:$0xf]  ;;  %vm562_vm0 = vcmask 1043456   ;;  %v3241_v1 = vld [vmem:[%s5800_s1 + $0x78] sm:$0xf]  ;;  %v3238_v2 = vld [vmem:[%s5800_s1 + $0x60] sm:$0xff] }
  0x1a   : > { %3242 = vmatpush.msk.msra.mxu0 %vm562_vm0, %v3240_v0  ;;  %3247 = vmatpush.msk.msra.mxu1 %vm562_vm0, %v3241_v1  ;;  %v535_v3 = vld [vmem:[%s5800_s1 + $0x30] sm:$0xf]  ;;  %v536_v4 = vld [vmem:[%s5800_s1 + $0x38] sm:$0xf]  ;;  %v3239_v5 = vld [vmem:[%s5800_s1 + $0x68] sm:$0xff]  ;;  %vm499_vm1 = vcmask 228352  }
  0x1b   : > { %3252 = vmatpush.msk.msra.mxu2 %vm562_vm0, %v535_v3  ;;  %3257 = vmatpush.msk.msra.mxu3 %vm562_vm0, %v536_v4  ;;  %v533_v6 = vld [vmem:[%s5800_s1 + $0x20] sm:$0xff]  ;;  %v534_v7 = vld [vmem:[%s5800_s1 + $0x28] sm:$0xff]  ;;  %v3236_v8 = vld [vmem:[%s5800_s1 + $0x50] sm:$0xff]  ;;  %v3782_v12 = vmov 0.0   ;;  %s493_s30 = scalar_select %p492_p10, %s3934_s17, 3  ;;  %vm519_vm2 = vcmask 224256  }
  0x1c   : > { %582 = vmatpush.msra.mxu0 %v3238_v2  ;;  %611 = vmatpush.msra.mxu1 %v3239_v5  ;;  %v3237_v9 = vld [vmem:[%s5800_s1 + $0x58] sm:$0xff]  ;;  %v531_v10 = vld [vmem:[%s5800_s1 + $0x10] sm:$0xff]  ;;  %500 = vst.msk [vmem:[#allocation2] sm:$0xff] %vm499_vm1, %v3782_v12  ;;  %v3234_v13 = vld [vmem:[%s5800_s1 + $0x40] sm:$0xff]  ;;  %vm1039_vm3 = vcmask 326656   ;;  %vm1193_vm4 = vcmask 687104  }
  0x1d   : > { %v532_v11 = vld [vmem:[%s5800_s1 + $0x18] sm:$0xff]  ;;  %658 = vmatpush.msra.mxu2 %v533_v6  ;;  %687 = vmatpush.msra.mxu3 %v534_v7  ;;  %v3235_v14 = vld [vmem:[%s5800_s1 + $0x48] sm:$0xff]  ;;  %v529_v15 = vld [vmem:[%s5800_s1] sm:$0xff]  ;;  %501 = vst.msk [vmem:[#allocation2 + $0x8] sm:$0xff] %vm499_vm1, %v3782_v12  ;;  %s3668_s25 = sshll.u32 %s493_s30, 5  ;;  %vm1189_vm5 = vcmask 1046528  }
  0x1e   : > { %583 = vmatpush.msra.mxu0 %v3236_v8  ;;  %612 = vmatpush.msra.mxu1 %v3237_v9  ;;  %v530_v16 = vld [vmem:[%s5800_s1 + $0x8] sm:$0xff]  ;;  %502 = vst.msk [vmem:[#allocation2 + $0x10] sm:$0xff] %vm499_vm1, %v3782_v12  ;;  %s3979_s24 = scalar_lea.vmem %s5801_s0, %s3668_s25  ;;  %v3268_v21 = vld [vmem:[%s5800_s1 + $0xb0] sm:$0xf]  ;;  %v3269_v22 = vld [vmem:[%s5800_s1 + $0xb8] sm:$0xf] }
  0x1f   : > { %659 = vmatpush.msra.mxu2 %v531_v10  ;;  %688 = vmatpush.msra.mxu3 %v532_v11  ;;  %503 = vst.msk [vmem:[#allocation2 + $0x18] sm:$0xff] %vm499_vm1, %v3782_v12  ;;  %v508_v17 = vld [vmem:[%s3979_s24] sm:$0xff]  ;;  %v509_v18 = vld [vmem:[%s3979_s24 + $0x8] sm:$0xff]  ;;  %v510_v19 = vld [vmem:[%s3979_s24 + $0x10] sm:$0xff]  ;;  %vm1416_vm6 = vcmask 1044480   ;;  %vm1329_vm7 = vcmask 1045504  }
  0x20   : > { %584 = vmatpush.msra.mxu0 %v3234_v13  ;;  %613 = vmatpush.msra.mxu1 %v3235_v14  ;;  %504 = vst.msk [vmem:[#allocation2 + $0x20] sm:$0xff] %vm499_vm1, %v3782_v12  ;;  %v511_v20 = vld [vmem:[%s3979_s24 + $0x18] sm:$0xf]  ;;  %v3266_v23 = vld [vmem:[%s5800_s1 + $0xa0] sm:$0xff]  ;;  %v3286_v24 = vld [vmem:[%s5800_s1 + $0xf0] sm:$0xf] }
  0x21   : > { %660 = vmatpush.msra.mxu2 %v529_v15  ;;  %689 = vmatpush.msra.mxu3 %v530_v16  ;;  %505 = vst.msk [vmem:[#allocation2 + $0x28] sm:$0xff] %vm499_vm1, %v3782_v12  ;;  %v3287_v25 = vld [vmem:[%s5800_s1 + $0xf8] sm:$0xf]  ;;  %v3267_v26 = vld [vmem:[%s5800_s1 + $0xa8] sm:$0xff]  ;;  %v3284_v27 = vld [vmem:[%s5800_s1 + $0xe0] sm:$0xff]  ;;  %vm1601_vm8 = vcmask 261120  }
  0x22   : > { %516 = vst.msk [vmem:[#allocation2 + $0x2] sm:$0xff] %vm499_vm1, %v508_v17  ;;  %3270 = vmatpush.msk.msrb.mxu0 %vm562_vm0, %v3268_v21  ;;  %3275 = vmatpush.msk.msrb.mxu1 %vm562_vm0, %v3269_v22  ;;  %v3285_v28 = vld [vmem:[%s5800_s1 + $0xe8] sm:$0xff]  ;;  %v3264_v29 = vld [vmem:[%s5800_s1 + $0x90] sm:$0xff]  ;;  %v3265_v30 = vld [vmem:[%s5800_s1 + $0x98] sm:$0xff]  ;;  %vm1658_vm9 = vcmask 1041408   ;;  %vm1654_vm10 = vcmask 80896  }
  0x23   : > { %506 = vst.msk [vmem:[#allocation2 + $0x30] sm:$0xff] %vm499_vm1, %v3782_v12  ;;  %3288 = vmatpush.msk.msrb.mxu2 %vm562_vm0, %v3286_v24  ;;  %3293 = vmatpush.msk.msrb.mxu3 %vm562_vm0, %v3287_v25  ;;  %v3282_v31 = vld [vmem:[%s5800_s1 + $0xd0] sm:$0xff]  ;;  %v3283_v32 = vld [vmem:[%s5800_s1 + $0xd8] sm:$0xff]  ;;  %v3262_v33 = vld [vmem:[%s5800_s1 + $0x80] sm:$0xff]  ;;  %vm1682_vm11 = vcmask 647168   ;;  %s5791_s25 = smov 112  }
  0x24   : > { %507 = vst.msk [vmem:[#allocation2 + $0x38] sm:$0xff] %vm499_vm1, %v3782_v12  ;;  %747 = vmatpush.msrb.mxu0 %v3266_v23  ;;  %776 = vmatpush.msrb.mxu1 %v3267_v26  ;;  %v3263_v36 = vld [vmem:[%s5800_s1 + $0x88] sm:$0xff]  ;;  %v3280_v37 = vld [vmem:[%s5800_s1 + $0xc0] sm:$0xff]  ;;  %v3304_v45 = vld [vmem:[%s5800_s1 + $0x130] sm:$0xf]  ;;  %s5790_s0 = smov 64  }
  0x25   : > { %517 = vst.msk [vmem:[#allocation2 + $0xa] sm:$0xff] %vm499_vm1, %v509_v18  ;;  %844 = vmatpush.msrb.mxu2 %v3284_v27  ;;  %873 = vmatpush.msrb.mxu3 %v3285_v28  ;;  %v3281_v38 = vld [vmem:[%s5800_s1 + $0xc8] sm:$0xff]  ;;  %v3305_v46 = vld [vmem:[%s5800_s1 + $0x138] sm:$0xf]  ;;  %v3302_v47 = vld [vmem:[%s5800_s1 + $0x120] sm:$0xff]  ;;  %vm1693_vm12 = vcmask 1041024  }
  0x26   : > { %518 = vst.msk [vmem:[#allocation2 + $0x12] sm:$0xff] %vm499_vm1, %v510_v19  ;;  %748 = vmatpush.msrb.mxu0 %v3264_v29  ;;  %777 = vmatpush.msrb.mxu1 %v3265_v30  ;;  %v3303_v48 = vld [vmem:[%s5800_s1 + $0x128] sm:$0xff]  ;;  %v3300_v49 = vld [vmem:[%s5800_s1 + $0x110] sm:$0xff]  ;;  %v3301_v50 = vld [vmem:[%s5800_s1 + $0x118] sm:$0xff]  ;;  %vm1694_vm13 = vcmask 256002   ;;  %vm1690_vm14 = vcmask 654336  }
  0x27   : > { %520 = vst.msk [vmem:[#allocation2 + $0x1a] sm:$0xf] %vm519_vm2, %v511_v20  ;;  %845 = vmatpush.msrb.mxu2 %v3282_v31  ;;  %874 = vmatpush.msrb.mxu3 %v3283_v32  ;;  %v3298_v53 = vld [vmem:[%s5800_s1 + $0x100] sm:$0xff]  ;;  %v3299_v54 = vld [vmem:[%s5800_s1 + $0x108] sm:$0xff]  ;;  %v1033_v5 = vld [vmem:[%s5774_s4 + $0x78] sm:$0xff] }
  0x28   : > { %749 = vmatpush.msrb.mxu0 %v3262_v33  ;;  %778 = vmatpush.msrb.mxu1 %v3263_v36  ;;  %v1032_v6 = vld [vmem:[%s5774_s4 + $0x70] sm:$0xff]  ;;  %v1031_v7 = vld [vmem:[%s5774_s4 + $0x68] sm:$0xff]  ;;  %v1030_v10 = vld [vmem:[%s5774_s4 + $0x60] sm:$0xff] }
  0x29   : > { %v537_v34 = vld [vmem:[#allocation2 + $0x1] sm:$0xff]  ;;  %846 = vmatpush.msrb.mxu2 %v3280_v37  ;;  %875 = vmatpush.msrb.mxu3 %v3281_v38  ;;  %v1029_v13 = vld [vmem:[%s5774_s4 + $0x58] sm:$0xff]  ;;  %v1026_v16 = vld [vmem:[%s5774_s4 + $0x40] sm:$0xff] }
  0x2a   : > { %v525_v35 = vld [vmem:[#allocation2] sm:$0xff]  ;;  %3243 = vmatmul.msk.f32.vlgmr.msra.gmra.mxu0 %vm499_vm1, %v537_v34  ;;  %3248 = vmatmul.msk.f32.vlgmr.msra.gmra.mxu1 %vm499_vm1, %v537_v34  ;;  %v1028_v14 = vld [vmem:[%s5774_s4 + $0x50] sm:$0xff]  ;;  %v1025_v21 = vld [vmem:[%s5774_s4 + $0x38] sm:$0xff] }
  0x2b   : > { %3253 = vmatmul.msk.f32.vlgmr.msra.gmra.mxu2 %vm499_vm1, %v525_v35  ;;  %3258 = vmatmul.msk.f32.vlgmr.msra.gmra.mxu3 %vm499_vm1, %v525_v35  ;;  %v703_v51 = vld [vmem:[#allocation2 + $0x2] sm:$0xff]  ;;  %v1022_v24 = vld [vmem:[%s5774_s4 + $0x20] sm:$0xff]  ;;  %v1021_v28 = vld [vmem:[%s5774_s4 + $0x18] sm:$0xff] }
  0x2c   : > { %v538_v39 = vld [vmem:[#allocation2 + $0x9] sm:$0xff]  ;;  %3306 = vmatpush.msk.msra.mxu0 %vm562_vm0, %v3304_v45  ;;  %3311 = vmatpush.msk.msra.mxu1 %vm562_vm0, %v3305_v46  ;;  %v1027_v15 = vld [vmem:[%s5774_s4 + $0x48] sm:$0xff]  ;;  %v1038_v25 = vld [vmem:[%s5774_s4 + $0xa0] sm:$0xff] }
  0x2d   : > { %v526_v40 = vld [vmem:[#allocation2 + $0x8] sm:$0xff]  ;;  %v539_v41 = vld [vmem:[#allocation2 + $0x11] sm:$0xff]  ;;  %1052 = vmatpush.msra.mxu2 %v1033_v5  ;;  %v1023_v23 = vld [vmem:[%s5774_s4 + $0x28] sm:$0xff]  ;;  %1092 = vmatpush.msra.mxu3 %v1038_v25 }
  0x2e   : > { %v527_v42 = vld [vmem:[#allocation2 + $0x10] sm:$0xff]  ;;  %v540_v43 = vld [vmem:[#allocation2 + $0x19] sm:$0xf]  ;;  %941 = vmatpush.msra.mxu0 %v3302_v47  ;;  %970 = vmatpush.msra.mxu1 %v3303_v48  ;;  %v800_v52 = vld [vmem:[#allocation2 + $0x3] sm:$0xff] }
  0x2f   : > { %v528_v44 = vld [vmem:[#allocation2 + $0x18] sm:$0xf]  ;;  %v704_v55 = vld [vmem:[#allocation2 + $0xa] sm:$0xff]  ;;  %v900_v0 = vld [vmem:[#allocation2 + $0x1c] sm:$0xf]  ;;  %1053 = vmatpush.msra.mxu2 %v1032_v6 }
  0x30   : > { %942 = vmatpush.msra.mxu0 %v3300_v49  ;;  %971 = vmatpush.msra.mxu1 %v3301_v50  ;;  %v801_v56 = vld [vmem:[#allocation2 + $0xb] sm:$0xff]  ;;  %v802_v58 = vld [vmem:[#allocation2 + $0x13] sm:$0xff]  ;;  %v803_v60 = vld [vmem:[#allocation2 + $0x1b] sm:$0xf] }
  0x31   : > { %v705_v57 = vld [vmem:[#allocation2 + $0x12] sm:$0xff]  ;;  %v706_v59 = vld [vmem:[#allocation2 + $0x1a] sm:$0xf]  ;;  %v897_v61 = vld [vmem:[#allocation2 + $0x4] sm:$0xff]  ;;  %1054 = vmatpush.msra.mxu2 %v1031_v7 }
  0x32   : > { %3244 = vmatmul.msk.f32.gmra.mxu0 %vm499_vm1, %v538_v39  ;;  %3249 = vmatmul.msk.f32.gmra.mxu1 %vm499_vm1, %v538_v39  ;;  %v898_v62 = vld [vmem:[#allocation2 + $0xc] sm:$0xff]  ;;  %v899_v63 = vld [vmem:[#allocation2 + $0x14] sm:$0xff]  ;;  %v1019_v34 = vld [vmem:[%s5774_s4 + $0x8] sm:$0xff] }
  0x33   : > { %3254 = vmatmul.msk.f32.gmra.mxu2 %vm499_vm1, %v526_v40  ;;  %3259 = vmatmul.msk.f32.gmra.mxu3 %vm499_vm1, %v526_v40  ;;  %v1024_v22 = vld [vmem:[%s5774_s4 + $0x30] sm:$0xff]  ;;  %v1037_v29 = vld [vmem:[%s5774_s4 + $0x98] sm:$0xff]  ;;  %v1035_v35 = vld [vmem:[%s5774_s4 + $0x88] sm:$0xff] }
  0x34   : > { %943 = vmatpush.msra.mxu0 %v3298_v53  ;;  %972 = vmatpush.msra.mxu1 %v3299_v54  ;;  %v1020_v32 = vld [vmem:[%s5774_s4 + $0x10] sm:$0xff]  ;;  %v1018_v36 = vld [vmem:[%s5774_s4] sm:$0xff]  ;;  %vm4990_vm15 = vmor %vm1694_vm13, %vm1693_vm12 }
  0x35   : > { %1055 = vmatpush.msra.mxu2 %v1030_v10  ;;  %1093 = vmatpush.msra.mxu3 %v1037_v29  ;;  %v1036_v33 = vld [vmem:[%s5774_s4 + $0x90] sm:$0xff]  ;;  %v1034_v37 = vld [vmem:[%s5774_s4 + $0x80] sm:$0xff] }
  0x36   : > { %v994_v50 = vld [vmem:[%s5772_s2] sm:$0x3] }
  0x37   : > { %1056 = vmatpush.msra.mxu2 %v1029_v13  ;;  %1094 = vmatpush.msra.mxu3 %v1036_v33 }
  0x39   : > { %1057 = vmatpush.msra.mxu2 %v1028_v14  ;;  %1095 = vmatpush.msra.mxu3 %v1035_v35 }
  0x3a   : > { %3245 = vmatmul.msk.f32.gmra.mxu0 %vm499_vm1, %v539_v41  ;;  %3250 = vmatmul.msk.f32.gmra.mxu1 %vm499_vm1, %v539_v41 }
  0x3b   : > { %3255 = vmatmul.msk.f32.gmra.mxu2 %vm499_vm1, %v527_v42  ;;  %3260 = vmatmul.msk.f32.gmra.mxu3 %vm499_vm1, %v527_v42 }
  0x3c   : > { %1058 = vmatpush.msra.mxu2 %v1027_v15  ;;  %1096 = vmatpush.msra.mxu3 %v1034_v37 }
  0x3e   : > { %1059 = vmatpush.msra.mxu2 %v1026_v16 }
  0x40   : > { %1060 = vmatpush.msra.mxu2 %v1025_v21 }
  0x42   : > { %3246 = vmatmul.msk.f32.gmra.mxu0 %vm499_vm1, %v540_v43  ;;  %3251 = vmatmul.msk.f32.gmra.mxu1 %vm499_vm1, %v540_v43 }
  0x43   : > { %3256 = vmatmul.msk.f32.gmra.mxu2 %vm499_vm1, %v528_v44  ;;  %3261 = vmatmul.msk.f32.gmra.mxu3 %vm499_vm1, %v528_v44 }
  0x44   : > { %1061 = vmatpush.msra.mxu2 %v1024_v22 }
  0x46   : > { %1062 = vmatpush.msra.mxu2 %v1023_v23 }
  0x48   : > { %1063 = vmatpush.msra.mxu2 %v1022_v24 }
  0x4a   : > { %3271 = vmatmul.msk.f32.vlgmr.msrb.gmra.mxu0 %vm499_vm1, %v703_v51  ;;  %3276 = vmatmul.msk.f32.vlgmr.msrb.gmra.mxu1 %vm499_vm1, %v703_v51 }
  0x4b   : > { %3289 = vmatmul.msk.f32.vlgmr.msrb.gmra.mxu2 %vm499_vm1, %v800_v52  ;;  %3294 = vmatmul.msk.f32.vlgmr.msrb.gmra.mxu3 %vm499_vm1, %v800_v52 }
  0x4c   : > { %1064 = vmatpush.msra.mxu2 %v1021_v28 }
  0x4e   : > { %1065 = vmatpush.msra.mxu2 %v1020_v32 }
  0x50   : > { %1066 = vmatpush.msra.mxu2 %v1019_v34 }
  0x52   : > { %3272 = vmatmul.msk.f32.gmra.mxu0 %vm499_vm1, %v704_v55  ;;  %3277 = vmatmul.msk.f32.gmra.mxu1 %vm499_vm1, %v704_v55 }
  0x53   : > { %3290 = vmatmul.msk.f32.gmra.mxu2 %vm499_vm1, %v801_v56  ;;  %3295 = vmatmul.msk.f32.gmra.mxu3 %vm499_vm1, %v801_v56 }
  0x54   : > { %1067 = vmatpush.msra.mxu2 %v1018_v36 }
  0x5a   : > { %3273 = vmatmul.msk.f32.gmra.mxu0 %vm499_vm1, %v705_v57  ;;  %3278 = vmatmul.msk.f32.gmra.mxu1 %vm499_vm1, %v705_v57  ;;  %v996_v57 = vperm.slane %v994_v50, 0 }
  0x5b   : > { %3291 = vmatmul.msk.f32.gmra.mxu2 %vm499_vm1, %v802_v58  ;;  %3296 = vmatmul.msk.f32.gmra.mxu3 %vm499_vm1, %v802_v58  ;;  %v997_v58 = vperm.slane %v994_v50, 1 }
  0x62   : > { %3274 = vmatmul.msk.f32.gmra.mxu0 %vm499_vm1, %v706_v59  ;;  %3279 = vmatmul.msk.f32.gmra.mxu1 %vm499_vm1, %v706_v59 }
  0x63   : > { %3292 = vmatmul.msk.f32.gmra.mxu2 %vm499_vm1, %v803_v60  ;;  %3297 = vmatmul.msk.f32.gmra.mxu3 %vm499_vm1, %v803_v60 }
  0x6a   : > { %3307 = vmatmul.msk.f32.vlgmr.msra.gmra.mxu0 %vm499_vm1, %v897_v61  ;;  %3312 = vmatmul.msk.f32.vlgmr.msra.gmra.mxu1 %vm499_vm1, %v897_v61 }
  0x72   : > { %3308 = vmatmul.msk.f32.gmra.mxu0 %vm499_vm1, %v898_v62  ;;  %3313 = vmatmul.msk.f32.gmra.mxu1 %vm499_vm1, %v898_v62 }
  0x7a   : > { %3309 = vmatmul.msk.f32.gmra.mxu0 %vm499_vm1, %v899_v63  ;;  %3314 = vmatmul.msk.f32.gmra.mxu1 %vm499_vm1, %v899_v63 }
  0x82   : > { %3310 = vmatmul.msk.f32.gmra.mxu0 %vm499_vm1, %v900_v0  ;;  %3315 = vmatmul.msk.f32.gmra.mxu1 %vm499_vm1, %v900_v0 }
  0xa7   : > { %v4111_v1 = vpop.f32.mrf.mxu0  ;;  %v4113_v2 = vpop.f32.mrf.mxu1 }
  0xae   : > { %v662_v8 = vpop.f32.mrf.mxu2  ;;  %v691_v9 = vpop.f32.mrf.mxu3 }
  0xaf   : > { %v4115_v3 = vpop.f32.mrf.mxu0  ;;  %v4117_v4 = vpop.f32.mrf.mxu1  ;;  %v663_v48 = vadd.f32 %v662_v8, %v4111_v1  ;;  %v692_v49 = vadd.f32 %v691_v9, %v4113_v2 }
  0xb6   : > { %v665_v17 = vpop.f32.mrf.mxu2  ;;  %v694_v18 = vpop.f32.mrf.mxu3 }
  0xb7   : > { %v4131_v11 = vpop.f32.mrf.mxu0  ;;  %v4133_v12 = vpop.f32.mrf.mxu1  ;;  %v666_v63 = vadd.f32 %v665_v17, %v4115_v3  ;;  %v695_v0 = vadd.f32 %v694_v18, %v4117_v4 }
  0xbe   : > { %v668_v30 = vpop.f32.mrf.mxu2  ;;  %v697_v31 = vpop.f32.mrf.mxu3 }
  0xbf   : > { %v4147_v19 = vpop.f32.mrf.mxu0  ;;  %v4149_v20 = vpop.f32.mrf.mxu1  ;;  %v669_v4 = vadd.f32 %v668_v30, %v4131_v11  ;;  %v698_v17 = vadd.f32 %v697_v31, %v4133_v12 }
  0xc6   : > { %v671_v40 = vpop.f32.mrf.mxu2  ;;  %v700_v41 = vpop.f32.mrf.mxu3 }
  0xc7   : > { %v751_v26 = vpop.f32.mrf.mxu0  ;;  %v780_v27 = vpop.f32.mrf.mxu1  ;;  %v672_v35 = vadd.f32 %v671_v40, %v4147_v19  ;;  %v701_v11 = vadd.f32 %v700_v41, %v4149_v20 }
  0xc8   : > { %v792_v51 = vadd.f32 %v751_v26, %v663_v48  ;;  %v793_v52 = vadd.f32 %v780_v27, %v692_v49 }
  0xce   : > { %v848_v44 = vpop.f32.mrf.mxu2  ;;  %v877_v45 = vpop.f32.mrf.mxu3 }
  0xcf   : > { %v754_v38 = vpop.f32.mrf.mxu0  ;;  %v783_v39 = vpop.f32.mrf.mxu1  ;;  %v889_v53 = vadd.f32 %v848_v44, %v792_v51  ;;  %v890_v54 = vadd.f32 %v877_v45, %v793_v52 }
  0xd0   : > { %v794_v5 = vadd.f32 %v754_v38, %v666_v63  ;;  %v795_v6 = vadd.f32 %v783_v39, %v695_v0 }
  0xd6   : > { %v851_v55 = vpop.f32.mrf.mxu2  ;;  %v880_v56 = vpop.f32.mrf.mxu3 }
  0xd7   : > { %v757_v42 = vpop.f32.mrf.mxu0  ;;  %v786_v43 = vpop.f32.mrf.mxu1  ;;  %v891_v9 = vadd.f32 %v851_v55, %v794_v5  ;;  %v892_v10 = vadd.f32 %v880_v56, %v795_v6  ;;  %v1158_v55 = vld [vmem:[%s5775_s5 + $0x80] sm:$0xff]  ;;  %v3343_v56 = vld [vmem:[%s5775_s5 + $0x150] sm:$0xf]  ;;  %v3338_v5 = vld [vmem:[%s5775_s5 + $0x128] sm:$0xff] }
  0xd8   : > { %v796_v23 = vadd.f32 %v757_v42, %v669_v4  ;;  %v797_v24 = vadd.f32 %v786_v43, %v698_v17  ;;  %3345 = vmatpush.msk.msrb.mxu1 %vm562_vm0, %v3343_v56  ;;  %v1152_v6 = vld [vmem:[%s5775_s5 + $0x50] sm:$0xff]  ;;  %v1146_v4 = vld [vmem:[%s5775_s5 + $0x20] sm:$0xff]  ;;  %v3398_v56 = vld [vmem:[%s5775_s5 + $0x278] sm:$0xff] }
  0xde   : > { %v854_v21 = vpop.f32.mrf.mxu2  ;;  %v883_v3 = vpop.f32.mrf.mxu3 }
  0xdf   : > { %v760_v46 = vpop.f32.mrf.mxu0  ;;  %v789_v47 = vpop.f32.mrf.mxu1  ;;  %v893_v27 = vadd.f32 %v854_v21, %v796_v23  ;;  %v894_v28 = vadd.f32 %v883_v3, %v797_v24  ;;  %v1144_v23 = vld [vmem:[%s5775_s5 + $0x10] sm:$0xff] }
  0xe0   : > { %v798_v37 = vadd.f32 %v760_v46, %v672_v35  ;;  %v799_v38 = vadd.f32 %v789_v47, %v701_v11  ;;  %v1016_v35 = vld [vmem:[%s5773_s3] sm:$0xff] }
  0xe1   : > { %v3403_v11 = vld [vmem:[%s5775_s5 + $0x2a0] sm:$0xff] }
  0xe6   : > { %v857_v31 = vpop.f32.mrf.mxu2  ;;  %v886_v36 = vpop.f32.mrf.mxu3 }
  0xe7   : > { %v945_v59 = vpop.f32.mrf.mxu0  ;;  %v974_v60 = vpop.f32.mrf.mxu1  ;;  %v895_v43 = vadd.f32 %v857_v31, %v798_v37  ;;  %v896_v44 = vadd.f32 %v886_v36, %v799_v38  ;;  %v1159_v31 = vld [vmem:[%s5775_s5 + $0x88] sm:$0xff]  ;;  %v1157_v36 = vld [vmem:[%s5775_s5 + $0x78] sm:$0xff] }
  0xe8   : > { %v986_v61 = vadd.f32 %v945_v59, %v889_v53  ;;  %v987_v62 = vadd.f32 %v974_v60, %v890_v54  ;;  %v1162_v53 = vld [vmem:[%s5775_s5 + $0xa0] sm:$0xf]  ;;  %v1160_v54 = vld [vmem:[%s5775_s5 + $0x90] sm:$0xff]  ;;  %v3342_v59 = vld [vmem:[%s5775_s5 + $0x148] sm:$0xff] }
  0xe9   : > { %3351 = vmatpush.msk.msrb.mxu3 %vm562_vm0, %v1162_v53  ;;  %v1156_v60 = vld [vmem:[%s5775_s5 + $0x70] sm:$0xff]  ;;  %v1017_v37 = vld [vmem:[%s5773_s3 + $0x8] sm:$0x3f] }
  0xea   : > { %v1000_v1 = vadd.f32 %v996_v57, %v986_v61  ;;  %v1001_v2 = vadd.f32 %v997_v58, %v987_v62  ;;  %v3339_v61 = vld [vmem:[%s5775_s5 + $0x130] sm:$0xff]  ;;  %v3340_v62 = vld [vmem:[%s5775_s5 + $0x138] sm:$0xff]  ;;  %v1155_v38 = vld [vmem:[%s5775_s5 + $0x68] sm:$0xff] }
  0xeb   : > { %1266 = vmatpush.msrb.mxu3 %v1160_v54  ;;  %v3375_v53 = vld [vmem:[%s5775_s5 + $0x1f0] sm:$0xff]  ;;  %v3376_v54 = vld [vmem:[%s5775_s5 + $0x1f8] sm:$0xff] }
  0xec   : > { %v1008_v7 = vmax.f32 %v1000_v1, 0.0  ;;  %v1009_v8 = vmax.f32 %v1001_v2, 0.0  ;;  %v1154_v1 = vld [vmem:[%s5775_s5 + $0x60] sm:$0xff] }
  0xed   : > { %1267 = vmatpush.msrb.mxu3 %v1158_v55  ;;  %v3337_v2 = vld [vmem:[%s5775_s5 + $0x120] sm:$0xff]  ;;  %v3397_v55 = vld [vmem:[%s5775_s5 + $0x270] sm:$0xff] }
  0xee   : > { %1068 = vmatmul.f32.vlgmr.msra.gmra.mxu2 %v1008_v7  ;;  %3316 = vmatmul.msk.f32.vlgmr.msra.gmra.mxu3 %vm1039_vm3, %v1009_v8  ;;  %v3335_v7 = vld [vmem:[%s5775_s5 + $0x110] sm:$0xff]  ;;  %v3336_v8 = vld [vmem:[%s5775_s5 + $0x118] sm:$0xff] }
  0xef   : > { %v948_v13 = vpop.f32.mrf.mxu0  ;;  %v977_v14 = vpop.f32.mrf.mxu1  ;;  %1268 = vmatpush.msrb.mxu3 %v1156_v60  ;;  %v3396_v60 = vld [vmem:[%s5775_s5 + $0x268] sm:$0xff] }
  0xf0   : > { %v988_v15 = vadd.f32 %v948_v13, %v891_v9  ;;  %v989_v16 = vadd.f32 %v977_v14, %v892_v10  ;;  %v1150_v9 = vld [vmem:[%s5775_s5 + $0x40] sm:$0xff]  ;;  %v3334_v13 = vld [vmem:[%s5775_s5 + $0x108] sm:$0xff]  ;;  %v1148_v14 = vld [vmem:[%s5775_s5 + $0x30] sm:$0xff] }
  0xf1   : > { %1269 = vmatpush.msrb.mxu3 %v1154_v1  ;;  %v3333_v10 = vld [vmem:[%s5775_s5 + $0x100] sm:$0xff] }
  0xf2   : > { %v1003_v18 = vadd.f32 %v997_v58, %v989_v16  ;;  %v1002_v22 = vadd.f32 %v996_v57, %v988_v15  ;;  %v3331_v15 = vld [vmem:[%s5775_s5 + $0xf0] sm:$0xff]  ;;  %v3332_v16 = vld [vmem:[%s5775_s5 + $0xf8] sm:$0xff]  ;;  %v3369_v1 = vld [vmem:[%s5775_s5 + $0x1c0] sm:$0xff] }
  0xf3   : > { %1270 = vmatpush.msrb.mxu3 %v1152_v6  ;;  %v3392_v6 = vld [vmem:[%s5775_s5 + $0x248] sm:$0xff] }
  0xf4   : > { %v1010_v25 = vmax.f32 %v1002_v22, 0.0  ;;  %v1011_v26 = vmax.f32 %v1003_v18, 0.0  ;;  %v3329_v18 = vld [vmem:[%s5775_s5 + $0xe0] sm:$0xff]  ;;  %v3330_v22 = vld [vmem:[%s5775_s5 + $0xe8] sm:$0xff] }
  0xf5   : > { %1271 = vmatpush.msrb.mxu3 %v1150_v9  ;;  %v3389_v9 = vld [vmem:[%s5775_s5 + $0x230] sm:$0xff] }
  0xf6   : > { %1071 = vmatmul.f32.gmra.mxu2 %v1010_v25  ;;  %3317 = vmatmul.msk.f32.gmra.mxu3 %vm1039_vm3, %v1011_v26  ;;  %v3327_v25 = vld [vmem:[%s5775_s5 + $0xd0] sm:$0xff]  ;;  %v3328_v26 = vld [vmem:[%s5775_s5 + $0xd8] sm:$0xff] }
  0xf7   : > { %v951_v29 = vpop.f32.mrf.mxu0  ;;  %v980_v32 = vpop.f32.mrf.mxu1  ;;  %1272 = vmatpush.msrb.mxu3 %v1148_v14  ;;  %v3366_v14 = vld [vmem:[%s5775_s5 + $0x1a8] sm:$0xff] }
  0xf8   : > { %v990_v33 = vadd.f32 %v951_v29, %v893_v27  ;;  %v991_v34 = vadd.f32 %v980_v32, %v894_v28  ;;  %v1142_v27 = vld [vmem:[%s5775_s5] sm:$0xff]  ;;  %v3405_v29 = vld [vmem:[%s5775_s5 + $0x2b0] sm:$0xf] }
  0xf9   : > { %1273 = vmatpush.msrb.mxu3 %v1146_v4  ;;  %v3325_v32 = vld [vmem:[%s5775_s5 + $0xc0] sm:$0xff]  ;;  %v3385_v4 = vld [vmem:[%s5775_s5 + $0x210] sm:$0xff] }
  0xfa   : > { %v1005_v12 = vadd.f32 %v997_v58, %v991_v34  ;;  %v1004_v30 = vadd.f32 %v996_v57, %v990_v33  ;;  %v3326_v33 = vld [vmem:[%s5775_s5 + $0xc8] sm:$0xff] }
  0xfb   : > { %1274 = vmatpush.msrb.mxu3 %v1144_v23  ;;  %v3359_v23 = vld [vmem:[%s5775_s5 + $0x170] sm:$0xff] }
  0xfc   : > { %v1012_v39 = vmax.f32 %v1004_v30, 0.0  ;;  %v1013_v42 = vmax.f32 %v1005_v12, 0.0  ;;  %v1163_v12 = vld [vmem:[%s5775_s5 + $0xa8] sm:$0xf]  ;;  %v1161_v30 = vld [vmem:[%s5775_s5 + $0x98] sm:$0xff] }
  0xfd   : > { %1275 = vmatpush.msrb.mxu3 %v1142_v27 }
  0xfe   : > { %1074 = vmatmul.f32.gmra.mxu2 %v1012_v39  ;;  %3318 = vmatmul.msk.f32.gmra.mxu3 %vm1039_vm3, %v1013_v42  ;;  %v1153_v39 = vld [vmem:[%s5775_s5 + $0x58] sm:$0xff]  ;;  %v1151_v42 = vld [vmem:[%s5775_s5 + $0x48] sm:$0xff] }
  0xff   : > { %v954_v45 = vpop.f32.mrf.mxu0  ;;  %v983_v48 = vpop.f32.mrf.mxu1  ;;  %3407 = vmatpush.msk.msra.mxu3 %vm562_vm0, %v3405_v29 }
 0x100   : > { %v992_v49 = vadd.f32 %v954_v45, %v895_v43  ;;  %v993_v50 = vadd.f32 %v983_v48, %v896_v44  ;;  %v1149_v43 = vld [vmem:[%s5775_s5 + $0x38] sm:$0xff]  ;;  %v1147_v44 = vld [vmem:[%s5775_s5 + $0x28] sm:$0xff] }
 0x101   : > { %1436 = vmatpush.msra.mxu3 %v3403_v11  ;;  %v1145_v45 = vld [vmem:[%s5775_s5 + $0x18] sm:$0xff]  ;;  %v1143_v48 = vld [vmem:[%s5775_s5 + $0x8] sm:$0xff] }
 0x102   : > { %v1007_v19 = vadd.f32 %v997_v58, %v993_v50  ;;  %v1006_v40 = vadd.f32 %v996_v57, %v992_v49  ;;  %v3344_v57 = vld [vmem:[%s5775_s5 + $0x158] sm:$0xf]  ;;  %v3341_v58 = vld [vmem:[%s5775_s5 + $0x140] sm:$0xff]  ;;  %v3404_v50 = vld [vmem:[%s5775_s5 + $0x2a8] sm:$0xff] }
 0x103   : > { %3348 = vmatpush.msk.msrb.mxu2 %vm562_vm0, %v3344_v57  ;;  %1210 = vmatpush.msrb.mxu1 %v3341_v58  ;;  %v3406_v49 = vld [vmem:[%s5775_s5 + $0x2b8] sm:$0xf]  ;;  %v3373_v57 = vld [vmem:[%s5775_s5 + $0x1e0] sm:$0xff]  ;;  %v3374_v58 = vld [vmem:[%s5775_s5 + $0x1e8] sm:$0xff] }
 0x104   : > { %v1014_v20 = vmax.f32 %v1006_v40, 0.0  ;;  %v1015_v41 = vmax.f32 %v1007_v19, 0.0  ;;  %v3401_v19 = vld [vmem:[%s5775_s5 + $0x290] sm:$0xff]  ;;  %v3402_v40 = vld [vmem:[%s5775_s5 + $0x298] sm:$0xff] }
 0x105   : > { %1233 = vmatpush.msrb.mxu2 %v3342_v59  ;;  %1211 = vmatpush.msrb.mxu1 %v3339_v61  ;;  %v3395_v59 = vld [vmem:[%s5775_s5 + $0x260] sm:$0xff]  ;;  %v3371_v61 = vld [vmem:[%s5775_s5 + $0x1d0] sm:$0xff] }
 0x106   : > { %1077 = vmatmul.f32.gmra.mxu2 %v1014_v20  ;;  %3319 = vmatmul.msk.f32.gmra.mxu3 %vm1039_vm3, %v1015_v41  ;;  %v3323_v20 = vld [vmem:[%s5775_s5 + $0xb0] sm:$0xff]  ;;  %v3324_v41 = vld [vmem:[%s5775_s5 + $0xb8] sm:$0xff] }
 0x107   : > { %1234 = vmatpush.msrb.mxu2 %v3340_v62  ;;  %1212 = vmatpush.msrb.mxu1 %v3337_v2  ;;  %v3372_v62 = vld [vmem:[%s5775_s5 + $0x1d8] sm:$0xff]  ;;  %v3370_v2 = vld [vmem:[%s5775_s5 + $0x1c8] sm:$0xff] }
 0x108   : > { %1437 = vmatpush.msra.mxu3 %v3401_v19  ;;  %v3421_v19 = vld [vmem:[%s5775_s5 + $0x300] sm:$0xff] }
 0x109   : > { %1235 = vmatpush.msrb.mxu2 %v3338_v5  ;;  %1213 = vmatpush.msrb.mxu1 %v3335_v7  ;;  %v3391_v5 = vld [vmem:[%s5775_s5 + $0x240] sm:$0xff]  ;;  %v3367_v7 = vld [vmem:[%s5775_s5 + $0x1b0] sm:$0xff] }
 0x10b   : > { %1236 = vmatpush.msrb.mxu2 %v3336_v8  ;;  %1214 = vmatpush.msrb.mxu1 %v3333_v10  ;;  %v3368_v8 = vld [vmem:[%s5775_s5 + $0x1b8] sm:$0xff] }
 0x10c   : > { %v3390_v10 = vld [vmem:[%s5775_s5 + $0x238] sm:$0xff] }
 0x10d   : > { %1237 = vmatpush.msrb.mxu2 %v3334_v13  ;;  %1215 = vmatpush.msrb.mxu1 %v3331_v15  ;;  %v3365_v13 = vld [vmem:[%s5775_s5 + $0x1a0] sm:$0xff] }
 0x10e   : > { %v3387_v15 = vld [vmem:[%s5775_s5 + $0x220] sm:$0xff] }
 0x10f   : > { %1238 = vmatpush.msrb.mxu2 %v3332_v16  ;;  %1216 = vmatpush.msrb.mxu1 %v3329_v18  ;;  %v3388_v16 = vld [vmem:[%s5775_s5 + $0x228] sm:$0xff]  ;;  %v3361_v18 = vld [vmem:[%s5775_s5 + $0x180] sm:$0xff] }
 0x111   : > { %1239 = vmatpush.msrb.mxu2 %v3330_v22  ;;  %1217 = vmatpush.msrb.mxu1 %v3327_v25  ;;  %v3362_v22 = vld [vmem:[%s5775_s5 + $0x188] sm:$0xff]  ;;  %v3357_v25 = vld [vmem:[%s5775_s5 + $0x160] sm:$0xff] }
 0x113   : > { %1240 = vmatpush.msrb.mxu2 %v3328_v26  ;;  %1218 = vmatpush.msrb.mxu1 %v3325_v32  ;;  %v3358_v26 = vld [vmem:[%s5775_s5 + $0x168] sm:$0xff] }
 0x115   : > { %1241 = vmatpush.msrb.mxu2 %v3326_v33  ;;  %1219 = vmatpush.msrb.mxu1 %v3323_v20  ;;  %v3433_v33 = vld [vmem:[%s5775_s5 + $0x360] sm:$0xf] }
 0x117   : > { %1242 = vmatpush.msrb.mxu2 %v3324_v41  ;;  %v3419_v41 = vld [vmem:[%s5775_s5 + $0x2f0] sm:$0xff] }
 0x171   : > { %v4205_v46 = vpop.f32.mrf.mxu2  ;;  %v4207_v47 = vpop.f32.mrf.mxu3 }
 0x172   : > { %v1099_v34 = vadd.f32 %v4207_v47, %v4205_v46  ;;  %v3377_v46 = vld [vmem:[%s5775_s5 + $0x200] sm:$0xf]  ;;  %v3378_v47 = vld [vmem:[%s5775_s5 + $0x208] sm:$0xf] }
 0x173   : > { %3379 = vmatpush.msk.msra.mxu1 %vm562_vm0, %v3377_v46  ;;  %3382 = vmatpush.msk.msra.mxu2 %vm562_vm0, %v3378_v47  ;;  %v3420_v46 = vld [vmem:[%s5775_s5 + $0x2f8] sm:$0xff]  ;;  %v3417_v47 = vld [vmem:[%s5775_s5 + $0x2e0] sm:$0xff] }
 0x175   : > { %1349 = vmatpush.msra.mxu1 %v3375_v53  ;;  %1372 = vmatpush.msra.mxu2 %v3376_v54  ;;  %v3416_v53 = vld [vmem:[%s5775_s5 + $0x2d8] sm:$0xff]  ;;  %v3413_v54 = vld [vmem:[%s5775_s5 + $0x2c0] sm:$0xff] }
 0x177   : > { %1350 = vmatpush.msra.mxu1 %v3373_v57  ;;  %1373 = vmatpush.msra.mxu2 %v3374_v58 }
 0x179   : > { %v4209_v51 = vpop.f32.mrf.mxu2  ;;  %v1101_v52 = vpop.f32.mrf.mxu3  ;;  %1351 = vmatpush.msra.mxu1 %v3371_v61  ;;  %1374 = vmatpush.msra.mxu2 %v3372_v62  ;;  %v1594_v61 = vld [vmem:[%s5778_s8 + $0x68] sm:$0xff]  ;;  %v1593_v62 = vld [vmem:[%s5778_s8 + $0x60] sm:$0xff] }
 0x17a   : > { %v1102_v28 = vadd.f32 %v1101_v52, %v4209_v51  ;;  %v3399_v51 = vld [vmem:[%s5775_s5 + $0x280] sm:$0xff]  ;;  %v3400_v52 = vld [vmem:[%s5775_s5 + $0x288] sm:$0xff] }
 0x17b   : > { %1438 = vmatpush.msra.mxu3 %v3399_v51  ;;  %1352 = vmatpush.msra.mxu1 %v3369_v1  ;;  %v3418_v51 = vld [vmem:[%s5775_s5 + $0x2e8] sm:$0xff] }
 0x17c   : > { %1375 = vmatpush.msra.mxu2 %v3370_v2  ;;  %v1590_v1 = vld [vmem:[%s5778_s8 + $0x48] sm:$0xff]  ;;  %v1589_v2 = vld [vmem:[%s5778_s8 + $0x40] sm:$0xff] }
 0x17d   : > { %1439 = vmatpush.msra.mxu3 %v3397_v55  ;;  %1353 = vmatpush.msra.mxu1 %v3367_v7  ;;  %v3414_v55 = vld [vmem:[%s5775_s5 + $0x2c8] sm:$0xff] }
 0x17e   : > { %1376 = vmatpush.msra.mxu2 %v3368_v8  ;;  %v1586_v7 = vld [vmem:[%s5778_s8 + $0x28] sm:$0xff]  ;;  %v1585_v8 = vld [vmem:[%s5778_s8 + $0x20] sm:$0xff] }
 0x17f   : > { %1440 = vmatpush.msra.mxu3 %v3395_v59  ;;  %1354 = vmatpush.msra.mxu1 %v3365_v13  ;;  %v1596_v59 = vld [vmem:[%s5778_s8 + $0x78] sm:$0xff]  ;;  %v1583_v13 = vld [vmem:[%s5778_s8 + $0x10] sm:$0xff] }
 0x180   : > { %1377 = vmatpush.msra.mxu2 %v3366_v14  ;;  %v1582_v14 = vld [vmem:[%s5778_s8 + $0x8] sm:$0xff] }
 0x181   : > { %v1075_v63 = vpop.f32.mrf.mxu2  ;;  %v1104_v0 = vpop.f32.mrf.mxu3 }
 0x182   : > { %v1105_v24 = vadd.f32 %v1104_v0, %v1075_v63  ;;  %v3393_v63 = vld [vmem:[%s5775_s5 + $0x250] sm:$0xff]  ;;  %v3394_v0 = vld [vmem:[%s5775_s5 + $0x258] sm:$0xff] }
 0x183   : > { %1441 = vmatpush.msra.mxu3 %v3393_v63  ;;  %v1592_v63 = vld [vmem:[%s5778_s8 + $0x58] sm:$0xff] }
 0x185   : > { %1442 = vmatpush.msra.mxu3 %v3391_v5  ;;  %v1588_v5 = vld [vmem:[%s5778_s8 + $0x38] sm:$0xff] }
 0x187   : > { %1443 = vmatpush.msra.mxu3 %v3389_v9 }
 0x189   : > { %v1078_v21 = vpop.f32.mrf.mxu2  ;;  %v1107_v3 = vpop.f32.mrf.mxu3  ;;  %1444 = vmatpush.msra.mxu3 %v3387_v15 }
 0x18a   : > { %v1108_v17 = vadd.f32 %v1107_v3, %v1078_v21  ;;  %v3363_v21 = vld [vmem:[%s5775_s5 + $0x190] sm:$0xff]  ;;  %v3364_v3 = vld [vmem:[%s5775_s5 + $0x198] sm:$0xff] }
 0x18b   : > { %1355 = vmatpush.msra.mxu1 %v3363_v21  ;;  %1378 = vmatpush.msra.mxu2 %v3364_v3  ;;  %v1600_v21 = vld [vmem:[%s5778_s8 + $0x98] sm:$0xff] }
 0x18c   : > { %3320 = vmatpush.msk.msrb.mxu0 %vm562_vm0, %v1108_v17  ;;  %v3386_v17 = vld [vmem:[%s5775_s5 + $0x218] sm:$0xff]  ;;  %1445 = vmatpush.msra.mxu3 %v3385_v4 }
 0x18d   : > { %1356 = vmatpush.msra.mxu1 %v3361_v18  ;;  %1379 = vmatpush.msra.mxu2 %v3362_v22  ;;  %v1598_v18 = vld [vmem:[%s5778_s8 + $0x88] sm:$0xff]  ;;  %v1597_v22 = vld [vmem:[%s5778_s8 + $0x80] sm:$0xff] }
 0x18e   : > { %1132 = vmatpush.msrb.mxu0 %v1105_v24  ;;  %v3360_v24 = vld [vmem:[%s5775_s5 + $0x178] sm:$0xff] }
 0x18f   : > { %1357 = vmatpush.msra.mxu1 %v3359_v23  ;;  %1380 = vmatpush.msra.mxu2 %v3360_v24 }
 0x190   : > { %1133 = vmatpush.msrb.mxu0 %v1102_v28 }
 0x191   : > { %1358 = vmatpush.msra.mxu1 %v3357_v25  ;;  %1381 = vmatpush.msra.mxu2 %v3358_v26 }
 0x192   : > { %1134 = vmatpush.msrb.mxu0 %v1099_v34  ;;  %v3434_v34 = vld [vmem:[%s5775_s5 + $0x368] sm:$0xf] }
 0x193   : > { %3321 = vmatmul.msk.f32.vlgmr.msrb.gmra.mxu0 %vm499_vm1, %v1016_v35 }
 0x194   : > { %3354 = vmatpush.msk.msra.mxu0 %vm562_vm0, %v1163_v12  ;;  %v3431_v12 = vld [vmem:[%s5775_s5 + $0x350] sm:$0xff] }
 0x196   : > { %1289 = vmatpush.msra.mxu0 %v1161_v30  ;;  %v3432_v30 = vld [vmem:[%s5775_s5 + $0x358] sm:$0xff] }
 0x198   : > { %1290 = vmatpush.msra.mxu0 %v1159_v31 }
 0x19a   : > { %1291 = vmatpush.msra.mxu0 %v1157_v36  ;;  %v3429_v36 = vld [vmem:[%s5775_s5 + $0x340] sm:$0xff] }
 0x19b   : > { %3322 = vmatmul.msk.f32.gmra.mxu0 %vm499_vm1, %v1017_v37  ;;  %v3430_v37 = vld [vmem:[%s5775_s5 + $0x348] sm:$0xff] }
 0x19c   : > { %1292 = vmatpush.msra.mxu0 %v1155_v38 }
 0x19e   : > { %1293 = vmatpush.msra.mxu0 %v1153_v39  ;;  %v3427_v39 = vld [vmem:[%s5775_s5 + $0x330] sm:$0xff] }
 0x1a0   : > { %1294 = vmatpush.msra.mxu0 %v1151_v42  ;;  %v3428_v42 = vld [vmem:[%s5775_s5 + $0x338] sm:$0xff] }
 0x1a2   : > { %1295 = vmatpush.msra.mxu0 %v1149_v43  ;;  %v3425_v43 = vld [vmem:[%s5775_s5 + $0x320] sm:$0xff] }
 0x1a4   : > { %1296 = vmatpush.msra.mxu0 %v1147_v44  ;;  %v3426_v44 = vld [vmem:[%s5775_s5 + $0x328] sm:$0xff] }
 0x1a6   : > { %1297 = vmatpush.msra.mxu0 %v1145_v45 }
 0x1a8   : > { %1298 = vmatpush.msra.mxu0 %v1143_v48  ;;  %v3423_v48 = vld [vmem:[%s5775_s5 + $0x310] sm:$0xff] }
 0x1aa   : > { %3410 = vmatpush.msk.msrb.mxu0 %vm562_vm0, %v3406_v49  ;;  %v3424_v49 = vld [vmem:[%s5775_s5 + $0x318] sm:$0xff] }
 0x1ac   : > { %1459 = vmatpush.msrb.mxu0 %v3404_v50 }
 0x1ae   : > { %1460 = vmatpush.msrb.mxu0 %v3402_v40  ;;  %v3422_v40 = vld [vmem:[%s5775_s5 + $0x308] sm:$0xff] }
 0x1b0   : > { %1461 = vmatpush.msrb.mxu0 %v3400_v52  ;;  %v3415_v52 = vld [vmem:[%s5775_s5 + $0x2d0] sm:$0xff] }
 0x1b2   : > { %1462 = vmatpush.msrb.mxu0 %v3398_v56 }
 0x1b4   : > { %1463 = vmatpush.msrb.mxu0 %v3396_v60  ;;  %v1595_v60 = vld [vmem:[%s5778_s8 + $0x70] sm:$0xff] }
 0x1b6   : > { %1464 = vmatpush.msrb.mxu0 %v3394_v0  ;;  %v1591_v0 = vld [vmem:[%s5778_s8 + $0x50] sm:$0xff] }
 0x1b8   : > { %1465 = vmatpush.msrb.mxu0 %v3392_v6  ;;  %v1587_v6 = vld [vmem:[%s5778_s8 + $0x30] sm:$0xff] }
 0x1ba   : > { %1466 = vmatpush.msrb.mxu0 %v3390_v10  ;;  %v1584_v10 = vld [vmem:[%s5778_s8 + $0x18] sm:$0xff] }
 0x1bc   : > { %1467 = vmatpush.msrb.mxu0 %v3388_v16  ;;  %v1581_v16 = vld [vmem:[%s5778_s8] sm:$0xff] }
 0x1be   : > { %1468 = vmatpush.msrb.mxu0 %v3386_v17  ;;  %v1599_v17 = vld [vmem:[%s5778_s8 + $0x90] sm:$0xff] }
 0x210   : > { %v4495_v27 = vpop.f32.mrf.mxu0 }
 0x211   : > { %3352 = vmatmul.msk.f32.vlgmr.msrb.gmra.mxu3 %vm1193_vm4, %v4495_v27  ;;  %3355 = vmatmul.msk.f32.vlgmr.msra.gmra.mxu0 %vm1193_vm4, %v4495_v27  ;;  %v1190_v29 = vrot.slane %v4495_v27, 1  ;;  %v1417_v31 = vrot.slane %v4495_v27, 3  ;;  %v1330_v50 = vrot.slane %v4495_v27, 2  ;;  %v1503_v57 = vrot.slane %v4495_v27, 4  ;;  %v3453_v27 = vld [vmem:[%s5800_s1 + $0x70] sm:$0xf] }
 0x212   : > { %1608 = vmatpush.msrb.mxu3 %v1596_v59  ;;  %1643 = vmatpush.msra.mxu0 %v1600_v21 }
 0x214   : > { %1609 = vmatpush.msrb.mxu3 %v1595_v60  ;;  %1644 = vmatpush.msra.mxu0 %v1599_v17 }
 0x216   : > { %1610 = vmatpush.msrb.mxu3 %v1594_v61  ;;  %1645 = vmatpush.msra.mxu0 %v1598_v18 }
 0x218   : > { %v4501_v28 = vpop.f32.mrf.mxu0  ;;  %1611 = vmatpush.msrb.mxu3 %v1593_v62  ;;  %1646 = vmatpush.msra.mxu0 %v1597_v22 }
 0x219   : > { %3353 = vmatmul.msk.f32.gmra.mxu3 %vm1193_vm4, %v4501_v28  ;;  %3356 = vmatmul.msk.f32.gmra.mxu0 %vm1193_vm4, %v4501_v28  ;;  %v1191_v32 = vrot.slane %v4501_v28, 1  ;;  %v1418_v11 = vrot.slane %v4501_v28, 3  ;;  %v1331_v45 = vrot.slane %v4501_v28, 2  ;;  %v1504_v56 = vrot.slane %v4501_v28, 4  ;;  %v3451_v28 = vld [vmem:[%s5800_s1 + $0x60] sm:$0xff] }
 0x21a   : > { %1612 = vmatpush.msrb.mxu3 %v1592_v63 }
 0x21b   : > { %v1192_v35 = vsel %vm1189_vm5, %v1190_v29, %v1191_v32  ;;  %v1419_v38 = vsel %vm1416_vm6, %v1417_v31, %v1418_v11  ;;  %v1332_v20 = vsel %vm1329_vm7, %v1330_v50, %v1331_v45  ;;  %v1505_v58 = vsel %vm562_vm0, %v1503_v57, %v1504_v56 }
 0x21c   : > { %3346 = vmatmul.msk.f32.vlgmr.msrb.gmra.mxu1 %vm1193_vm4, %v1192_v35  ;;  %3349 = vmatmul.msk.f32.vlgmr.msrb.gmra.mxu2 %vm1193_vm4, %v1192_v35  ;;  %v514_v35 = vld [vmem:[%s3979_s24 + $0x30] sm:$0xff] }
 0x21d   : > { %3435 = vmatpush.msk.msrb.mxu1 %vm562_vm0, %v3433_v33  ;;  %3438 = vmatpush.msk.msrb.mxu2 %vm562_vm0, %v3434_v34  ;;  %v512_v33 = vld [vmem:[%s3979_s24 + $0x20] sm:$0xff]  ;;  %v513_v34 = vld [vmem:[%s3979_s24 + $0x28] sm:$0xff]  ;;  %523 = vst.msk [vmem:[#allocation2 + $0x32] sm:$0xff] %vm499_vm1, %v514_v35  ;;  %v3495_v35 = vld [vmem:[%s5800_s1 + $0xd0] sm:$0xff] }
 0x21e   : > { %1613 = vmatpush.msrb.mxu3 %v1591_v0  ;;  %521 = vst.msk [vmem:[#allocation2 + $0x22] sm:$0xff] %vm499_vm1, %v512_v33  ;;  %v3497_v33 = vld [vmem:[%s5800_s1 + $0xe0] sm:$0xff] }
 0x21f   : > { %1522 = vmatpush.msrb.mxu1 %v3431_v12  ;;  %1545 = vmatpush.msrb.mxu2 %v3432_v30  ;;  %v515_v12 = vld [vmem:[%s3979_s24 + $0x38] sm:$0xf]  ;;  %522 = vst.msk [vmem:[#allocation2 + $0x2a] sm:$0xff] %vm499_vm1, %v513_v34  ;;  %v3517_v34 = vld [vmem:[%s5800_s1 + $0x130] sm:$0xf]  ;;  %s5805_s24 = smov 64  }
 0x220   : > { %1614 = vmatpush.msrb.mxu3 %v1590_v1  ;;  %524 = vst.msk [vmem:[#allocation2 + $0x3a] sm:$0xf] %vm519_vm2, %v515_v12  ;;  %v3493_v12 = vld [vmem:[%s5800_s1 + $0xc0] sm:$0xff]  ;;  %vm1717_vm2 = vcmask 518146  }
 0x221   : > { %3408 = vmatmul.msk.f32.vlgmr.msra.gmra.mxu3 %vm1193_vm4, %v1419_v38  ;;  %3411 = vmatmul.msk.f32.vlgmr.msrb.gmra.mxu0 %vm1193_vm4, %v1419_v38  ;;  %v3447_v38 = vld [vmem:[%s5800_s1 + $0x40] sm:$0xff] }
 0x222   : > { %1523 = vmatpush.msrb.mxu1 %v3429_v36  ;;  %1546 = vmatpush.msrb.mxu2 %v3430_v37  ;;  %v1742_v36 = vld [vmem:[%s5800_s1 + $0x20] sm:$0xff] }
 0x223   : > { %1615 = vmatpush.msrb.mxu3 %v1589_v2 }
 0x224   : > { %3347 = vmatmul.msk.f32.gmra.mxu1 %vm1193_vm4, %v1191_v32  ;;  %3350 = vmatmul.msk.f32.gmra.mxu2 %vm1193_vm4, %v1191_v32  ;;  %v3449_v32 = vld [vmem:[%s5800_s1 + $0x50] sm:$0xff] }
 0x225   : > { %1524 = vmatpush.msrb.mxu1 %v3427_v39  ;;  %1547 = vmatpush.msrb.mxu2 %v3428_v42  ;;  %v1740_v39 = vld [vmem:[%s5800_s1 + $0x10] sm:$0xff]  ;;  %v1734_v22 = vld [vmem:[#allocation2 + $0x20] sm:$0xff] }
 0x226   : > { %1616 = vmatpush.msrb.mxu3 %v1588_v5  ;;  %v3481_v42 = vld [vmem:[%s5800_s1 + $0xb0] sm:$0xf] }
 0x227   : > { %1525 = vmatpush.msrb.mxu1 %v3425_v43  ;;  %1548 = vmatpush.msrb.mxu2 %v3426_v44  ;;  %v1738_v44 = vld [vmem:[%s5800_s1] sm:$0xff] }
 0x228   : > { %1617 = vmatpush.msrb.mxu3 %v1587_v6  ;;  %v4726_v18 = vld [vmem:[#allocation2 + $0x39] sm:$0xf] }
 0x229   : > { %3409 = vmatmul.msk.f32.gmra.mxu3 %vm1193_vm4, %v1418_v11  ;;  %3412 = vmatmul.msk.f32.gmra.mxu0 %vm1193_vm4, %v1418_v11  ;;  %v1744_v11 = vld [vmem:[%s5800_s1 + $0x30] sm:$0xf] }
 0x22a   : > { %1526 = vmatpush.msrb.mxu1 %v3423_v48  ;;  %1549 = vmatpush.msrb.mxu2 %v3424_v49  ;;  %v1566_v48 = vld [vmem:[%s5776_s6] sm:$0x3] }
 0x22b   : > { %1618 = vmatpush.msrb.mxu3 %v1586_v7  ;;  %v3479_v49 = vld [vmem:[%s5800_s1 + $0xa0] sm:$0xff]  ;;  %v1569_v61 = vperm.slane %v1566_v48, 1 }
 0x22c   : > { %3380 = vmatmul.msk.f32.vlgmr.msra.gmra.mxu1 %vm1193_vm4, %v1332_v20  ;;  %3383 = vmatmul.msk.f32.vlgmr.msra.gmra.mxu2 %vm1193_vm4, %v1332_v20 }
 0x22d   : > { %1527 = vmatpush.msrb.mxu1 %v3421_v19  ;;  %1550 = vmatpush.msrb.mxu2 %v3422_v40  ;;  %v4707_v19 = vld [vmem:[#allocation2 + $0x21] sm:$0xff] }
 0x22e   : > { %1619 = vmatpush.msrb.mxu3 %v1585_v8 }
 0x22f   : > { %1528 = vmatpush.msrb.mxu1 %v3419_v41  ;;  %1551 = vmatpush.msrb.mxu2 %v3420_v46  ;;  %v1568_v41 = vperm.slane %v1566_v48, 0  ;;  %v3477_v46 = vld [vmem:[%s5800_s1 + $0x90] sm:$0xff]  ;;  %v2008_v48 = vld [vmem:[#allocation2 + $0x33] sm:$0xff] }
 0x230   : > { %1620 = vmatpush.msrb.mxu3 %v1584_v10 }
 0x231   : > { %1529 = vmatpush.msrb.mxu1 %v3417_v47  ;;  %1552 = vmatpush.msrb.mxu2 %v3418_v51 }
 0x232   : > { %1621 = vmatpush.msrb.mxu3 %v1583_v13 }
 0x233   : > { %1530 = vmatpush.msrb.mxu1 %v3415_v52  ;;  %1553 = vmatpush.msrb.mxu2 %v3416_v53 }
 0x234   : > { %3381 = vmatmul.msk.f32.gmra.mxu1 %vm1193_vm4, %v1331_v45  ;;  %3384 = vmatmul.msk.f32.gmra.mxu2 %vm1193_vm4, %v1331_v45 }
 0x235   : > { %1531 = vmatpush.msrb.mxu1 %v3413_v54  ;;  %1554 = vmatpush.msrb.mxu2 %v3414_v55  ;;  %v3475_v54 = vld [vmem:[%s5800_s1 + $0x80] sm:$0xff] }
 0x236   : > { %1622 = vmatpush.msrb.mxu3 %v1582_v14  ;;  %v4721_v14 = vld [vmem:[#allocation2 + $0x31] sm:$0xff] }
 0x237   : > { %3455 = vmatpush.msk.msra.mxu2 %vm562_vm0, %v3453_v27  ;;  %v4742_v27 = vld [vmem:[#allocation2 + $0x32] sm:$0xff] }
 0x238   : > { %1623 = vmatpush.msrb.mxu3 %v1581_v16 }
 0x239   : > { %1789 = vmatpush.msra.mxu2 %v3451_v28  ;;  %v4746_v28 = vld [vmem:[#allocation2 + $0x38] sm:$0xf] }
 0x23a   : > { %3465 = vmatpush.msk.msra.mxu3 %vm562_vm0, %v1744_v11  ;;  %v3515_v11 = vld [vmem:[%s5800_s1 + $0x120] sm:$0xff] }
 0x23b   : > { %1790 = vmatpush.msra.mxu2 %v3449_v32  ;;  %v4754_v32 = vld [vmem:[#allocation2 + $0x3a] sm:$0xf] }
 0x23c   : > { %3436 = vmatmul.msk.f32.vlgmr.msrb.gmra.mxu1 %vm1193_vm4, %v1505_v58  ;;  %3439 = vmatmul.msk.f32.vlgmr.msrb.gmra.mxu2 %vm1193_vm4, %v1505_v58  ;;  %v4717_v58 = vld [vmem:[#allocation2 + $0x29] sm:$0xff] }
 0x23d   : > { %1865 = vmatpush.msra.mxu3 %v1742_v36  ;;  %1791 = vmatpush.msra.mxu2 %v3447_v38  ;;  %v1745_v36 = vld [vmem:[%s5800_s1 + $0x38] sm:$0xf]  ;;  %v4787_v38 = vld [vmem:[#allocation2 + $0x24] sm:$0xff] }
 0x23e   : > { %3470 = vmatpush.msk.msrb.mxu0 %vm562_vm0, %v1745_v36  ;;  %v2225_v36 = vld [vmem:[%s5774_s4 + $0x18] sm:$0xff] }
 0x23f   : > { %1866 = vmatpush.msra.mxu3 %v1740_v39  ;;  %3483 = vmatpush.msk.msrb.mxu2 %vm562_vm0, %v3481_v42  ;;  %v1743_v39 = vld [vmem:[%s5800_s1 + $0x28] sm:$0xff]  ;;  %v1741_v42 = vld [vmem:[%s5800_s1 + $0x18] sm:$0xff] }
 0x240   : > { %1894 = vmatpush.msrb.mxu0 %v1743_v39  ;;  %v2224_v39 = vld [vmem:[%s5774_s4 + $0x10] sm:$0xff] }
 0x241   : > { %1867 = vmatpush.msra.mxu3 %v1738_v44  ;;  %1953 = vmatpush.msrb.mxu2 %v3479_v49  ;;  %v2007_v44 = vld [vmem:[#allocation2 + $0x2b] sm:$0xff]  ;;  %v4807_v49 = vld [vmem:[#allocation2 + $0x34] sm:$0xff] }
 0x242   : > { %1895 = vmatpush.msrb.mxu0 %v1741_v42 }
 0x243   : > { %1954 = vmatpush.msrb.mxu2 %v3477_v46 }
 0x244   : > { %3437 = vmatmul.msk.f32.gmra.mxu1 %vm1193_vm4, %v1504_v56  ;;  %3440 = vmatmul.msk.f32.gmra.mxu2 %vm1193_vm4, %v1504_v56 }
 0x245   : > { %1955 = vmatpush.msrb.mxu2 %v3475_v54  ;;  %v3454_v54 = vld [vmem:[%s5800_s1 + $0x78] sm:$0xf] }
 0x24c   : > { %3456 = vmatmul.msk.f32.vlgmr.msra.gmra.mxu2 %vm499_vm1, %v4707_v19 }
 0x24d   : > { %3519 = vmatpush.msk.msra.mxu2 %vm562_vm0, %v3517_v34 }
 0x24f   : > { %2145 = vmatpush.msra.mxu2 %v3515_v11  ;;  %v2226_v11 = vld [vmem:[%s5774_s4 + $0x20] sm:$0xff] }
 0x254   : > { %3457 = vmatmul.msk.f32.gmra.mxu2 %vm499_vm1, %v4717_v58 }
 0x25c   : > { %3458 = vmatmul.msk.f32.gmra.mxu2 %vm499_vm1, %v4721_v14 }
 0x264   : > { %3459 = vmatmul.msk.f32.gmra.mxu2 %vm499_vm1, %v4726_v18 }
 0x28e   : > { %v1300_v23 = vpop.f32.mrf.mxu0 }
 0x294   : > { %v1277_v3 = vpop.f32.mrf.mxu3 }
 0x296   : > { %v1303_v30 = vpop.f32.mrf.mxu0 }
 0x299   : > { %v1221_v9 = vpop.f32.mrf.mxu1 }
 0x29a   : > { %v1278_v37 = vadd.f32 %v1277_v3, %v1221_v9 }
 0x29c   : > { %v1280_v26 = vpop.f32.mrf.mxu3 }
 0x29e   : > { %v1470_v55 = vpop.f32.mrf.mxu0 }
 0x29f   : > { %v1244_v15 = vpop.f32.mrf.mxu2 }
 0x2a0   : > { %v1301_v40 = vadd.f32 %v1300_v23, %v1244_v15  ;;  %v4732_v23 = vld [vmem:[#allocation2 + $0x22] sm:$0xff] }
 0x2a1   : > { %v1224_v4 = vpop.f32.mrf.mxu1  ;;  %3484 = vmatmul.msk.f32.vlgmr.msrb.gmra.mxu2 %vm499_vm1, %v4732_v23 }
 0x2a2   : > { %v1281_v51 = vadd.f32 %v1280_v26, %v1224_v4  ;;  %v1736_v26 = vld [vmem:[#allocation2 + $0x30] sm:$0xff] }
 0x2a4   : > { %v1447_v45 = vpop.f32.mrf.mxu3 }
 0x2a6   : > { %v1473_v13 = vpop.f32.mrf.mxu0 }
 0x2a7   : > { %v1247_v24 = vpop.f32.mrf.mxu2 }
 0x2a8   : > { %v1304_v0 = vadd.f32 %v1303_v30, %v1247_v24  ;;  %v1735_v24 = vld [vmem:[#allocation2 + $0x28] sm:$0xff] }
 0x2a9   : > { %v1360_v25 = vpop.f32.mrf.mxu1  ;;  %v3513_v30 = vld [vmem:[%s5800_s1 + $0x110] sm:$0xff] }
 0x2aa   : > { %v1389_v43 = vadd.f32 %v1360_v25, %v1278_v37  ;;  %v4737_v25 = vld [vmem:[#allocation2 + $0x2a] sm:$0xff]  ;;  %2146 = vmatpush.msra.mxu2 %v3513_v30  ;;  %v3511_v37 = vld [vmem:[%s5800_s1 + $0x100] sm:$0xff] }
 0x2ab   : > { %3485 = vmatmul.msk.f32.gmra.mxu2 %vm499_vm1, %v4737_v25 }
 0x2ac   : > { %v1476_v20 = vadd.f32 %v1447_v45, %v1389_v43  ;;  %v1450_v62 = vpop.f32.mrf.mxu3  ;;  %2147 = vmatpush.msra.mxu2 %v3511_v37  ;;  %v1739_v43 = vld [vmem:[%s5800_s1 + $0x8] sm:$0xff]  ;;  %v4801_v45 = vld [vmem:[#allocation2 + $0x2c] sm:$0xff] }
 0x2ad   : > { %1896 = vmatpush.msrb.mxu0 %v1739_v43 }
 0x2af   : > { %v1383_v29 = vpop.f32.mrf.mxu2 }
 0x2b0   : > { %v1390_v52 = vadd.f32 %v1383_v29, %v1301_v40  ;;  %v3499_v29 = vld [vmem:[%s5800_s1 + $0xf0] sm:$0xf] }
 0x2b1   : > { %v1363_v31 = vpop.f32.mrf.mxu1 }
 0x2b2   : > { %v1391_v56 = vadd.f32 %v1363_v31, %v1281_v51  ;;  %v1477_v60 = vadd.f32 %v1470_v55, %v1390_v52  ;;  %v4777_v31 = vld [vmem:[#allocation2 + $0x23] sm:$0xff] }
 0x2b3   : > { %3486 = vmatmul.msk.f32.gmra.mxu2 %vm499_vm1, %v4742_v27  ;;  %v3452_v55 = vld [vmem:[%s5800_s1 + $0x68] sm:$0xff] }
 0x2b4   : > { %v1478_v2 = vadd.f32 %v1450_v62, %v1391_v56  ;;  %v3500_v56 = vld [vmem:[%s5800_s1 + $0xf8] sm:$0xf] }
 0x2b5   : > { %v3482_v62 = vld [vmem:[%s5800_s1 + $0xb8] sm:$0xf] }
 0x2b7   : > { %v1386_v50 = vpop.f32.mrf.mxu2 }
 0x2b8   : > { %v1392_v6 = vadd.f32 %v1386_v50, %v1304_v0  ;;  %v3494_v0 = vld [vmem:[%s5800_s1 + $0xc8] sm:$0xff] }
 0x2b9   : > { %v1533_v47 = vpop.f32.mrf.mxu1 }
 0x2ba   : > { %v1562_v53 = vadd.f32 %v1533_v47, %v1476_v20  ;;  %v1479_v15 = vadd.f32 %v1473_v13, %v1392_v6  ;;  %v2009_v20 = vld [vmem:[#allocation2 + $0x3b] sm:$0xf] }
 0x2bb   : > { %3487 = vmatmul.msk.f32.gmra.mxu2 %vm499_vm1, %v4754_v32 }
 0x2bc   : > { %v1572_v57 = vadd.f32 %v1568_v41, %v1562_v53  ;;  %v1580_v53 = vld [vmem:[%s5777_s7] sm:$0x1f] }
 0x2be   : > { %v1576_v59 = vmax.f32 %v1572_v57, 0.0  ;;  %v3498_v57 = vld [vmem:[%s5800_s1 + $0xe8] sm:$0xff] }
 0x2bf   : > { %v1556_v63 = vpop.f32.mrf.mxu2 }
 0x2c0   : > { %v1563_v1 = vadd.f32 %v1556_v63, %v1477_v60  ;;  %1624 = vmatmul.f32.vlgmr.msrb.gmra.mxu3 %v1576_v59  ;;  %v3450_v59 = vld [vmem:[%s5800_s1 + $0x58] sm:$0xff]  ;;  %v3480_v63 = vld [vmem:[%s5800_s1 + $0xa8] sm:$0xff] }
 0x2c1   : > { %v1536_v5 = vpop.f32.mrf.mxu1  ;;  %3501 = vmatpush.msk.msrb.mxu3 %vm562_vm0, %v3499_v29  ;;  %v3496_v60 = vld [vmem:[%s5800_s1 + $0xd8] sm:$0xff] }
 0x2c2   : > { %v1573_v7 = vadd.f32 %v1569_v61, %v1563_v1  ;;  %v1564_v8 = vadd.f32 %v1536_v5, %v1478_v2  ;;  %v3478_v1 = vld [vmem:[%s5800_s1 + $0x98] sm:$0xff]  ;;  %v3516_v5 = vld [vmem:[%s5800_s1 + $0x128] sm:$0xff] }
 0x2c3   : > { %2049 = vmatpush.msrb.mxu3 %v3497_v33  ;;  %3520 = vmatmul.msk.f32.vlgmr.msra.gmra.mxu2 %vm499_vm1, %v4787_v38  ;;  %v3518_v2 = vld [vmem:[%s5800_s1 + $0x138] sm:$0xf]  ;;  %v2228_v33 = vld [vmem:[%s5774_s4 + $0x30] sm:$0xff] }
 0x2c4   : > { %v1577_v9 = vmax.f32 %v1573_v7, 0.0  ;;  %v1574_v10 = vadd.f32 %v1568_v41, %v1564_v8  ;;  %v4813_v41 = vld [vmem:[#allocation2 + $0x3c] sm:$0xf]  ;;  %v3512_v7 = vld [vmem:[%s5800_s1 + $0x108] sm:$0xff]  ;;  %v2229_v29 = vld [vmem:[%s5774_s4 + $0x38] sm:$0xff] }
 0x2c5   : > { %2050 = vmatpush.msrb.mxu3 %v3495_v35  ;;  %v2227_v35 = vld [vmem:[%s5774_s4 + $0x28] sm:$0xff] }
 0x2c6   : > { %3441 = vmatmul.msk.f32.vlgmr.msra.gmra.mxu0 %vm1601_vm8, %v1577_v9  ;;  %v1578_v16 = vmax.f32 %v1574_v10, 0.0 }
 0x2c7   : > { %v1559_v21 = vpop.f32.mrf.mxu2  ;;  %2051 = vmatpush.msrb.mxu3 %v3493_v12  ;;  %3506 = vmatpush.msk.msra.mxu0 %vm562_vm0, %v3500_v56 }
 0x2c8   : > { %v1565_v3 = vadd.f32 %v1559_v21, %v1479_v15  ;;  %1627 = vmatmul.f32.gmra.mxu3 %v1578_v16  ;;  %v2236_v15 = vld [vmem:[%s5774_s4 + $0x70] sm:$0xff]  ;;  %v2235_v21 = vld [vmem:[%s5774_s4 + $0x68] sm:$0xff] }
 0x2c9   : > { %2078 = vmatpush.msra.mxu0 %v3498_v57 }
 0x2ca   : > { %v1575_v4 = vadd.f32 %v1569_v61, %v1565_v3  ;;  %v3448_v61 = vld [vmem:[%s5800_s1 + $0x48] sm:$0xff]  ;;  %v2234_v3 = vld [vmem:[%s5774_s4 + $0x60] sm:$0xff] }
 0x2cb   : > { %3521 = vmatmul.msk.f32.gmra.mxu2 %vm499_vm1, %v4801_v45  ;;  %2079 = vmatpush.msra.mxu0 %v3496_v60 }
 0x2cc   : > { %v1579_v17 = vmax.f32 %v1575_v4, 0.0  ;;  %v2233_v4 = vld [vmem:[%s5774_s4 + $0x58] sm:$0xff] }
 0x2cd   : > { %2080 = vmatpush.msra.mxu0 %v3494_v0 }
 0x2ce   : > { %3442 = vmatmul.msk.f32.gmra.mxu0 %vm1601_vm8, %v1579_v17 }
 0x2cf   : > { %v1793_v6 = vpop.f32.mrf.mxu2 }
 0x2d0   : > { %3466 = vmatmul.msk.f32.vlgmr.msra.gmra.mxu3 %vm499_vm1, %v1734_v22 }
 0x2d3   : > { %3522 = vmatmul.msk.f32.gmra.mxu2 %vm499_vm1, %v4807_v49 }
 0x2d6   : > { %3471 = vmatmul.msk.f32.vlgmr.msrb.gmra.mxu0 %vm499_vm1, %v1734_v22  ;;  %v2231_v22 = vld [vmem:[%s5774_s4 + $0x48] sm:$0xff] }
 0x2d7   : > { %v1796_v8 = vpop.f32.mrf.mxu2 }
 0x2d8   : > { %3467 = vmatmul.msk.f32.gmra.mxu3 %vm499_vm1, %v1735_v24 }
 0x2db   : > { %3523 = vmatmul.msk.f32.gmra.mxu2 %vm499_vm1, %v4813_v41 }
 0x2de   : > { %3472 = vmatmul.msk.f32.gmra.mxu0 %vm499_vm1, %v1735_v24  ;;  %v2230_v24 = vld [vmem:[%s5774_s4 + $0x40] sm:$0xff] }
 0x2df   : > { %v1799_v9 = vpop.f32.mrf.mxu2 }
 0x2e0   : > { %3468 = vmatmul.msk.f32.gmra.mxu3 %vm499_vm1, %v1736_v26 }
 0x2e6   : > { %3473 = vmatmul.msk.f32.gmra.mxu0 %vm499_vm1, %v1736_v26 }
 0x2e7   : > { %v4897_v10 = vpop.f32.mrf.mxu2 }
 0x2e8   : > { %3469 = vmatmul.msk.f32.gmra.mxu3 %vm499_vm1, %v4746_v28 }
 0x2ee   : > { %3474 = vmatmul.msk.f32.gmra.mxu0 %vm499_vm1, %v4746_v28 }
 0x2f0   : > { %3502 = vmatmul.msk.f32.vlgmr.msrb.gmra.mxu3 %vm499_vm1, %v4777_v31 }
 0x2f6   : > { %3507 = vmatmul.msk.f32.vlgmr.msra.gmra.mxu0 %vm499_vm1, %v4777_v31 }
 0x2f8   : > { %3503 = vmatmul.msk.f32.gmra.mxu3 %vm499_vm1, %v2007_v44 }
 0x2fe   : > { %3508 = vmatmul.msk.f32.gmra.mxu0 %vm499_vm1, %v2007_v44  ;;  %v2223_v44 = vld [vmem:[%s5774_s4 + $0x8] sm:$0xff] }
 0x300   : > { %3504 = vmatmul.msk.f32.gmra.mxu3 %vm499_vm1, %v2008_v48 }
 0x306   : > { %3509 = vmatmul.msk.f32.gmra.mxu0 %vm499_vm1, %v2008_v48 }
 0x308   : > { %3505 = vmatmul.msk.f32.gmra.mxu3 %vm499_vm1, %v2009_v20 }
 0x30e   : > { %3510 = vmatmul.msk.f32.gmra.mxu0 %vm499_vm1, %v2009_v20 }
 0x324   : > { %v1957_v16 = vpop.f32.mrf.mxu2 }
 0x343   : > { %v1625_v50 = vpop.f32.mrf.mxu3  ;;  %v1648_v40 = vpop.f32.mrf.mxu0 }
 0x344   : > { %v1649_v52 = vadd.f32 %v1648_v40, %v1625_v50 }
 0x34b   : > { %v1628_v46 = vpop.f32.mrf.mxu3  ;;  %v1651_v47 = vpop.f32.mrf.mxu0 }
 0x34c   : > { %v1652_v51 = vadd.f32 %v1651_v47, %v1628_v46 }
 0x34e   : > { %3443 = vmatpush.msk.msra.mxu1 %vm1658_vm9, %v1652_v51 }
 0x350   : > { %1677 = vmatpush.msra.mxu1 %v1649_v52 }
 0x351   : > { %3444 = vmatmul.msk.f32.vlgmr.msra.gmra.mxu1 %vm1654_vm10, %v1580_v53 }
 0x352   : > { %3460 = vmatpush.msk.msrb.mxu1 %vm562_vm0, %v3454_v54 }
 0x353   : > { %v1869_v13 = vpop.f32.mrf.mxu3 }
 0x354   : > { %1818 = vmatpush.msrb.mxu1 %v3452_v55  ;;  %v1870_v28 = vadd.f32 %v1869_v13, %v1793_v6 }
 0x356   : > { %1819 = vmatpush.msrb.mxu1 %v3450_v59  ;;  %v1998_v34 = vadd.f32 %v1957_v16, %v1870_v28 }
 0x358   : > { %1820 = vmatpush.msrb.mxu1 %v3448_v61 }
 0x359   : > { %3461 = vmatmul.msk.f32.vlgmr.msrb.gmra.mxu1 %vm499_vm1, %v4707_v19  ;;  %v3476_v19 = vld [vmem:[%s5800_s1 + $0x88] sm:$0xff] }
 0x35a   : > { %3488 = vmatpush.msk.msra.mxu1 %vm562_vm0, %v3482_v62 }
 0x35b   : > { %v1872_v17 = vpop.f32.mrf.mxu3 }
 0x35c   : > { %1982 = vmatpush.msra.mxu1 %v3480_v63  ;;  %v1873_v30 = vadd.f32 %v1872_v17, %v1796_v8 }
 0x35e   : > { %1983 = vmatpush.msra.mxu1 %v3478_v1 }
 0x360   : > { %1984 = vmatpush.msra.mxu1 %v3476_v19 }
 0x361   : > { %3462 = vmatmul.msk.f32.gmra.mxu1 %vm499_vm1, %v4717_v58  ;;  %v3514_v58 = vld [vmem:[%s5800_s1 + $0x118] sm:$0xff] }
 0x362   : > { %3524 = vmatpush.msk.msrb.mxu1 %vm562_vm0, %v3518_v2 }
 0x364   : > { %2174 = vmatpush.msrb.mxu1 %v3516_v5 }
 0x366   : > { %2175 = vmatpush.msrb.mxu1 %v3514_v58 }
 0x368   : > { %2176 = vmatpush.msrb.mxu1 %v3512_v7 }
 0x369   : > { %3463 = vmatmul.msk.f32.gmra.mxu1 %vm499_vm1, %v4721_v14  ;;  %v2237_v14 = vld [vmem:[%s5774_s4 + $0x78] sm:$0xff] }
 0x36a   : > { %2255 = vmatpush.msra.mxu3 %v2237_v14  ;;  %v1898_v14 = vpop.f32.mrf.mxu0 }
 0x36c   : > { %2256 = vmatpush.msra.mxu3 %v2236_v15 }
 0x36e   : > { %2257 = vmatpush.msra.mxu3 %v2235_v21 }
 0x370   : > { %2258 = vmatpush.msra.mxu3 %v2234_v3 }
 0x371   : > { %3464 = vmatmul.msk.f32.gmra.mxu1 %vm499_vm1, %v4726_v18  ;;  %v2232_v18 = vld [vmem:[%s5774_s4 + $0x50] sm:$0xff] }
 0x372   : > { %2259 = vmatpush.msra.mxu3 %v2233_v4  ;;  %v1901_v3 = vpop.f32.mrf.mxu0  ;;  %v2242_v4 = vld [vmem:[%s5774_s4 + $0xa0] sm:$0xff] }
 0x373   : > { %2295 = vmatpush.msrb.mxu0 %v2242_v4 }
 0x374   : > { %2260 = vmatpush.msra.mxu3 %v2232_v18  ;;  %v2241_v18 = vld [vmem:[%s5774_s4 + $0x98] sm:$0xff] }
 0x375   : > { %2296 = vmatpush.msrb.mxu0 %v2241_v18  ;;  %v3550_v18 = vld [vmem:[%s5775_s5 + $0x120] sm:$0xff] }
 0x376   : > { %2261 = vmatpush.msra.mxu3 %v2231_v22  ;;  %v2240_v22 = vld [vmem:[%s5774_s4 + $0x90] sm:$0xff] }
 0x377   : > { %2297 = vmatpush.msrb.mxu0 %v2240_v22  ;;  %v3551_v22 = vld [vmem:[%s5775_s5 + $0x128] sm:$0xff] }
 0x378   : > { %2262 = vmatpush.msra.mxu3 %v2230_v24  ;;  %v2239_v24 = vld [vmem:[%s5774_s4 + $0x88] sm:$0xff] }
 0x379   : > { %3489 = vmatmul.msk.f32.vlgmr.msra.gmra.mxu1 %vm499_vm1, %v4732_v23  ;;  %v1960_v23 = vpop.f32.mrf.mxu2  ;;  %2298 = vmatpush.msrb.mxu0 %v2239_v24  ;;  %v3548_v24 = vld [vmem:[%s5775_s5 + $0x110] sm:$0xff] }
 0x37a   : > { %2263 = vmatpush.msra.mxu3 %v2229_v29 }
 0x37c   : > { %2264 = vmatpush.msra.mxu3 %v2228_v33 }
 0x37e   : > { %2265 = vmatpush.msra.mxu3 %v2227_v35 }
 0x380   : > { %2266 = vmatpush.msra.mxu3 %v2226_v11 }
 0x381   : > { %3490 = vmatmul.msk.f32.gmra.mxu1 %vm499_vm1, %v4737_v25  ;;  %v1875_v25 = vpop.f32.mrf.mxu3  ;;  %v1963_v26 = vpop.f32.mrf.mxu2 }
 0x382   : > { %2267 = vmatpush.msra.mxu3 %v2225_v36  ;;  %v1876_v20 = vadd.f32 %v1875_v25, %v1799_v9  ;;  %v2238_v25 = vld [vmem:[%s5774_s4 + $0x80] sm:$0xff] }
 0x383   : > { %2299 = vmatpush.msrb.mxu0 %v2238_v25  ;;  %v3549_v25 = vld [vmem:[%s5775_s5 + $0x118] sm:$0xff] }
 0x384   : > { %2268 = vmatpush.msra.mxu3 %v2224_v39  ;;  %v2002_v51 = vadd.f32 %v1963_v26, %v1876_v20 }
 0x386   : > { %2269 = vmatpush.msra.mxu3 %v2223_v44 }
 0x389   : > { %3491 = vmatmul.msk.f32.gmra.mxu1 %vm499_vm1, %v4742_v27  ;;  %v1878_v27 = vpop.f32.mrf.mxu3 }
 0x38a   : > { %v1879_v55 = vadd.f32 %v1878_v27, %v4897_v10 }
 0x391   : > { %3492 = vmatmul.msk.f32.gmra.mxu1 %vm499_vm1, %v4754_v32  ;;  %v1966_v32 = vpop.f32.mrf.mxu2  ;;  %v2053_v12 = vpop.f32.mrf.mxu3 }
 0x392   : > { %v2094_v31 = vadd.f32 %v2053_v12, %v1998_v34  ;;  %v2004_v60 = vadd.f32 %v1966_v32, %v1879_v55 }
 0x399   : > { %3525 = vmatmul.msk.f32.vlgmr.msrb.gmra.mxu1 %vm499_vm1, %v4787_v38  ;;  %v2149_v37 = vpop.f32.mrf.mxu2  ;;  %v4951_v38 = vld [vmem:[%s5772_s2] sm:$0x3]  ;;  %v2056_v40 = vpop.f32.mrf.mxu3 }
 0x39a   : > { %v2190_v42 = vadd.f32 %v2149_v37, %v2094_v31  ;;  %v2200_v43 = vperm.slane %v4951_v38, 0  ;;  %v2201_v11 = vperm.slane %v4951_v38, 1 }
 0x39c   : > { %v2204_v48 = vadd.f32 %v2200_v43, %v2190_v42 }
 0x39e   : > { %v2212_v50 = vmax.f32 %v2204_v48, 0.0 }
 0x3a1   : > { %3526 = vmatmul.msk.f32.gmra.mxu1 %vm499_vm1, %v4801_v45  ;;  %v2000_v45 = vadd.f32 %v1960_v23, %v1873_v30  ;;  %v2152_v46 = vpop.f32.mrf.mxu2  ;;  %v2059_v54 = vpop.f32.mrf.mxu3 }
 0x3a2   : > { %v2098_v56 = vadd.f32 %v2059_v54, %v2002_v51  ;;  %v1904_v23 = vpop.f32.mrf.mxu0 }
 0x3a9   : > { %3527 = vmatmul.msk.f32.gmra.mxu1 %vm499_vm1, %v4807_v49  ;;  %v2222_v49 = vld [vmem:[%s5774_s4] sm:$0xff]  ;;  %v2155_v57 = vpop.f32.mrf.mxu2  ;;  %v2062_v63 = vpop.f32.mrf.mxu3 }
 0x3aa   : > { %2270 = vmatpush.msra.mxu3 %v2222_v49  ;;  %v2194_v59 = vadd.f32 %v2155_v57, %v2098_v56  ;;  %v2100_v1 = vadd.f32 %v2062_v63, %v2004_v60  ;;  %v1907_v27 = vpop.f32.mrf.mxu0 }
 0x3ab   : > { %2271 = vmatmul.f32.vlgmr.msra.gmra.mxu3 %v2212_v50 }
 0x3ac   : > { %v2208_v61 = vadd.f32 %v2200_v43, %v2194_v59 }
 0x3ae   : > { %v2216_v62 = vmax.f32 %v2208_v61, 0.0 }
 0x3b1   : > { %3528 = vmatmul.msk.f32.gmra.mxu1 %vm499_vm1, %v4813_v41  ;;  %v2096_v41 = vadd.f32 %v2056_v40, %v2000_v45  ;;  %v2158_v2 = vpop.f32.mrf.mxu2 }
 0x3b2   : > { %v2196_v5 = vadd.f32 %v2158_v2, %v2100_v1  ;;  %v2082_v29 = vpop.f32.mrf.mxu0 }
 0x3b3   : > { %v2192_v47 = vadd.f32 %v2152_v46, %v2096_v41 }
 0x3b4   : > { %v2210_v6 = vadd.f32 %v2200_v43, %v2196_v5 }
 0x3b5   : > { %v2206_v52 = vadd.f32 %v2200_v43, %v2192_v47 }
 0x3b6   : > { %v2218_v58 = vmax.f32 %v2210_v6, 0.0  ;;  %v2365_v6 = vld [vmem:[%s5775_s5 + $0xa0] sm:$0xf] }
 0x3b7   : > { %v2214_v53 = vmax.f32 %v2206_v52, 0.0  ;;  %3564 = vmatpush.msk.msra.mxu0 %vm562_vm0, %v2365_v6  ;;  %v3612_v6 = vld [vmem:[%s5775_s5 + $0x280] sm:$0xff] }
 0x3b9   : > { %2274 = vmatmul.f32.gmra.mxu3 %v2214_v53 }
 0x3ba   : > { %v2085_v12 = vpop.f32.mrf.mxu0 }
 0x3c1   : > { %2277 = vmatmul.f32.gmra.mxu3 %v2216_v62 }
 0x3c2   : > { %v2088_v49 = vpop.f32.mrf.mxu0 }
 0x3c9   : > { %2280 = vmatmul.f32.gmra.mxu3 %v2218_v58  ;;  %v2363_v58 = vld [vmem:[%s5775_s5 + $0x90] sm:$0xff] }
 0x3ca   : > { %v2091_v53 = vpop.f32.mrf.mxu0  ;;  %2466 = vmatpush.msra.mxu0 %v2363_v58  ;;  %v3613_v58 = vld [vmem:[%s5775_s5 + $0x288] sm:$0xff] }
 0x3ce   : > { %v1679_v0 = vpop.f32.mrf.mxu1 }
 0x3cf   : > { %1697 = vst.sshfl [vmem:[#allocation1] sm:$0xff pattern:$0x73625140] %v1679_v0  ;;  %v3445_v19 = vrot.slane %v1679_v0, 9 }
 0x3d0   : > { %1683 = vst.msk [vmem:[#allocation3] sm:$0x1] %vm1682_vm11, %v1679_v0 }
 0x3d1   : > { %1687 = vrot.lane.b32.xlu0 %v3445_v19, %s3783_s23 }
 0x3d6   : > { %v4966_v7 = vld [vmem:[#allocation1 + $0x1] ss:$4 sm:$0xff]  ;;  %v1822_v8 = vpop.f32.mrf.mxu1 }
 0x3d7   : > { %1705 = vst.sshfl [vmem:[#allocation1] sm:$0xff pattern:$0x73625140] %v1679_v0  ;;  %v1899_v33 = vadd.f32 %v1898_v14, %v1822_v8  ;;  %v2361_v8 = vld [vmem:[%s5775_s5 + $0x80] sm:$0xff]  ;;  %v3555_v14 = vld [vmem:[%s5775_s5 + $0x148] sm:$0xff] }
 0x3d8   : > { %2467 = vmatpush.msra.mxu0 %v2361_v8  ;;  %v3588_v8 = vld [vmem:[%s5775_s5 + $0x1f0] sm:$0xff] }
 0x3de   : > { %v1825_v9 = vpop.f32.mrf.mxu1  ;;  %v1707_v10 = vld [vmem:[#allocation1 + $0x1] ss:$4 sm:$0xff] }
 0x3df   : > { %v3446_v13 = vrot.slane %v1707_v10, 9  ;;  %1720 = vst.sshfl [vmem:[#allocation1] sm:$0xff pattern:$0x73625140] %v1679_v0  ;;  %v1902_v31 = vadd.f32 %v1901_v3, %v1825_v9  ;;  %v3556_v9 = vld [vmem:[%s5775_s5 + $0x150] sm:$0xf] }
 0x3e0   : > { %v3557_v10 = vld [vmem:[%s5775_s5 + $0x158] sm:$0xf]  ;;  %3558 = vmatpush.msk.msra.mxu1 %vm562_vm0, %v3556_v9 }
 0x3e1   : > { %1710 = vrot.lane.b32.xlu1 %v3446_v13, %s5791_s25  ;;  %v3554_v13 = vld [vmem:[%s5775_s5 + $0x140] sm:$0xff]  ;;  %3561 = vmatpush.msk.msrb.mxu3 %vm562_vm0, %v3557_v10  ;;  %v3553_v3 = vld [vmem:[%s5775_s5 + $0x138] sm:$0xff]  ;;  %v3610_v10 = vld [vmem:[%s5775_s5 + $0x270] sm:$0xff]  ;;  %s3160_s25 = scalar_lea.hbm %s5785_s15, %s3934_s17 }
 0x3e2   : > { %2410 = vmatpush.msra.mxu1 %v3554_v13  ;;  %v3589_v9 = vld [vmem:[%s5775_s5 + $0x1f8] sm:$0xff]  ;;  %s3163_s26 = sshll.u32 %s3160_s25, 4  ;;  %s3164_s26 = int_to_ptr.hbm [resolvable:$true] %s3163_s26 }
 0x3e3   : > { %2433 = vmatpush.msrb.mxu3 %v3555_v14  ;;  %v3611_v13 = vld [vmem:[%s5775_s5 + $0x278] sm:$0xff]  ;;  %v3586_v14 = vld [vmem:[%s5775_s5 + $0x1e0] sm:$0xff]  ;;  %s3732_s1 = sshra.s32 %s3164_s26, 4  ;;  %s3733_s1 = int_to_ptr.hbm [resolvable:$true] %s3732_s1 }
 0x3e4   : > { %s3734_s30 = scalar_lea.hbm %s3733_s1, 2  ;;  %p3739_p0 = scmp.lt.s32.totalorder %s3733_s1, %s5785_s15 }
 0x3e5   : > { %2434 = vmatpush.msrb.mxu3 %v3553_v3  ;;  %v3584_v3 = vld [vmem:[%s5775_s5 + $0x1d0] sm:$0xff]  ;;  %p3735_p11 = scmp.ne.s32.totalorder %s3733_s1, %s3734_s30 }
 0x3e6   : > { %v1828_v15 = vpop.f32.mrf.mxu1  ;;  %v1722_v16 = vld [vmem:[#allocation1 + $0x2] ss:$4 sm:$0xff] }
 0x3e7   : > { %1723 = vrot.lane.b32.xlu2 %v1722_v16, %s5790_s0  ;;  %v1905_v45 = vadd.f32 %v1904_v23, %v1828_v15  ;;  %v2359_v16 = vld [vmem:[%s5775_s5 + $0x70] sm:$0xff]  ;;  %2435 = vmatpush.msrb.mxu3 %v3551_v22  ;;  %v3582_v22 = vld [vmem:[%s5775_s5 + $0x1c0] sm:$0xff]  ;;  %p3736_p12 = pnand %p3735_p11, %p3904_p5 }
 0x3e8   : > { %2468 = vmatpush.msra.mxu0 %v2359_v16  ;;  %v2355_v23 = vld [vmem:[%s5775_s5 + $0x50] sm:$0xff]  ;;  %v3608_v16 = vld [vmem:[%s5775_s5 + $0x260] sm:$0xff] }
 0x3e9   : > { %2436 = vmatpush.msrb.mxu3 %v3549_v25  ;;  %v3605_v25 = vld [vmem:[%s5775_s5 + $0x248] sm:$0xff]  ;;  %p3737_p13 = pneg %p3736_p12 }
 0x3ee   : > { %v1831_v21 = vpop.f32.mrf.mxu1 }
 0x3ef   : > { %v1908_v46 = vadd.f32 %v1907_v27, %v1831_v21  ;;  %v3552_v21 = vld [vmem:[%s5775_s5 + $0x130] sm:$0xff]  ;;  %v3546_v27 = vld [vmem:[%s5775_s5 + $0x100] sm:$0xff] }
 0x3f0   : > { %2411 = vmatpush.msra.mxu1 %v3552_v21  ;;  %v3609_v21 = vld [vmem:[%s5775_s5 + $0x268] sm:$0xff] }
 0x3f2   : > { %2412 = vmatpush.msra.mxu1 %v3550_v18  ;;  %v3607_v18 = vld [vmem:[%s5775_s5 + $0x258] sm:$0xff] }
 0x3f4   : > { %2413 = vmatpush.msra.mxu1 %v3548_v24  ;;  %v3604_v24 = vld [vmem:[%s5775_s5 + $0x240] sm:$0xff] }
 0x3f6   : > { %v1986_v17 = vpop.f32.mrf.mxu1  ;;  %2414 = vmatpush.msra.mxu1 %v3546_v27  ;;  %v3581_v27 = vld [vmem:[%s5775_s5 + $0x1b8] sm:$0xff] }
 0x3f7   : > { %v1999_v34 = vadd.f32 %v1986_v17, %v1899_v33  ;;  %v2357_v17 = vld [vmem:[%s5775_s5 + $0x60] sm:$0xff]  ;;  %v3545_v33 = vld [vmem:[%s5775_s5 + $0xf8] sm:$0xff] }
 0x3f8   : > { %2469 = vmatpush.msra.mxu0 %v2357_v17  ;;  %v3606_v17 = vld [vmem:[%s5775_s5 + $0x250] sm:$0xff] }
 0x3f9   : > { %v2095_v35 = vadd.f32 %v2082_v29, %v1999_v34  ;;  %v2351_v29 = vld [vmem:[%s5775_s5 + $0x30] sm:$0xff] }
 0x3fa   : > { %2470 = vmatpush.msra.mxu0 %v2355_v23  ;;  %v3583_v23 = vld [vmem:[%s5775_s5 + $0x1c8] sm:$0xff] }
 0x3fe   : > { %v1989_v26 = vpop.f32.mrf.mxu1 }
 0x3ff   : > { %v2001_v37 = vadd.f32 %v1989_v26, %v1902_v31  ;;  %v2353_v26 = vld [vmem:[%s5775_s5 + $0x40] sm:$0xff]  ;;  %v3543_v31 = vld [vmem:[%s5775_s5 + $0xe8] sm:$0xff] }
 0x400   : > { %2471 = vmatpush.msra.mxu0 %v2353_v26  ;;  %v3580_v26 = vld [vmem:[%s5775_s5 + $0x1b0] sm:$0xff] }
 0x401   : > { %v2097_v43 = vadd.f32 %v2085_v12, %v2001_v37 }
 0x402   : > { %2472 = vmatpush.msra.mxu0 %v2351_v29  ;;  %v3603_v29 = vld [vmem:[%s5775_s5 + $0x238] sm:$0xff] }
 0x406   : > { %v1992_v28 = vpop.f32.mrf.mxu1 }
 0x407   : > { %v2003_v50 = vadd.f32 %v1992_v28, %v1905_v45  ;;  %v3547_v28 = vld [vmem:[%s5775_s5 + $0x108] sm:$0xff]  ;;  %v3618_v45 = vld [vmem:[%s5775_s5 + $0x2b0] sm:$0xf] }
 0x408   : > { %2437 = vmatpush.msrb.mxu3 %v3547_v28  ;;  %v3602_v28 = vld [vmem:[%s5775_s5 + $0x230] sm:$0xff] }
 0x409   : > { %v2099_v41 = vadd.f32 %v2088_v49, %v2003_v50  ;;  %v3539_v49 = vld [vmem:[%s5775_s5 + $0xc8] sm:$0xff] }
 0x40a   : > { %2438 = vmatpush.msrb.mxu3 %v3545_v33  ;;  %v3579_v33 = vld [vmem:[%s5775_s5 + $0x1a8] sm:$0xff] }
 0x40c   : > { %2439 = vmatpush.msrb.mxu3 %v3543_v31  ;;  %v3599_v31 = vld [vmem:[%s5775_s5 + $0x218] sm:$0xff] }
 0x40e   : > { %v1995_v32 = vpop.f32.mrf.mxu1 }
 0x40f   : > { %v2005_v51 = vadd.f32 %v1995_v32, %v1908_v46  ;;  %v3544_v32 = vld [vmem:[%s5775_s5 + $0xf0] sm:$0xff]  ;;  %v2362_v46 = vld [vmem:[%s5775_s5 + $0x88] sm:$0xff] }
 0x410   : > { %2415 = vmatpush.msra.mxu1 %v3544_v32  ;;  %v3578_v32 = vld [vmem:[%s5775_s5 + $0x1a0] sm:$0xff] }
 0x411   : > { %v2101_v55 = vadd.f32 %v2091_v53, %v2005_v51  ;;  %v2221_v51 = vld [vmem:[%s5773_s3 + $0x8] sm:$0x3f]  ;;  %v2356_v53 = vld [vmem:[%s5775_s5 + $0x58] sm:$0xff] }
 0x416   : > { %v2178_v30 = vpop.f32.mrf.mxu1 }
 0x417   : > { %v2191_v36 = vadd.f32 %v2178_v30, %v2095_v35  ;;  %v3542_v30 = vld [vmem:[%s5775_s5 + $0xe0] sm:$0xff] }
 0x418   : > { %2416 = vmatpush.msra.mxu1 %v3542_v30  ;;  %v3598_v30 = vld [vmem:[%s5775_s5 + $0x210] sm:$0xff] }
 0x419   : > { %v2205_v39 = vadd.f32 %v2201_v11, %v2191_v36  ;;  %v2347_v36 = vld [vmem:[%s5775_s5 + $0x10] sm:$0xff] }
 0x41b   : > { %v2213_v42 = vmax.f32 %v2205_v39, 0.0  ;;  %v3540_v39 = vld [vmem:[%s5775_s5 + $0xd0] sm:$0xff] }
 0x41c   : > { %2417 = vmatpush.msra.mxu1 %v3540_v39  ;;  %v3572_v39 = vld [vmem:[%s5775_s5 + $0x170] sm:$0xff] }
 0x41d   : > { %3529 = vmatmul.msk.f32.vlgmr.msrb.gmra.mxu0 %vm1039_vm3, %v2213_v42  ;;  %v3541_v42 = vld [vmem:[%s5775_s5 + $0xd8] sm:$0xff] }
 0x41e   : > { %v2181_v44 = vpop.f32.mrf.mxu1  ;;  %2440 = vmatpush.msrb.mxu3 %v3541_v42  ;;  %v3573_v42 = vld [vmem:[%s5775_s5 + $0x178] sm:$0xff] }
 0x41f   : > { %v2193_v48 = vadd.f32 %v2181_v44, %v2097_v43  ;;  %v2345_v43 = vld [vmem:[%s5775_s5] sm:$0xff] }
 0x420   : > { %2441 = vmatpush.msrb.mxu3 %v3539_v49 }
 0x421   : > { %v2207_v40 = vadd.f32 %v2201_v11, %v2193_v48  ;;  %v3538_v48 = vld [vmem:[%s5775_s5 + $0xc0] sm:$0xff] }
 0x422   : > { %2418 = vmatpush.msra.mxu1 %v3538_v48 }
 0x423   : > { %v2215_v20 = vmax.f32 %v2207_v40, 0.0  ;;  %v2220_v40 = vld [vmem:[%s5773_s3] sm:$0xff] }
 0x425   : > { %3530 = vmatmul.msk.f32.gmra.mxu0 %vm1039_vm3, %v2215_v20  ;;  %v3616_v20 = vld [vmem:[%s5775_s5 + $0x2a0] sm:$0xff] }
 0x426   : > { %v2184_v38 = vpop.f32.mrf.mxu1 }
 0x427   : > { %v2195_v47 = vadd.f32 %v2184_v38, %v2099_v41  ;;  %v2366_v41 = vld [vmem:[%s5775_s5 + $0xa8] sm:$0xf]  ;;  %v2364_v38 = vld [vmem:[%s5775_s5 + $0x98] sm:$0xff] }
 0x429   : > { %v2209_v52 = vadd.f32 %v2201_v11, %v2195_v47  ;;  %v2360_v47 = vld [vmem:[%s5775_s5 + $0x78] sm:$0xff] }
 0x42b   : > { %v2217_v54 = vmax.f32 %v2209_v52, 0.0  ;;  %v2358_v52 = vld [vmem:[%s5775_s5 + $0x68] sm:$0xff] }
 0x42d   : > { %3531 = vmatmul.msk.f32.gmra.mxu0 %vm1039_vm3, %v2217_v54  ;;  %v2354_v54 = vld [vmem:[%s5775_s5 + $0x48] sm:$0xff] }
 0x42e   : > { %v2187_v56 = vpop.f32.mrf.mxu1  ;;  %v4997_v1 = vpop.f32.mrf.mxu3 }
 0x42f   : > { %v2197_v57 = vadd.f32 %v2187_v56, %v2101_v55  ;;  %v2352_v55 = vld [vmem:[%s5775_s5 + $0x38] sm:$0xff]  ;;  %v2350_v56 = vld [vmem:[%s5775_s5 + $0x28] sm:$0xff] }
 0x431   : > { %v2211_v59 = vadd.f32 %v2201_v11, %v2197_v57  ;;  %v2349_v11 = vld [vmem:[%s5775_s5 + $0x20] sm:$0xff]  ;;  %v2348_v57 = vld [vmem:[%s5775_s5 + $0x18] sm:$0xff] }
 0x432   : > { %2473 = vmatpush.msra.mxu0 %v2349_v11  ;;  %v3576_v11 = vld [vmem:[%s5775_s5 + $0x190] sm:$0xff] }
 0x433   : > { %v2219_v60 = vmax.f32 %v2211_v59, 0.0  ;;  %v2346_v59 = vld [vmem:[%s5775_s5 + $0x8] sm:$0xff] }
 0x434   : > { %2474 = vmatpush.msra.mxu0 %v2347_v36  ;;  %v3574_v36 = vld [vmem:[%s5775_s5 + $0x180] sm:$0xff] }
 0x435   : > { %3532 = vmatmul.msk.f32.gmra.mxu0 %vm1039_vm3, %v2219_v60  ;;  %v3619_v60 = vld [vmem:[%s5775_s5 + $0x2b8] sm:$0xf]  ;;  %vm1729_vm3 = vcmask 1040896  }
 0x436   : > { %2475 = vmatpush.msra.mxu0 %v2345_v43  ;;  %v3570_v43 = vld [vmem:[%s5775_s5 + $0x160] sm:$0xff] }
 0x438   : > { %3620 = vmatpush.msk.msrb.mxu0 %vm562_vm0, %v3618_v45 }
 0x43a   : > { %2632 = vmatpush.msrb.mxu0 %v3616_v20  ;;  %v3647_v20 = vld [vmem:[%s5775_s5 + $0x368] sm:$0xf] }
 0x43c   : > { %v5001_v2 = vpop.f32.mrf.mxu3 }
 0x443   : > { %v1688_v61 = vpop.permute.xlu0 %1687 }
 0x444   : > { %v1689_v62 = vrot.slane %v1688_v61, 6  ;;  %v2278_v15 = vpop.f32.mrf.mxu3 }
 0x446   : > { %v1691_v0 = vsel %vm1690_vm14, %v1689_v62, %v1688_v61  ;;  %v3617_v61 = vld [vmem:[%s5775_s5 + $0x2a8] sm:$0xff]  ;;  %v3614_v62 = vld [vmem:[%s5775_s5 + $0x290] sm:$0xff] }
 0x447   : > { %1696 = vst.msk [vmem:[#allocation3] sm:$0x5] %vm4990_vm15, %v1691_v0  ;;  %v3615_v0 = vld [vmem:[%s5775_s5 + $0x298] sm:$0xff]  ;;  %2633 = vmatpush.msrb.mxu0 %v3614_v62 }
 0x448   : > { %v3637_v62 = vld [vmem:[%s5775_s5 + $0x318] sm:$0xff] }
 0x449   : > { %2634 = vmatpush.msrb.mxu0 %v3612_v6  ;;  %v3633_v6 = vld [vmem:[%s5775_s5 + $0x2f8] sm:$0xff] }
 0x44b   : > { %2635 = vmatpush.msrb.mxu0 %v3610_v10  ;;  %v3629_v10 = vld [vmem:[%s5775_s5 + $0x2d8] sm:$0xff] }
 0x44c   : > { %v2281_v34 = vpop.f32.mrf.mxu3 }
 0x44d   : > { %2636 = vmatpush.msrb.mxu0 %v3608_v16 }
 0x44f   : > { %2637 = vmatpush.msrb.mxu0 %v3606_v17  ;;  %v2789_v17 = vld [vmem:[%s5778_s8 + $0x68] sm:$0xff] }
 0x451   : > { %2638 = vmatpush.msrb.mxu0 %v3604_v24  ;;  %v2785_v24 = vld [vmem:[%s5778_s8 + $0x48] sm:$0xff] }
 0x453   : > { %2639 = vmatpush.msrb.mxu0 %v3602_v28  ;;  %v2781_v28 = vld [vmem:[%s5778_s8 + $0x28] sm:$0xff] }
 0x49a   : > { %v4999_v19 = vpop.f32.mrf.mxu0 }
 0x49b   : > { %v2302_v50 = vadd.f32 %v4999_v19, %v4997_v1  ;;  %v3536_v1 = vld [vmem:[%s5775_s5 + $0xb0] sm:$0xff]  ;;  %v3537_v19 = vld [vmem:[%s5775_s5 + $0xb8] sm:$0xff] }
 0x49c   : > { %2419 = vmatpush.msra.mxu1 %v3536_v1  ;;  %2442 = vmatpush.msrb.mxu3 %v3537_v19  ;;  %v3634_v1 = vld [vmem:[%s5775_s5 + $0x300] sm:$0xff]  ;;  %v3635_v19 = vld [vmem:[%s5775_s5 + $0x308] sm:$0xff] }
 0x4a2   : > { %v2304_v5 = vpop.f32.mrf.mxu0 }
 0x4a3   : > { %v2305_v44 = vadd.f32 %v2304_v5, %v5001_v2  ;;  %v3590_v2 = vld [vmem:[%s5775_s5 + $0x200] sm:$0xf]  ;;  %v3591_v5 = vld [vmem:[%s5775_s5 + $0x208] sm:$0xf] }
 0x4a4   : > { %3592 = vmatpush.msk.msrb.mxu1 %vm562_vm0, %v3590_v2  ;;  %3595 = vmatpush.msk.msra.mxu3 %vm562_vm0, %v3591_v5  ;;  %v3632_v5 = vld [vmem:[%s5775_s5 + $0x2f0] sm:$0xff] }
 0x4a6   : > { %2547 = vmatpush.msrb.mxu1 %v3588_v8  ;;  %2570 = vmatpush.msra.mxu3 %v3589_v9  ;;  %v3631_v8 = vld [vmem:[%s5775_s5 + $0x2e8] sm:$0xff]  ;;  %v3628_v9 = vld [vmem:[%s5775_s5 + $0x2d0] sm:$0xff] }
 0x4a8   : > { %2548 = vmatpush.msrb.mxu1 %v3586_v14  ;;  %v3627_v14 = vld [vmem:[%s5775_s5 + $0x2c8] sm:$0xff] }
 0x4aa   : > { %v2307_v4 = vpop.f32.mrf.mxu0  ;;  %2549 = vmatpush.msrb.mxu1 %v3584_v3  ;;  %v2791_v3 = vld [vmem:[%s5778_s8 + $0x78] sm:$0xff] }
 0x4ab   : > { %v2308_v37 = vadd.f32 %v2307_v4, %v2278_v15  ;;  %v3587_v15 = vld [vmem:[%s5775_s5 + $0x1e8] sm:$0xff]  ;;  %v3585_v4 = vld [vmem:[%s5775_s5 + $0x1d8] sm:$0xff] }
 0x4ac   : > { %2571 = vmatpush.msra.mxu3 %v3587_v15  ;;  %2550 = vmatpush.msrb.mxu1 %v3582_v22  ;;  %v2787_v22 = vld [vmem:[%s5778_s8 + $0x58] sm:$0xff] }
 0x4ae   : > { %2572 = vmatpush.msra.mxu3 %v3585_v4  ;;  %2551 = vmatpush.msrb.mxu1 %v3580_v26  ;;  %v2790_v4 = vld [vmem:[%s5778_s8 + $0x70] sm:$0xff]  ;;  %v2783_v26 = vld [vmem:[%s5778_s8 + $0x38] sm:$0xff] }
 0x4b0   : > { %2573 = vmatpush.msra.mxu3 %v3583_v23  ;;  %2552 = vmatpush.msrb.mxu1 %v3578_v32  ;;  %v2786_v23 = vld [vmem:[%s5778_s8 + $0x50] sm:$0xff] }
 0x4b2   : > { %v2310_v35 = vpop.f32.mrf.mxu0  ;;  %2574 = vmatpush.msra.mxu3 %v3581_v27  ;;  %2553 = vmatpush.msrb.mxu1 %v3576_v11  ;;  %v2782_v27 = vld [vmem:[%s5778_s8 + $0x30] sm:$0xff] }
 0x4b3   : > { %v2311_v12 = vadd.f32 %v2310_v35, %v2281_v34  ;;  %v3600_v34 = vld [vmem:[%s5775_s5 + $0x220] sm:$0xff]  ;;  %v3601_v35 = vld [vmem:[%s5775_s5 + $0x228] sm:$0xff] }
 0x4b4   : > { %2575 = vmatpush.msra.mxu3 %v3579_v33  ;;  %2640 = vmatpush.msrb.mxu0 %v3600_v34  ;;  %v2779_v33 = vld [vmem:[%s5778_s8 + $0x18] sm:$0xff]  ;;  %v2778_v34 = vld [vmem:[%s5778_s8 + $0x10] sm:$0xff] }
 0x4b5   : > { %3533 = vmatpush.msk.msrb.mxu2 %vm562_vm0, %v2311_v12  ;;  %v3577_v12 = vld [vmem:[%s5775_s5 + $0x198] sm:$0xff]  ;;  %2554 = vmatpush.msrb.mxu1 %v3574_v36 }
 0x4b6   : > { %2576 = vmatpush.msra.mxu3 %v3577_v12  ;;  %2641 = vmatpush.msrb.mxu0 %v3598_v30  ;;  %v2776_v12 = vld [vmem:[%s5778_s8] sm:$0xff]  ;;  %v2795_v30 = vld [vmem:[%s5778_s8 + $0x98] sm:$0xff] }
 0x4b7   : > { %2335 = vmatpush.msrb.mxu2 %v2308_v37  ;;  %v3575_v37 = vld [vmem:[%s5775_s5 + $0x188] sm:$0xff]  ;;  %2555 = vmatpush.msrb.mxu1 %v3572_v39 }
 0x4b8   : > { %2577 = vmatpush.msra.mxu3 %v3575_v37  ;;  %v2794_v37 = vld [vmem:[%s5778_s8 + $0x90] sm:$0xff]  ;;  %v2793_v39 = vld [vmem:[%s5778_s8 + $0x88] sm:$0xff] }
 0x4b9   : > { %2336 = vmatpush.msrb.mxu2 %v2305_v44  ;;  %v3571_v44 = vld [vmem:[%s5775_s5 + $0x168] sm:$0xff]  ;;  %2556 = vmatpush.msrb.mxu1 %v3570_v43 }
 0x4ba   : > { %2578 = vmatpush.msra.mxu3 %v3573_v42  ;;  %v2792_v42 = vld [vmem:[%s5778_s8 + $0x80] sm:$0xff] }
 0x4bb   : > { %2337 = vmatpush.msrb.mxu2 %v2302_v50 }
 0x4bc   : > { %3534 = vmatmul.msk.f32.vlgmr.msrb.gmra.mxu2 %vm499_vm1, %v2220_v40  ;;  %2579 = vmatpush.msra.mxu3 %v3571_v44  ;;  %v3646_v40 = vld [vmem:[%s5775_s5 + $0x360] sm:$0xf] }
 0x4bd   : > { %3567 = vmatpush.msk.msra.mxu2 %vm562_vm0, %v2366_v41 }
 0x4bf   : > { %2489 = vmatpush.msra.mxu2 %v2364_v38 }
 0x4c1   : > { %2490 = vmatpush.msra.mxu2 %v2362_v46  ;;  %v3644_v46 = vld [vmem:[%s5775_s5 + $0x350] sm:$0xff] }
 0x4c3   : > { %2491 = vmatpush.msra.mxu2 %v2360_v47  ;;  %v3645_v47 = vld [vmem:[%s5775_s5 + $0x358] sm:$0xff] }
 0x4c4   : > { %3535 = vmatmul.msk.f32.gmra.mxu2 %vm499_vm1, %v2221_v51  ;;  %vm1716_vm1 = vcmask 1041280  }
 0x4c5   : > { %2492 = vmatpush.msra.mxu2 %v2358_v52  ;;  %v3642_v52 = vld [vmem:[%s5775_s5 + $0x340] sm:$0xff] }
 0x4c7   : > { %2493 = vmatpush.msra.mxu2 %v2356_v53  ;;  %v3643_v53 = vld [vmem:[%s5775_s5 + $0x348] sm:$0xff] }
 0x4c9   : > { %2494 = vmatpush.msra.mxu2 %v2354_v54 }
 0x4cb   : > { %2495 = vmatpush.msra.mxu2 %v2352_v55  ;;  %v3640_v55 = vld [vmem:[%s5775_s5 + $0x330] sm:$0xff] }
 0x4cd   : > { %2496 = vmatpush.msra.mxu2 %v2350_v56  ;;  %v3641_v56 = vld [vmem:[%s5775_s5 + $0x338] sm:$0xff] }
 0x4cf   : > { %2497 = vmatpush.msra.mxu2 %v2348_v57  ;;  %v3638_v57 = vld [vmem:[%s5775_s5 + $0x320] sm:$0xff] }
 0x4d1   : > { %2498 = vmatpush.msra.mxu2 %v2346_v59  ;;  %v3639_v59 = vld [vmem:[%s5775_s5 + $0x328] sm:$0xff] }
 0x4d3   : > { %3623 = vmatpush.msk.msrb.mxu2 %vm562_vm0, %v3619_v60 }
 0x4d5   : > { %2655 = vmatpush.msrb.mxu2 %v3617_v61  ;;  %v3636_v61 = vld [vmem:[%s5775_s5 + $0x310] sm:$0xff] }
 0x4d7   : > { %2656 = vmatpush.msrb.mxu2 %v3615_v0 }
 0x4d9   : > { %2657 = vmatpush.msrb.mxu2 %v3613_v58  ;;  %v3630_v58 = vld [vmem:[%s5775_s5 + $0x2e0] sm:$0xff] }
 0x4db   : > { %2658 = vmatpush.msrb.mxu2 %v3611_v13  ;;  %v3626_v13 = vld [vmem:[%s5775_s5 + $0x2c0] sm:$0xff] }
 0x4dd   : > { %2659 = vmatpush.msrb.mxu2 %v3609_v21 }
 0x4df   : > { %2660 = vmatpush.msrb.mxu2 %v3607_v18  ;;  %v2788_v18 = vld [vmem:[%s5778_s8 + $0x60] sm:$0xff] }
 0x4e1   : > { %2661 = vmatpush.msrb.mxu2 %v3605_v25  ;;  %v2784_v25 = vld [vmem:[%s5778_s8 + $0x40] sm:$0xff] }
 0x4e3   : > { %2662 = vmatpush.msrb.mxu2 %v3603_v29  ;;  %v2780_v29 = vld [vmem:[%s5778_s8 + $0x20] sm:$0xff] }
 0x4e5   : > { %2663 = vmatpush.msrb.mxu2 %v3601_v35  ;;  %v2777_v35 = vld [vmem:[%s5778_s8 + $0x8] sm:$0xff] }
 0x4e7   : > { %2664 = vmatpush.msrb.mxu2 %v3599_v31 }
 0x53f   : > { %v5287_v45 = vpop.f32.mrf.mxu2 }
 0x540   : > { %3565 = vmatmul.msk.f32.vlgmr.msra.gmra.mxu0 %vm1193_vm4, %v5287_v45  ;;  %3568 = vmatmul.msk.f32.vlgmr.msra.gmra.mxu2 %vm1193_vm4, %v5287_v45  ;;  %v2391_v49 = vrot.slane %v5287_v45, 1  ;;  %v2613_v51 = vrot.slane %v5287_v45, 3  ;;  %v2528_v0 = vrot.slane %v5287_v45, 2  ;;  %v2698_v16 = vrot.slane %v5287_v45, 4 }
 0x541   : > { %2802 = vmatpush.msra.mxu0 %v2791_v3  ;;  %2837 = vmatpush.msra.mxu2 %v2795_v30  ;;  %v2927_v30 = vld [vmem:[%s5779_s9 + $0x78] sm:$0xff] }
 0x543   : > { %2803 = vmatpush.msra.mxu0 %v2790_v4  ;;  %2838 = vmatpush.msra.mxu2 %v2794_v37  ;;  %v2942_v37 = vld [vmem:[%s5779_s9 + $0xf0] sm:$0xff] }
 0x545   : > { %2804 = vmatpush.msra.mxu0 %v2789_v17  ;;  %2839 = vmatpush.msra.mxu2 %v2793_v39  ;;  %v2958_v39 = vld [vmem:[%s5779_s9 + $0x170] sm:$0xff] }
 0x547   : > { %v5293_v48 = vpop.f32.mrf.mxu2  ;;  %2805 = vmatpush.msra.mxu0 %v2788_v18  ;;  %2840 = vmatpush.msra.mxu2 %v2792_v42  ;;  %v2925_v42 = vld [vmem:[%s5779_s9 + $0x68] sm:$0xff] }
 0x548   : > { %v2392_v50 = vrot.slane %v5293_v48, 1  ;;  %3566 = vmatmul.msk.f32.gmra.mxu0 %vm1193_vm4, %v5293_v48  ;;  %3569 = vmatmul.msk.f32.gmra.mxu2 %vm1193_vm4, %v5293_v48  ;;  %v2614_v38 = vrot.slane %v5293_v48, 3  ;;  %v2529_v60 = vrot.slane %v5293_v48, 2  ;;  %v2699_v15 = vrot.slane %v5293_v48, 4 }
 0x549   : > { %2806 = vmatpush.msra.mxu0 %v2787_v22 }
 0x54a   : > { %v2393_v41 = vsel %vm1189_vm5, %v2391_v49, %v2392_v50  ;;  %v2615_v54 = vsel %vm1416_vm6, %v2613_v51, %v2614_v38  ;;  %v2530_v2 = vsel %vm1329_vm7, %v2528_v0, %v2529_v60  ;;  %v2700_v21 = vsel %vm562_vm0, %v2698_v16, %v2699_v15 }
 0x54b   : > { %3559 = vmatmul.msk.f32.vlgmr.msra.gmra.mxu1 %vm1193_vm4, %v2393_v41  ;;  %3562 = vmatmul.msk.f32.vlgmr.msrb.gmra.mxu3 %vm1193_vm4, %v2393_v41  ;;  %vm1730_vm5 = vcmask 124930   ;;  %vm1713_vm6 = vcmask 916480   ;;  %vm1703_vm7 = vcmask 909568  }
 0x54c   : > { %3648 = vmatpush.msk.msra.mxu1 %vm562_vm0, %v3646_v40  ;;  %3651 = vmatpush.msk.msrb.mxu3 %vm562_vm0, %v3647_v20 }
 0x54d   : > { %2807 = vmatpush.msra.mxu0 %v2786_v23 }
 0x54e   : > { %2717 = vmatpush.msra.mxu1 %v3644_v46  ;;  %2740 = vmatpush.msrb.mxu3 %v3645_v47  ;;  %v2761_v46 = vld [vmem:[%s5776_s6] sm:$0x3] }
 0x54f   : > { %2808 = vmatpush.msra.mxu0 %v2785_v24 }
 0x550   : > { %3621 = vmatmul.msk.f32.vlgmr.msrb.gmra.mxu0 %vm1193_vm4, %v2615_v54  ;;  %3624 = vmatmul.msk.f32.vlgmr.msrb.gmra.mxu2 %vm1193_vm4, %v2615_v54 }
 0x551   : > { %2718 = vmatpush.msra.mxu1 %v3642_v52  ;;  %2741 = vmatpush.msrb.mxu3 %v3643_v53  ;;  %v2763_v53 = vperm.slane %v2761_v46, 0 }
 0x552   : > { %2809 = vmatpush.msra.mxu0 %v2784_v25 }
 0x553   : > { %3560 = vmatmul.msk.f32.gmra.mxu1 %vm1193_vm4, %v2392_v50  ;;  %3563 = vmatmul.msk.f32.gmra.mxu3 %vm1193_vm4, %v2392_v50 }
 0x554   : > { %2719 = vmatpush.msra.mxu1 %v3640_v55  ;;  %2742 = vmatpush.msrb.mxu3 %v3641_v56 }
 0x555   : > { %2810 = vmatpush.msra.mxu0 %v2783_v26 }
 0x556   : > { %2720 = vmatpush.msra.mxu1 %v3638_v57  ;;  %2743 = vmatpush.msrb.mxu3 %v3639_v59 }
 0x557   : > { %2811 = vmatpush.msra.mxu0 %v2782_v27 }
 0x558   : > { %3622 = vmatmul.msk.f32.gmra.mxu0 %vm1193_vm4, %v2614_v38  ;;  %3625 = vmatmul.msk.f32.gmra.mxu2 %vm1193_vm4, %v2614_v38 }
 0x559   : > { %2721 = vmatpush.msra.mxu1 %v3636_v61  ;;  %2744 = vmatpush.msrb.mxu3 %v3637_v62 }
 0x55a   : > { %2812 = vmatpush.msra.mxu0 %v2781_v28 }
 0x55b   : > { %3593 = vmatmul.msk.f32.vlgmr.msrb.gmra.mxu1 %vm1193_vm4, %v2530_v2  ;;  %3596 = vmatmul.msk.f32.vlgmr.msra.gmra.mxu3 %vm1193_vm4, %v2530_v2 }
 0x55c   : > { %2722 = vmatpush.msra.mxu1 %v3634_v1  ;;  %2745 = vmatpush.msrb.mxu3 %v3635_v19  ;;  %v2764_v1 = vperm.slane %v2761_v46, 1  ;;  %v2954_v46 = vld [vmem:[%s5779_s9 + $0x150] sm:$0xff] }
 0x55d   : > { %2813 = vmatpush.msra.mxu0 %v2780_v29  ;;  %v2775_v29 = vld [vmem:[%s5777_s7] sm:$0x1f] }
 0x55e   : > { %2723 = vmatpush.msra.mxu1 %v3632_v5  ;;  %2746 = vmatpush.msrb.mxu3 %v3633_v6 }
 0x55f   : > { %2814 = vmatpush.msra.mxu0 %v2779_v33 }
 0x560   : > { %2724 = vmatpush.msra.mxu1 %v3630_v58  ;;  %2747 = vmatpush.msrb.mxu3 %v3631_v8 }
 0x561   : > { %2815 = vmatpush.msra.mxu0 %v2778_v34 }
 0x562   : > { %2725 = vmatpush.msra.mxu1 %v3628_v9  ;;  %2748 = vmatpush.msrb.mxu3 %v3629_v10 }
 0x563   : > { %3594 = vmatmul.msk.f32.gmra.mxu1 %vm1193_vm4, %v2529_v60  ;;  %3597 = vmatmul.msk.f32.gmra.mxu3 %vm1193_vm4, %v2529_v60 }
 0x564   : > { %2726 = vmatpush.msra.mxu1 %v3626_v13  ;;  %2749 = vmatpush.msrb.mxu3 %v3627_v14 }
 0x565   : > { %2816 = vmatpush.msra.mxu0 %v2777_v35 }
 0x566   : > { %2978 = vmatpush.msra.mxu3 %v2927_v30  ;;  %v3073_v30 = vld [vmem:[%s5781_s11 + $0x70] sm:$0xff] }
 0x567   : > { %2817 = vmatpush.msra.mxu0 %v2776_v12 }
 0x569   : > { %3083 = vmatpush.msrb.mxu0 %v3073_v30 }
 0x56b   : > { %3649 = vmatmul.msk.f32.vlgmr.msra.gmra.mxu1 %vm1193_vm4, %v2700_v21  ;;  %3652 = vmatmul.msk.f32.vlgmr.msrb.gmra.mxu3 %vm1193_vm4, %v2700_v21 }
 0x573   : > { %3650 = vmatmul.msk.f32.gmra.mxu1 %vm1193_vm4, %v2699_v15  ;;  %3653 = vmatmul.msk.f32.gmra.mxu3 %vm1193_vm4, %v2699_v15 }
 0x5bd   : > { %v2477_v31 = vpop.f32.mrf.mxu0 }
 0x5c3   : > { %v2500_v43 = vpop.f32.mrf.mxu2 }
 0x5c5   : > { %v2480_v48 = vpop.f32.mrf.mxu0 }
 0x5c8   : > { %v2421_v32 = vpop.f32.mrf.mxu1 }
 0x5c9   : > { %v2478_v20 = vadd.f32 %v2477_v31, %v2421_v32  ;;  %v2943_v31 = vld [vmem:[%s5779_s9 + $0xf8] sm:$0xff] }
 0x5ca   : > { %2998 = vmatpush.msrb.mxu2 %v2943_v31  ;;  %v3072_v31 = vld [vmem:[%s5781_s11 + $0x68] sm:$0xff] }
 0x5cb   : > { %v2503_v50 = vpop.f32.mrf.mxu2  ;;  %3084 = vmatpush.msrb.mxu0 %v3072_v31 }
 0x5cc   : > { %2999 = vmatpush.msrb.mxu2 %v2942_v37 }
 0x5cd   : > { %v2643_v38 = vpop.f32.mrf.mxu0 }
 0x5ce   : > { %v2444_v11 = vpop.f32.mrf.mxu3 }
 0x5cf   : > { %v2501_v51 = vadd.f32 %v2500_v43, %v2444_v11  ;;  %v2941_v43 = vld [vmem:[%s5779_s9 + $0xe8] sm:$0xff] }
 0x5d0   : > { %v2424_v36 = vpop.f32.mrf.mxu1  ;;  %3000 = vmatpush.msrb.mxu2 %v2941_v43 }
 0x5d1   : > { %v2481_v55 = vadd.f32 %v2480_v48, %v2424_v36  ;;  %v2926_v36 = vld [vmem:[%s5779_s9 + $0x70] sm:$0xff]  ;;  %v2940_v48 = vld [vmem:[%s5779_s9 + $0xe0] sm:$0xff] }
 0x5d2   : > { %2979 = vmatpush.msra.mxu3 %v2926_v36  ;;  %3001 = vmatpush.msrb.mxu2 %v2940_v48  ;;  %v3071_v36 = vld [vmem:[%s5781_s11 + $0x60] sm:$0xff] }
 0x5d3   : > { %v2666_v59 = vpop.f32.mrf.mxu2  ;;  %3085 = vmatpush.msrb.mxu0 %v3071_v36 }
 0x5d4   : > { %2980 = vmatpush.msra.mxu3 %v2925_v42 }
 0x5d5   : > { %v2646_v19 = vpop.f32.mrf.mxu0 }
 0x5d6   : > { %v2447_v44 = vpop.f32.mrf.mxu3 }
 0x5d7   : > { %v2504_v5 = vadd.f32 %v2503_v50, %v2447_v44  ;;  %v2957_v44 = vld [vmem:[%s5779_s9 + $0x168] sm:$0xff]  ;;  %v2923_v50 = vld [vmem:[%s5779_s9 + $0x58] sm:$0xff] }
 0x5d8   : > { %v2558_v45 = vpop.f32.mrf.mxu1 }
 0x5d9   : > { %v2587_v41 = vadd.f32 %v2558_v45, %v2478_v20  ;;  %v2924_v45 = vld [vmem:[%s5779_s9 + $0x60] sm:$0xff]  ;;  %v2955_v20 = vld [vmem:[%s5779_s9 + $0x158] sm:$0xff] }
 0x5da   : > { %2981 = vmatpush.msra.mxu3 %v2924_v45 }
 0x5db   : > { %v2672_v52 = vadd.f32 %v2643_v38, %v2587_v41  ;;  %v2669_v16 = vpop.f32.mrf.mxu2  ;;  %v2922_v41 = vld [vmem:[%s5779_s9 + $0x50] sm:$0xff] }
 0x5dc   : > { %v2938_v38 = vld [vmem:[%s5779_s9 + $0xd0] sm:$0xff]  ;;  %2982 = vmatpush.msra.mxu3 %v2923_v50 }
 0x5de   : > { %v2581_v49 = vpop.f32.mrf.mxu3  ;;  %2983 = vmatpush.msra.mxu3 %v2922_v41  ;;  %v3068_v41 = vld [vmem:[%s5781_s11 + $0x48] sm:$0xff] }
 0x5df   : > { %v2588_v56 = vadd.f32 %v2581_v49, %v2501_v51  ;;  %v2956_v49 = vld [vmem:[%s5779_s9 + $0x160] sm:$0xff]  ;;  %v2937_v51 = vld [vmem:[%s5779_s9 + $0xc8] sm:$0xff] }
 0x5e0   : > { %v2561_v40 = vpop.f32.mrf.mxu1 }
 0x5e1   : > { %v2589_v60 = vadd.f32 %v2561_v40, %v2481_v55  ;;  %v2673_v0 = vadd.f32 %v2666_v59, %v2588_v56  ;;  %v2939_v40 = vld [vmem:[%s5779_s9 + $0xd8] sm:$0xff]  ;;  %v2952_v55 = vld [vmem:[%s5779_s9 + $0x140] sm:$0xff] }
 0x5e2   : > { %3002 = vmatpush.msrb.mxu2 %v2939_v40  ;;  %v2919_v56 = vld [vmem:[%s5779_s9 + $0x38] sm:$0xff] }
 0x5e3   : > { %v2674_v58 = vadd.f32 %v2646_v19, %v2589_v60  ;;  %v2951_v59 = vld [vmem:[%s5779_s9 + $0x138] sm:$0xff]  ;;  %v2918_v60 = vld [vmem:[%s5779_s9 + $0x30] sm:$0xff]  ;;  %v2933_v19 = vld [vmem:[%s5779_s9 + $0xa8] sm:$0xff] }
 0x5e4   : > { %3003 = vmatpush.msrb.mxu2 %v2938_v38  ;;  %v3067_v38 = vld [vmem:[%s5781_s11 + $0x40] sm:$0xff] }
 0x5e6   : > { %v2584_v47 = vpop.f32.mrf.mxu3  ;;  %3004 = vmatpush.msrb.mxu2 %v2937_v51  ;;  %v3064_v51 = vld [vmem:[%s5781_s11 + $0x28] sm:$0xff] }
 0x5e7   : > { %v2590_v9 = vadd.f32 %v2584_v47, %v2504_v5  ;;  %v2921_v47 = vld [vmem:[%s5779_s9 + $0x48] sm:$0xff] }
 0x5e8   : > { %v2728_v54 = vpop.f32.mrf.mxu1  ;;  %2984 = vmatpush.msra.mxu3 %v2921_v47  ;;  %v3065_v47 = vld [vmem:[%s5781_s11 + $0x30] sm:$0xff] }
 0x5e9   : > { %v2757_v57 = vadd.f32 %v2728_v54, %v2672_v52  ;;  %v2675_v3 = vadd.f32 %v2669_v16, %v2590_v9  ;;  %v2953_v52 = vld [vmem:[%s5779_s9 + $0x148] sm:$0xff]  ;;  %v2936_v54 = vld [vmem:[%s5779_s9 + $0xc0] sm:$0xff]  ;;  %v2947_v16 = vld [vmem:[%s5779_s9 + $0x118] sm:$0xff] }
 0x5ea   : > { %3005 = vmatpush.msrb.mxu2 %v2936_v54  ;;  %v2948_v9 = vld [vmem:[%s5779_s9 + $0x120] sm:$0xff]  ;;  %v3061_v54 = vld [vmem:[%s5781_s11 + $0x10] sm:$0xff] }
 0x5eb   : > { %v2767_v61 = vadd.f32 %v2763_v53, %v2757_v57  ;;  %v2935_v57 = vld [vmem:[%s5779_s9 + $0xb8] sm:$0xff] }
 0x5ec   : > { %3006 = vmatpush.msrb.mxu2 %v2935_v57  ;;  %v3113_v57 = vld [vmem:[%s5783_s13 + $0x50] sm:$0xf] }
 0x5ed   : > { %v2771_v62 = vmax.f32 %v2767_v61, 0.0  ;;  %v2934_v61 = vld [vmem:[%s5779_s9 + $0xb0] sm:$0xff] }
 0x5ee   : > { %v2751_v2 = vpop.f32.mrf.mxu3  ;;  %3007 = vmatpush.msrb.mxu2 %v2934_v61  ;;  %v3110_v61 = vld [vmem:[%s5783_s13 + $0x38] sm:$0xff] }
 0x5ef   : > { %v2758_v6 = vadd.f32 %v2751_v2, %v2673_v0  ;;  %2818 = vmatmul.f32.vlgmr.msra.gmra.mxu0 %v2771_v62  ;;  %v2950_v62 = vld [vmem:[%s5779_s9 + $0x130] sm:$0xff]  ;;  %v2949_v2 = vld [vmem:[%s5779_s9 + $0x128] sm:$0xff] }
 0x5f0   : > { %v2731_v8 = vpop.f32.mrf.mxu1  ;;  %3008 = vmatpush.msrb.mxu2 %v2933_v19  ;;  %v3106_v19 = vld [vmem:[%s5783_s13 + $0x18] sm:$0xff] }
 0x5f1   : > { %v2768_v10 = vadd.f32 %v2764_v1, %v2758_v6  ;;  %v2759_v13 = vadd.f32 %v2731_v8, %v2674_v58  ;;  %v1711_v6 = vpop.permute.xlu1 %1710  ;;  %v2916_v58 = vld [vmem:[%s5779_s9 + $0x20] sm:$0xff] }
 0x5f2   : > { %v2932_v8 = vld [vmem:[%s5779_s9 + $0xa0] sm:$0xff] }
 0x5f3   : > { %v2772_v14 = vmax.f32 %v2768_v10, 0.0  ;;  %v2769_v15 = vadd.f32 %v2763_v53, %v2759_v13  ;;  %v2920_v53 = vld [vmem:[%s5779_s9 + $0x40] sm:$0xff]  ;;  %v1724_v10 = vpop.permute.xlu2 %1723  ;;  %3009 = vmatpush.msrb.mxu2 %v2932_v8 }
 0x5f4   : > { %2985 = vmatpush.msra.mxu3 %v2920_v53  ;;  %v1725_v63 = vrot.slane %v1724_v10, 6  ;;  %v3062_v53 = vld [vmem:[%s5781_s11 + $0x18] sm:$0xff] }
 0x5f5   : > { %v2773_v21 = vmax.f32 %v2769_v15, 0.0  ;;  %3654 = vmatmul.msk.f32.vlgmr.msra.gmra.mxu2 %vm1601_vm8, %v2772_v14  ;;  %v2915_v14 = vld [vmem:[%s5779_s9 + $0x18] sm:$0xff] }
 0x5f6   : > { %v2754_v4 = vpop.f32.mrf.mxu3  ;;  %2986 = vmatpush.msra.mxu3 %v2919_v56  ;;  %v2931_v15 = vld [vmem:[%s5779_s9 + $0x98] sm:$0xff]  ;;  %v3059_v56 = vld [vmem:[%s5781_s11] sm:$0xff] }
 0x5f7   : > { %v2760_v17 = vadd.f32 %v2754_v4, %v2675_v3  ;;  %2821 = vmatmul.f32.gmra.mxu0 %v2773_v21  ;;  %v2914_v21 = vld [vmem:[%s5779_s9 + $0x10] sm:$0xff]  ;;  %v1712_v4 = vrot.slane %v1711_v6, 6  ;;  %3010 = vmatpush.msrb.mxu2 %v2931_v15 }
 0x5f8   : > { %2987 = vmatpush.msra.mxu3 %v2918_v60  ;;  %v2930_v3 = vld [vmem:[%s5779_s9 + $0x90] sm:$0xff]  ;;  %v3111_v60 = vld [vmem:[%s5783_s13 + $0x40] sm:$0xff] }
 0x5f9   : > { %v2770_v18 = vadd.f32 %v2764_v1, %v2760_v17  ;;  %v2917_v1 = vld [vmem:[%s5779_s9 + $0x28] sm:$0xff]  ;;  %v2946_v17 = vld [vmem:[%s5779_s9 + $0x110] sm:$0xff]  ;;  %3011 = vmatpush.msrb.mxu2 %v2930_v3  ;;  %v3103_v3 = vld [vmem:[%s5783_s13] sm:$0xff] }
 0x5fa   : > { %2988 = vmatpush.msra.mxu3 %v2917_v1  ;;  %v3107_v1 = vld [vmem:[%s5783_s13 + $0x20] sm:$0xff] }
 0x5fb   : > { %v2774_v22 = vmax.f32 %v2770_v18, 0.0  ;;  %v2913_v18 = vld [vmem:[%s5779_s9 + $0x8] sm:$0xff] }
 0x5fc   : > { %2989 = vmatpush.msra.mxu3 %v2916_v58 }
 0x5fd   : > { %3655 = vmatmul.msk.f32.gmra.mxu2 %vm1601_vm8, %v2774_v22  ;;  %v2929_v22 = vld [vmem:[%s5779_s9 + $0x88] sm:$0xff]  ;;  %vm1726_vm8 = vcmask 523264  }
 0x5fe   : > { %2990 = vmatpush.msra.mxu3 %v2915_v14  ;;  %3012 = vmatpush.msrb.mxu2 %v2929_v22  ;;  %v3717_v22 = vld [vmem:[%s5784_s14] ss:$0 sm:$0xff] }
 0x600   : > { %2991 = vmatpush.msra.mxu3 %v2914_v21  ;;  %v3104_v21 = vld [vmem:[%s5783_s13 + $0x8] sm:$0xff] }
 0x602   : > { %2992 = vmatpush.msra.mxu3 %v2913_v18 }
 0x66c   : > { %v2819_v23 = vpop.f32.mrf.mxu0 }
 0x674   : > { %v2822_v25 = vpop.f32.mrf.mxu0 }
 0x678   : > { %v2842_v24 = vpop.f32.mrf.mxu2 }
 0x679   : > { %v2843_v28 = vadd.f32 %v2842_v24, %v2819_v23  ;;  %v2945_v24 = vld [vmem:[%s5779_s9 + $0x108] sm:$0xff] }
 0x680   : > { %v2845_v26 = vpop.f32.mrf.mxu2 }
 0x681   : > { %v2846_v27 = vadd.f32 %v2845_v26, %v2822_v25 }
 0x683   : > { %3656 = vmatpush.msk.msrb.mxu1 %vm1658_vm9, %v2846_v27  ;;  %vm5607_vm9 = vmor %vm1717_vm2, %vm1716_vm1  ;;  %v2912_v27 = vld [vmem:[%s5779_s9] sm:$0xff] }
 0x684   : > { %2993 = vmatpush.msra.mxu3 %v2912_v27 }
 0x685   : > { %2869 = vmatpush.msrb.mxu1 %v2843_v28  ;;  %v2928_v28 = vld [vmem:[%s5779_s9 + $0x80] sm:$0xff] }
 0x686   : > { %3657 = vmatmul.msk.f32.vlgmr.msrb.gmra.mxu1 %vm1654_vm10, %v2775_v29  ;;  %vm5616_vm10 = vmor %vm1730_vm5, %vm1729_vm3  ;;  %v1714_v29 = vsel %vm1713_vm6, %v1712_v4, %v1711_v6  ;;  %3013 = vmatpush.msrb.mxu2 %v2928_v28  ;;  %v3716_v4 = vld [vmem:[%s5782_s12] ss:$0 sm:$0xff] }
 0x687   : > { %3662 = vmatpush.msk.msrb.mxu3 %vm562_vm0, %v3113_v57  ;;  %vm3078_vm0 = vcmask 982016  }
 0x703   : > { %v2871_v32 = vpop.f32.mrf.mxu1 }
 0x704   : > { %2884 = vst.sshfl [vmem:[#allocation1] sm:$0xff pattern:$0x73625140] %v2871_v32  ;;  %v3658_v33 = vrot.slane %v2871_v32, 9 }
 0x705   : > { %2874 = vst.msk [vmem:[#allocation3 + $0x1] sm:$0x1] %vm1682_vm11, %v2871_v32  ;;  %vm2975_vm11 = vcmask 130048  }
 0x706   : > { %2878 = vrot.lane.b32.xlu0 %v3658_v33, %s3783_s23  ;;  %v1727_v33 = vsel %vm1726_vm8, %v1725_v63, %v1724_v10  ;;  %s3230_s23 = sshll.u32 %s488_s29, 1 }
 0x70b   : > { %v2886_v34 = vld [vmem:[#allocation1 + $0x1] ss:$4 sm:$0xff] }
 0x70c   : > { %2891 = vst.sshfl [vmem:[#allocation1] sm:$0xff pattern:$0x73625140] %v2871_v32 }
 0x70e   : > { %1700 = vrot.lane.b32.xlu0 %v4966_v7, %s3786_s20  ;;  %v2959_v7 = vld [vmem:[%s5779_s9 + $0x178] sm:$0xff] }
 0x70f   : > { %3018 = vmatpush.msra.mxu1 %v2959_v7 }
 0x711   : > { %3019 = vmatpush.msra.mxu1 %v2958_v39  ;;  %v3070_v39 = vld [vmem:[%s5781_s11 + $0x58] sm:$0xff] }
 0x712   : > { %3086 = vmatpush.msrb.mxu0 %v3070_v39 }
 0x713   : > { %v2893_v35 = vld [vmem:[#allocation1 + $0x1] ss:$4 sm:$0xff]  ;;  %3020 = vmatpush.msra.mxu1 %v2957_v44 }
 0x714   : > { %v3659_v11 = vrot.slane %v2893_v35, 9  ;;  %2902 = vst.sshfl [vmem:[#allocation1] sm:$0xff pattern:$0x73625140] %v2871_v32  ;;  %v2944_v32 = vld [vmem:[%s5779_s9 + $0x100] sm:$0xff]  ;;  %v3069_v44 = vld [vmem:[%s5781_s11 + $0x50] sm:$0xff] }
 0x715   : > { %3021 = vmatpush.msra.mxu1 %v2956_v49  ;;  %v2960_v35 = vld [vmem:[%s5779_s9 + $0x180] sm:$0xff]  ;;  %3087 = vmatpush.msrb.mxu0 %v3069_v44 }
 0x716   : > { %2896 = vrot.lane.b32.xlu1 %v3659_v11, %s5804_s27 }
 0x717   : > { %3022 = vmatpush.msra.mxu1 %v2955_v20  ;;  %3088 = vmatpush.msrb.mxu0 %v3068_v41 }
 0x719   : > { %3023 = vmatpush.msra.mxu1 %v2954_v46  ;;  %v3066_v46 = vld [vmem:[%s5781_s11 + $0x38] sm:$0xff]  ;;  %3089 = vmatpush.msrb.mxu0 %v3067_v38 }
 0x71b   : > { %v2904_v12 = vld [vmem:[#allocation1 + $0x2] ss:$4 sm:$0xff]  ;;  %3024 = vmatpush.msra.mxu1 %v2953_v52  ;;  %3090 = vmatpush.msrb.mxu0 %v3066_v46 }
 0x71c   : > { %2905 = vrot.lane.b32.xlu2 %v2904_v12, %s5805_s24  ;;  %v3063_v52 = vld [vmem:[%s5781_s11 + $0x20] sm:$0xff] }
 0x71d   : > { %3025 = vmatpush.msra.mxu1 %v2952_v55  ;;  %3091 = vmatpush.msrb.mxu0 %v3065_v47  ;;  %v3060_v55 = vld [vmem:[%s5781_s11 + $0x8] sm:$0xff] }
 0x71e   : > { %2887 = vrot.lane.b32.xlu1 %v2886_v34, %s3786_s20  ;;  %v2961_v34 = vld [vmem:[%s5779_s9 + $0x188] sm:$0xff]  ;;  %s490_s20 = scalar_lea.vmem [#allocation4], %s3230_s23  ;;  %s3738_s23 = scalar_lea.hbm %s5785_s15, 4 }
 0x71f   : > { %3026 = vmatpush.msra.mxu1 %v2951_v59  ;;  %3052 = vmatpush.msra.mxu2 %v2961_v34  ;;  %v3112_v59 = vld [vmem:[%s5783_s13 + $0x48] sm:$0xff]  ;;  %s3161_s24 = sshll.u32 %s490_s20, 4  ;;  %p3740_p1 = scmp.lt.s32.totalorder %s3738_s23, %s3734_s30  ;;  %s3162_s24 = int_to_ptr.vmem [resolvable:$true] %s3161_s24 }
 0x720   : > { %3092 = vmatpush.msrb.mxu0 %v3064_v51  ;;  %3130 = vmatpush.msrb.mxu3 %v3112_v59 }
 0x721   : > { %3027 = vmatpush.msra.mxu1 %v2950_v62  ;;  %3053 = vmatpush.msra.mxu2 %v2960_v35  ;;  %v3109_v62 = vld [vmem:[%s5783_s13 + $0x30] sm:$0xff]  ;;  %p3741_p2 = por %p3740_p1, %p3739_p0 }
 0x722   : > { %3093 = vmatpush.msrb.mxu0 %v3063_v52  ;;  %3131 = vmatpush.msrb.mxu3 %v3111_v60 }
 0x723   : > { %3028 = vmatpush.msra.mxu1 %v2949_v2  ;;  %v3715_v2 = vld [vmem:[%s5780_s10] ss:$0 sm:$0xff]  ;;  %p3742_p3 = pnand %p3741_p2, %p3737_p13 }
 0x724   : > { %3094 = vmatpush.msrb.mxu0 %v3062_v53  ;;  %3132 = vmatpush.msrb.mxu3 %v3110_v61 }
 0x725   : > { %3029 = vmatpush.msra.mxu1 %v2948_v9 }
 0x726   : > { %3095 = vmatpush.msrb.mxu0 %v3061_v54  ;;  %3133 = vmatpush.msrb.mxu3 %v3109_v62 }
 0x727   : > { %3030 = vmatpush.msra.mxu1 %v2947_v16  ;;  %v3105_v16 = vld [vmem:[%s5783_s13 + $0x10] sm:$0xff] }
 0x728   : > { %3096 = vmatpush.msrb.mxu0 %v3060_v55 }
 0x729   : > { %3031 = vmatpush.msra.mxu1 %v2946_v17 }
 0x72a   : > { %3097 = vmatpush.msrb.mxu0 %v3059_v56 }
 0x72b   : > { %3032 = vmatpush.msra.mxu1 %v2945_v24 }
 0x72d   : > { %3033 = vmatpush.msra.mxu1 %v2944_v32 }
 0x776   : > { %v2906_v12 = vpop.permute.xlu2 %2905 }
 0x777   : > { %v2907_v37 = vrot.slane %v2906_v12, 6 }
 0x778   : > { %v2879_v0 = vpop.permute.xlu0 %2878 }
 0x779   : > { %v2880_v5 = vrot.slane %v2879_v0, 6  ;;  %v2908_v45 = vsel %vm1726_vm8, %v2907_v37, %v2906_v12 }
 0x77b   : > { %v2881_v13 = vsel %vm1690_vm14, %v2880_v5, %v2879_v0  ;;  %v3108_v0 = vld [vmem:[%s5783_s13 + $0x28] sm:$0xff] }
 0x77c   : > { %2883 = vst.msk [vmem:[#allocation3 + $0x1] sm:$0x5] %vm4990_vm15, %v2881_v13  ;;  %3134 = vmatpush.msrb.mxu3 %v3108_v0 }
 0x77e   : > { %3135 = vmatpush.msrb.mxu3 %v3107_v1 }
 0x780   : > { %v1701_v26 = vpop.permute.xlu0 %1700  ;;  %3136 = vmatpush.msrb.mxu3 %v3106_v19 }
 0x781   : > { %1704 = vst.msk [vmem:[#allocation3 + $0x2] sm:$0x1] %vm1703_vm7, %v1701_v26 }
 0x782   : > { %1719 = vst.msk [vmem:[#allocation3 + $0x2] sm:$0x5] %vm5607_vm9, %v1714_v29  ;;  %3137 = vmatpush.msrb.mxu3 %v3105_v16 }
 0x783   : > { %1732 = vst.msk [vmem:[#allocation3 + $0x4] sm:$0x5] %vm5616_vm10, %v1727_v33 }
 0x784   : > { %3138 = vmatpush.msrb.mxu3 %v3104_v21 }
 0x786   : > { %3139 = vmatpush.msrb.mxu3 %v3103_v3 }
 0x788   : > { %v2897_v11 = vpop.permute.xlu1 %2896 }
 0x789   : > { %v2898_v7 = vrot.slane %v2897_v11, 6 }
 0x78b   : > { %v2899_v43 = vsel %vm1713_vm6, %v2898_v7, %v2897_v11 }
 0x790   : > { %v2888_v42 = vpop.permute.xlu1 %2887 }
 0x791   : > { %2890 = vst.msk [vmem:[#allocation3 + $0x3] sm:$0x1] %vm1703_vm7, %v2888_v42 }
 0x792   : > { %2901 = vst.msk [vmem:[#allocation3 + $0x3] sm:$0x5] %vm5607_vm9, %v2899_v43 }
 0x793   : > { %2910 = vst.msk [vmem:[#allocation3 + $0x5] sm:$0x5] %vm5616_vm10, %v2908_v45 }
 0x79a   : > { %v2911_v48 = vld [vmem:[#allocation3] sm:$0xff] }
 0x79b   : > { %2967 = vst [vmem:[#allocation1] ss:$4 sm:$0xff] %v2911_v48 }
 0x7a2   : > { %v2968_v49 = vld.sshfl [vmem:[#allocation1] sm:$0xff pattern:$0x73625140]  ;;  %v2969_v50 = vld.sshfl [vmem:[#allocation1 + $0x8] sm:$0xff pattern:$0x73625140] }
 0x7a3   : > { %2994 = vmatmul.f32.vlgmr.msra.gmra.mxu3 %v2968_v49  ;;  %3014 = vmatmul.f32.vlgmr.msrb.gmra.mxu2 %v2969_v50  ;;  %v2970_v40 = vld.sshfl [vmem:[#allocation1 + $0x10] sm:$0xff pattern:$0x73625140]  ;;  %v2971_v20 = vld.sshfl [vmem:[#allocation1 + $0x18] sm:$0xff pattern:$0x73625140] }
 0x7a4   : > { %3034 = vmatmul.f32.vlgmr.msra.gmra.mxu1 %v2970_v40 }
 0x7ab   : > { %3660 = vmatmul.msk.f32.vlgmr.msra.gmra.mxu2 %vm2975_vm11, %v2971_v20 }
 0x821   : > { %v3035_v9 = vpop.f32.mrf.mxu1 }
 0x826   : > { %v2995_v5 = vpop.f32.mrf.mxu3  ;;  %v3015_v6 = vpop.f32.mrf.mxu2 }
 0x827   : > { %v2996_v58 = vadd.f32 %v3715_v2, %v2995_v5 }
 0x829   : > { %v3016_v8 = vadd.f32 %v3015_v6, %v2996_v58 }
 0x82b   : > { %v3036_v10 = vadd.f32 %v3035_v9, %v3016_v8 }
 0x82e   : > { %v3055_v13 = vpop.f32.mrf.mxu2 }
 0x82f   : > { %v3056_v14 = vadd.f32 %v3055_v13, %v3036_v10 }
 0x831   : > { %v3058_v15 = vmax.f32 %v3056_v14, 0.0 }
 0x833   : > { %3661 = vmatmul.msk.f32.vlgmr.msrb.gmra.mxu0 %vm3078_vm0, %v3058_v15 }
 0x8b0   : > { %v3099_v17 = vpop.f32.mrf.mxu0 }
 0x8b1   : > { %v3100_v63 = vadd.f32 %v3716_v4, %v3099_v17 }
 0x8b3   : > { %v3102_v18 = vmax.f32 %v3100_v63, 0.0 }
 0x8b5   : > { %3663 = vmatmul.msk.f32.vlgmr.msrb.gmra.mxu3 %vm1193_vm4, %v3102_v18 }
 0x938   : > { %v3141_v23 = vpop.f32.mrf.mxu3 }
 0x939   : > { %v3142_v24 = vadd.f32 %v3717_v22, %v3141_v23 }
 0x93b   : > { %v3145_v25 = vrot.slane %v3142_v24, 1  ;;  %3147 = vst [vmem:[%s490_s20] sm:$0x1] %v3142_v24 }
 0x93d   : > { %3148 = vst [vmem:[%s490_s20 + $0x1] sm:$0x1] %v3145_v25 }
 0x93e   : > { %3745 = shalt.err (!%p3742_p3)
}
 0x93f   : > { %s3787_s29 = smov 16   ;;  %s3788_s27 = smov 1  }
 0x940   : > { %3669 = dma.vmem_to_hbm [thread:$0]  (%p3904_p5), %s3162_s24, 32, %s3164_s26, %s3150_s22, %s3787_s29, %s3787_s29, %s3788_s27  }
 0x941 PF: > { %p3675_p4 = scmp.ge.s32.totalorder %s3780_s21, 2  ;;  %s3178_s17 = sand.u32 1, %s3768_s18  }
 0x942   : > { %s3179_s16 = scalar_lea.sflag [#allocation5], %s3178_s17 }
 0x943   : > { %p3672_p7 = pnand %p3675_p4, %p3908_p6 }
 0x945   : > { %p3673_p8 = pneg %p3672_p7 }
 0x947   : > { %3763 = dma.done.wait (%p3673_p8), %s3179_s16, 32  }
 0x948   : > { %3765 = vsyncadd (%p3673_p8), %s3179_s16, 4294967264  ;;  %s5811_s21 = sld [smem:[#allocation8_spill]]  ;;  %s5814_s18 = smov %s3772_s19 }
 0x949   : > { %s5812_s1 = sld [smem:[#allocation7_spill]] }
 0x94a   : > { %s5813_s20 = sld [smem:[#allocation9_spill]] }
 0x94e   : > { %p25_p9 = scmp.ge.s32.totalorder %s5811_s21, 4  }
 0x94f   : > { %s5815_s19 = smov %s5812_s1 }
 0x950   :  { %27 = sbr.rel (!%p25_p9) target bundleno = 6 (0x6), region = 130 }
 0x955   :  { %3185 = vsyncpa [#allocation5], 1 }
 0x956   :  { %3187 = vsyncpa [#allocation5 + $0x1], 1 }

</bundles_post_ra>
